<compile_context>
chip_gen: v7x
topology: tpu7x:2x2x1
jax: 0.10.0
libtpu: 0.0.40
codegen_flags: <defaults>
</compile_context>

<pallas_src>
import functools
import math

import jax
import jax.numpy as jnp
from jax.experimental import pallas as pl
from jax.experimental.pallas import tpu as pltpu

BERT_DIM_EMB = 768
TIME_CLIMATE_DIM = 21
SEQ_LEN = 34  # fixed by .repeat(1, 34, 1) in the reference forward

# Packed-parameter ordering used when flattening for the pallas_call.
_PACKED_KEYS = ("k_w1", "k_w23", "k_wvo", "k_b",
                "a_w1", "a_w23", "a_mw", "a_b",
                "o_w1", "o_w23", "o_mw", "o_b")


# -----------------------------------------------------------------------------
# In-kernel helpers (pure jnp on loaded values; refs are sliced at use site)
# -----------------------------------------------------------------------------
def _softmax_lastdim(x):
    x = x - jnp.max(x, axis=-1, keepdims=True)
    e = jnp.exp(x)
    return e * pl.reciprocal(jnp.sum(e, axis=-1, keepdims=True), approx=True)


def _gen3(x_bf16, w1_ref, w23_ref, b_ref, *, fdim, out_dim):
    """key/val/query generator MLPs of one AttentionBlock.

    Layer 1 is one wide bf16 matmul (weights concatenated to (din, 3F)); layers
    2/3 are per-path matmuls (weights stacked as (3, F, F+out_dim)).  Bias
    layout in b_ref: [b1_k|b1_v|b1_q | b2_k|b2_v|b2_q | b3_k|b3_v|b3_q | mha...]
    """
    F, D = fdim, out_dim
    y1 = jnp.maximum(
        jnp.dot(x_bf16, w1_ref[...], preferred_element_type=jnp.float32)
        + b_ref[:, 0:3 * F], 0.0)                                     # (N, 3F)
    ys = []
    for p in range(3):                                                # k, v, q paths
        h_in = y1[:, p * F:(p + 1) * F].astype(jnp.bfloat16)
        w23 = w23_ref[p]                                              # (F, F+D) bf16
        b2 = b_ref[:, 3 * F + p * F: 3 * F + (p + 1) * F]
        b3 = b_ref[:, 6 * F + p * D: 6 * F + (p + 1) * D]
        h2 = jnp.maximum(
            jnp.dot(h_in, w23[:, 0:F], preferred_element_type=jnp.float32) + b2, 0.0)
        ys.append(jnp.dot(h2.astype(jnp.bfloat16), w23[:, F:F + D],
                          preferred_element_type=jnp.float32) + b3)
    key = jnp.maximum(ys[0], 0.0)                 # key_gen ReLU tail
    val = jnp.maximum(ys[1], 0.0)                 # val_gen ReLU tail
    qry = _softmax_lastdim(ys[2])                 # query_gen Softmax tail
    return key, val, qry


def _mha(qry, key, val, mw_ref, b_ref, b_off, *, nheads, bt, seq):
    """torch.nn.MultiheadAttention (batch_first) for Bt sequences.

    Heads handled via static lane slices + per-head out-projection accumulation
    (no reshape/transpose relayouts, no concat).  mw_ref: (4, H, H) = q|k|v|o.
    """
    Hd = mw_ref.shape[-1]
    hd = Hd // nheads
    scale = 1.0 / math.sqrt(hd)

    def proj(x, i):
        b = b_ref[:, b_off + i * Hd: b_off + (i + 1) * Hd]
        y = jnp.dot(x.astype(jnp.bfloat16), mw_ref[i],
                    preferred_element_type=jnp.float32) + b
        return y.astype(jnp.bfloat16).reshape(bt, seq, Hd)

    qp, kp, vp = proj(qry, 0), proj(key, 1), proj(val, 2)             # (Bt,S,H) bf16
    wo = mw_ref[3]                                                    # (H, H) bf16

    attn = None
    for h in range(nheads):
        sl = slice(h * hd, (h + 1) * hd)
        s = jnp.einsum("bqd,bkd->bqk", qp[:, :, sl], kp[:, :, sl],
                       preferred_element_type=jnp.float32) * scale    # (Bt,S,S)
        p = _softmax_lastdim(s).astype(jnp.bfloat16)
        o = jnp.einsum("bqk,bkd->bqd", p, vp[:, :, sl],
                       preferred_element_type=jnp.float32)            # (Bt,S,hd)
        contrib = jnp.einsum("bqd,do->bqo", o.astype(jnp.bfloat16), wo[sl, :],
                             preferred_element_type=jnp.float32)      # (Bt,S,H)
        attn = contrib if attn is None else attn + contrib
    bo = b_ref[:, b_off + 3 * Hd: b_off + 4 * Hd]
    return attn + bo[None]                                            # (Bt,S,H) f32


# -----------------------------------------------------------------------------
# Fused forward kernel (one grid step = Bt batch elements)
# -----------------------------------------------------------------------------
def fused_forward_kernel(gen_ref, ocu_ref,
                         kw1_ref, kw23_ref, kwvo_ref, kb_ref,
                         aw1_ref, aw23_ref, amw_ref, ab_ref,
                         ow1_ref, ow23_ref, omw_ref, ob_ref,
                         out_ref, *, nheads, fdim, hdim, edim, bt, seq):
    F, H, E = fdim, hdim, edim
    bf16 = jnp.bfloat16

    # ---- klyma block, exact single-row reduction ----------------------------
    # Input rows are identical (general_data repeated) -> uniform attention ->
    # every output row equals out_proj(v_proj(val_gen(general_data))).
    g = gen_ref[...].reshape(bt, gen_ref.shape[-1]).astype(bf16)       # (Bt, 21)
    h1 = jnp.maximum(jnp.dot(g, kw1_ref[...], preferred_element_type=jnp.float32)
                     + kb_ref[:, 0:F], 0.0)
    h2 = jnp.maximum(jnp.dot(h1.astype(bf16), kw23_ref[:, 0:F],
                             preferred_element_type=jnp.float32)
                     + kb_ref[:, F:2 * F], 0.0)
    kval = jnp.maximum(jnp.dot(h2.astype(bf16), kw23_ref[:, F:F + H],
                               preferred_element_type=jnp.float32)
                       + kb_ref[:, 2 * F:2 * F + H], 0.0)
    kvp = (jnp.dot(kval.astype(bf16), kwvo_ref[:, 0:H],
                   preferred_element_type=jnp.float32)
           + kb_ref[:, 2 * F + H:2 * F + 2 * H])
    klym = (jnp.dot(kvp.astype(bf16), kwvo_ref[:, H:2 * H],
                    preferred_element_type=jnp.float32)
            + kb_ref[:, 2 * F + 2 * H:2 * F + 3 * H])
    gate = _softmax_lastdim(klym)                                      # (Bt, H) f32

    # ---- actv block ----------------------------------------------------------
    x = ocu_ref[...].reshape(bt * seq, ocu_ref.shape[-1]).astype(bf16)  # (Bt*S, 768)
    key, val, qry = _gen3(x, aw1_ref, aw23_ref, ab_ref, fdim=F, out_dim=H)
    actv = _mha(qry, key, val, amw_ref, ab_ref, 6 * F + 3 * H,
                nheads=nheads, bt=bt, seq=seq)                         # (Bt, S, H)

    # hidden = actv_repr * softmax(klym_repr, axis=-1)  (klym rows identical)
    hidden = actv * gate[:, None, :]

    # ---- out block -----------------------------------------------------------
    h_flat = hidden.reshape(bt * seq, H).astype(bf16)
    key, val, qry = _gen3(h_flat, ow1_ref, ow23_ref, ob_ref, fdim=F, out_dim=E)
    out = _mha(qry, key, val, omw_ref, ob_ref, 6 * F + 3 * E,
               nheads=nheads, bt=bt, seq=seq)                          # (Bt, S, E)

    out_ref[...] = out.astype(out_ref.dtype)


# -----------------------------------------------------------------------------
# Wrapper (single pallas_call for the whole model)
# -----------------------------------------------------------------------------
def _pick_block_batch(B, max_bt=8):
    """Largest divisor of B that is <= max_bt, preferring >= 2 grid steps."""
    divs = [d for d in range(1, min(B, max_bt) + 1) if B % d == 0]
    two_step = [d for d in divs if B // d >= 2]
    return max(two_step) if two_step else max(divs)


def space_act_optim_forward(packed, ocu_ber_emb, espai_enc, general_data, h, c,
                            *, nheads):
    del espai_enc, h, c  # unused in the reference forward as well
    B = general_data.shape[0]
    seq = ocu_ber_emb.shape[1]          # 34 per the reference model
    din = ocu_ber_emb.shape[-1]
    F = packed["a_w23"].shape[1]
    H = packed["a_w23"].shape[2] - F
    E = packed["o_w23"].shape[2] - F

    bt = _pick_block_batch(B)
    gen = general_data.reshape(B, 1, TIME_CLIMATE_DIM)
    ocu = ocu_ber_emb                    # cast to bf16 inside the kernel

    weights = [packed[k] for k in _PACKED_KEYS]

    def _const_spec(a):
        n = a.ndim
        # Full-array block, constant index map -> DMA'd once, resident all steps.
        return pl.BlockSpec(a.shape, lambda b, n=n: (0,) * n)

    kernel = functools.partial(fused_forward_kernel, nheads=nheads,
                               fdim=F, hdim=H, edim=E, bt=bt, seq=seq)

    # Rough cost hint so XLA schedules neighbours around this tiny kernel.
    actv_row = din * 3 * F + 3 * F * F + 3 * F * H + 4 * H * H + 2 * seq * H
    out_row = H * 3 * F + 3 * F * F + 3 * F * E + 4 * E * E + 2 * seq * E
    klyma_seq = TIME_CLIMATE_DIM * F + F * F + F * H + 2 * H * H
    flops = 2 * B * (seq * (actv_row + out_row) + klyma_seq)
    transcendentals = B * (seq * (H + E) + 2 * nheads * seq * seq + H)
    bytes_accessed = (int(ocu.size) * ocu.dtype.itemsize
                      + int(gen.size) * gen.dtype.itemsize
                      + sum(int(w.size) * w.dtype.itemsize for w in weights)
                      + B * seq * E * 4)
    cost = pl.CostEstimate(flops=flops, transcendentals=transcendentals,
                           bytes_accessed=bytes_accessed)

    return pl.pallas_call(
        kernel,
        out_shape=jax.ShapeDtypeStruct((B, seq, E), jnp.float32),
        grid=(B // bt,),
        in_specs=[pl.BlockSpec((bt, 1, TIME_CLIMATE_DIM), lambda b: (b, 0, 0)),
                  pl.BlockSpec((bt, seq, din), lambda b: (b, 0, 0))]
                 + [_const_spec(a) for a in weights],
        out_specs=pl.BlockSpec((bt, seq, E), lambda b: (b, 0, 0)),
        compiler_params=pltpu.CompilerParams(
            dimension_semantics=("parallel",)),  # both TCs on v7x when grid >= 2
        cost_estimate=cost,
    )(gen, ocu, *weights)


# -----------------------------------------------------------------------------
# Deterministic parameter init (xavier-uniform weights in (in,out) layout, zero
# biases) plus packing into the consolidated / bf16 kernel layout.
# -----------------------------------------------------------------------------
def _xavier(key, fan_in, fan_out):
    bound = math.sqrt(6.0 / (fan_in + fan_out))
    return jax.random.uniform(key, (fan_in, fan_out), jnp.float32, -bound, bound)


def _init_gen(key, din, fdim, dout):
    k1, k2, k3 = jax.random.split(key, 3)
    return dict(w1=_xavier(k1, din, fdim), b1=jnp.zeros((fdim,), jnp.float32),
                w2=_xavier(k2, fdim, fdim), b2=jnp.zeros((fdim,), jnp.float32),
                w3=_xavier(k3, fdim, dout), b3=jnp.zeros((dout,), jnp.float32))


def _init_mha(key, edim):
    kq, kk, kv, ko = jax.random.split(key, 4)
    zb = jnp.zeros((edim,), jnp.float32)
    return dict(wq=_xavier(kq, edim, edim), bq=zb,
                wk=_xavier(kk, edim, edim), bk=zb,
                wv=_xavier(kv, edim, edim), bv=zb,
                wo=_xavier(ko, edim, edim), bo=zb)


def _init_block(key, in_dim, hidden_dim, attn_fc):
    kk, kv, kq, km = jax.random.split(key, 4)
    p = dict(key=_init_gen(kk, in_dim, attn_fc, hidden_dim),
             val=_init_gen(kv, in_dim, attn_fc, hidden_dim),
             qry=_init_gen(kq, in_dim, attn_fc, hidden_dim))
    p.update(_init_mha(km, hidden_dim))
    return p


def _init_klyma(key, in_dim, hidden_dim, attn_fc):
    # Only the value path + v/out projections affect the klyma output when all
    # input rows are identical (uniform self-attention); key/query generators
    # and q/k projections cancel exactly, so they are not created.
    kv, km = jax.random.split(key)
    g = _init_gen(kv, in_dim, attn_fc, hidden_dim)
    kvw, kow = jax.random.split(km)
    zb = jnp.zeros((hidden_dim,), jnp.float32)
    return dict(v_w1=g["w1"], v_b1=g["b1"], v_w2=g["w2"], v_b2=g["b2"],
                v_w3=g["w3"], v_b3=g["b3"],
                wv=_xavier(kvw, hidden_dim, hidden_dim), bv=zb,
                wo=_xavier(kow, hidden_dim, hidden_dim), bo=zb)


def init_space_act_optim(key, espai_emb_dim, hidden_dim, attnFCdim):
    k1, k2, k3 = jax.random.split(key, 3)
    return dict(klyma=_init_klyma(k1, TIME_CLIMATE_DIM, hidden_dim, attnFCdim),
                actv=_init_block(k2, BERT_DIM_EMB, hidden_dim, attnFCdim),
                out=_init_block(k3, hidden_dim, espai_emb_dim, attnFCdim))


def pack_params(params):
    """Pack raw per-matrix params into 12 resident kernel arrays (weights bf16)."""
    bf = lambda a: a.astype(jnp.bfloat16)

    def blk(p):
        gens = [p["key"], p["val"], p["qry"]]
        w1 = bf(jnp.concatenate([g["w1"] for g in gens], axis=1))          # (din, 3F)
        w23 = bf(jnp.stack([jnp.concatenate([g["w2"], g["w3"]], axis=1)
                            for g in gens]))                                # (3, F, F+H)
        mw = bf(jnp.stack([p["wq"], p["wk"], p["wv"], p["wo"]]))            # (4, H, H)
        b = jnp.concatenate([g["b1"] for g in gens] + [g["b2"] for g in gens]
                            + [g["b3"] for g in gens]
                            + [p["bq"], p["bk"], p["bv"], p["bo"]]
                            ).astype(jnp.float32)[None, :]                  # (1, 6F+7H)
        return w1, w23, mw, b

    kl = params["klyma"]
    k_w1 = bf(kl["v_w1"])                                                   # (21, F)
    k_w23 = bf(jnp.concatenate([kl["v_w2"], kl["v_w3"]], axis=1))           # (F, F+H)
    k_wvo = bf(jnp.concatenate([kl["wv"], kl["wo"]], axis=1))               # (H, 2H)
    k_b = jnp.concatenate([kl["v_b1"], kl["v_b2"], kl["v_b3"],
                           kl["bv"], kl["bo"]]).astype(jnp.float32)[None, :]
    a_w1, a_w23, a_mw, a_b = blk(params["actv"])
    o_w1, o_w23, o_mw, o_b = blk(params["out"])
    return dict(k_w1=k_w1, k_w23=k_w23, k_wvo=k_wvo, k_b=k_b,
                a_w1=a_w1, a_w23=a_w23, a_mw=a_mw, a_b=a_b,
                o_w1=o_w1, o_w23=o_w23, o_mw=o_mw, o_b=o_b)


# -----------------------------------------------------------------------------
if __name__ == "__main__":
    espai_emb_dim = 32
    hidden_dim = 32
    lstm_nl = 2
    nheads = 4
    attnFCdim = 64
    B = 2

    root = jax.random.PRNGKey(0)
    kp, k1, k2, k3 = jax.random.split(root, 4)

    params = init_space_act_optim(kp, espai_emb_dim, hidden_dim, attnFCdim)
    packed = pack_params(params)           # packed once, outside jit

    ocu_ber_emb = jax.random.normal(k1, (B, SEQ_LEN, BERT_DIM_EMB), jnp.float32)
    espai_enc = jax.random.randint(k2, (B, SEQ_LEN), 0, 54, jnp.int32)   # unused
    general_data = jax.random.normal(k3, (B, TIME_CLIMATE_DIM), jnp.float32)
    h = jnp.zeros((lstm_nl, B, hidden_dim), jnp.float32)                 # unused
    c = jnp.zeros((lstm_nl, B, hidden_dim), jnp.float32)                 # unused

    fwd = jax.jit(functools.partial(space_act_optim_forward, nheads=nheads))
    out = fwd(packed, ocu_ber_emb, espai_enc, general_data, h, c)
    out = jax.block_until_ready(out)

    assert out.shape == (B, SEQ_LEN, espai_emb_dim), out.shape
    assert out.dtype == jnp.float32
    print("KERNEL_OK")
</pallas_src>

<mosaic_0001>
module attributes {stable_mosaic.version = 11 : i64} {
  func.func @fused_forward_kernel(%arg0: i32, %arg1: memref<1x1x21xf32, #tpu.memory_space<vmem>>, %arg2: memref<1x34x768xf32, #tpu.memory_space<vmem>>, %arg3: memref<21x64xbf16, #tpu.memory_space<vmem>>, %arg4: memref<64x96xbf16, #tpu.memory_space<vmem>>, %arg5: memref<32x64xbf16, #tpu.memory_space<vmem>>, %arg6: memref<1x224xf32, #tpu.memory_space<vmem>>, %arg7: memref<768x192xbf16, #tpu.memory_space<vmem>>, %arg8: memref<3x64x96xbf16, #tpu.memory_space<vmem>>, %arg9: memref<4x32x32xbf16, #tpu.memory_space<vmem>>, %arg10: memref<1x608xf32, #tpu.memory_space<vmem>>, %arg11: memref<32x192xbf16, #tpu.memory_space<vmem>>, %arg12: memref<3x64x96xbf16, #tpu.memory_space<vmem>>, %arg13: memref<4x32x32xbf16, #tpu.memory_space<vmem>>, %arg14: memref<1x608xf32, #tpu.memory_space<vmem>>, %arg15: memref<1x34x32xf32, #tpu.memory_space<vmem>>) attributes {dimension_semantics = [#tpu.dimension_semantics<parallel>], iteration_bounds = array<i64: 2>, scalar_prefetch = 0 : i64, scratch_operands = 0 : i64, tpu.core_type = #tpu.core_type<tc>, window_params = [{transform_indices = @transform_0, window_bounds = array<i64: 1, 1, 21>}, {transform_indices = @transform_1, window_bounds = array<i64: 1, 34, 768>}, {pipeline_mode = #tpu.pipeline_mode<synchronous>, transform_indices = @transform_2, window_bounds = array<i64: 21, 64>}, {pipeline_mode = #tpu.pipeline_mode<synchronous>, transform_indices = @transform_3, window_bounds = array<i64: 64, 96>}, {pipeline_mode = #tpu.pipeline_mode<synchronous>, transform_indices = @transform_4, window_bounds = array<i64: 32, 64>}, {pipeline_mode = #tpu.pipeline_mode<synchronous>, transform_indices = @transform_5, window_bounds = array<i64: 1, 224>}, {pipeline_mode = #tpu.pipeline_mode<synchronous>, transform_indices = @transform_6, window_bounds = array<i64: 768, 192>}, {pipeline_mode = #tpu.pipeline_mode<synchronous>, transform_indices = @transform_7, window_bounds = array<i64: 3, 64, 96>}, {pipeline_mode = #tpu.pipeline_mode<synchronous>, transform_indices = @transform_8, window_bounds = array<i64: 4, 32, 32>}, {pipeline_mode = #tpu.pipeline_mode<synchronous>, transform_indices = @transform_9, window_bounds = array<i64: 1, 608>}, {pipeline_mode = #tpu.pipeline_mode<synchronous>, transform_indices = @transform_10, window_bounds = array<i64: 32, 192>}, {pipeline_mode = #tpu.pipeline_mode<synchronous>, transform_indices = @transform_11, window_bounds = array<i64: 3, 64, 96>}, {pipeline_mode = #tpu.pipeline_mode<synchronous>, transform_indices = @transform_12, window_bounds = array<i64: 4, 32, 32>}, {pipeline_mode = #tpu.pipeline_mode<synchronous>, transform_indices = @transform_13, window_bounds = array<i64: 1, 608>}, {transform_indices = @transform_14, window_bounds = array<i64: 1, 34, 32>}]} {
    %c0 = arith.constant 0 : index
    %c0_0 = arith.constant 0 : index
    %c0_1 = arith.constant 0 : index
    %0 = vector.load %arg1[%c0, %c0_0, %c0_1] : memref<1x1x21xf32, #tpu.memory_space<vmem>>, vector<1x1x21xf32>
    %1 = vector.shape_cast %0 : vector<1x1x21xf32> to vector<1x21xf32>
    %2 = arith.truncf %1 : vector<1x21xf32> to vector<1x21xbf16>
    %c0_2 = arith.constant 0 : index
    %c0_3 = arith.constant 0 : index
    %3 = vector.load %arg3[%c0_2, %c0_3] : memref<21x64xbf16, #tpu.memory_space<vmem>>, vector<21x64xbf16>
    %cst = arith.constant dense<0.000000e+00> : vector<1x64xf32>
    %4 = tpu.matmul %2, %3, %cst {dimension_numbers = #tpu.dot_dimension_numbers<[1], [0], [0], [1], [0, 0, 1, 1], [], []>} : vector<1x21xbf16>, vector<21x64xbf16>, vector<1x64xf32> -> vector<1x64xf32>
    %c0_4 = arith.constant 0 : index
    %c0_5 = arith.constant 0 : index
    %5 = vector.load %arg6[%c0_4, %c0_5] : memref<1x224xf32, #tpu.memory_space<vmem>>, vector<1x64xf32>
    %6 = arith.addf %4, %5 : vector<1x64xf32>
    %cst_6 = arith.constant 0.000000e+00 : f32
    %7 = vector.broadcast %cst_6 : f32 to vector<1x64xf32>
    %8 = arith.maximumf %6, %7 : vector<1x64xf32>
    %9 = arith.truncf %8 : vector<1x64xf32> to vector<1x64xbf16>
    %c0_7 = arith.constant 0 : index
    %c0_8 = arith.constant 0 : index
    %10 = vector.load %arg4[%c0_7, %c0_8] : memref<64x96xbf16, #tpu.memory_space<vmem>>, vector<64x64xbf16>
    %cst_9 = arith.constant dense<0.000000e+00> : vector<1x64xf32>
    %11 = tpu.matmul %9, %10, %cst_9 {dimension_numbers = #tpu.dot_dimension_numbers<[1], [0], [0], [1], [0, 0, 1, 1], [], []>} : vector<1x64xbf16>, vector<64x64xbf16>, vector<1x64xf32> -> vector<1x64xf32>
    %c0_10 = arith.constant 0 : index
    %c64 = arith.constant 64 : index
    %12 = vector.load %arg6[%c0_10, %c64] : memref<1x224xf32, #tpu.memory_space<vmem>>, vector<1x64xf32>
    %13 = arith.addf %11, %12 : vector<1x64xf32>
    %cst_11 = arith.constant 0.000000e+00 : f32
    %14 = vector.broadcast %cst_11 : f32 to vector<1x64xf32>
    %15 = arith.maximumf %13, %14 : vector<1x64xf32>
    %16 = arith.truncf %15 : vector<1x64xf32> to vector<1x64xbf16>
    %c0_12 = arith.constant 0 : index
    %c64_13 = arith.constant 64 : index
    %17 = vector.load %arg4[%c0_12, %c64_13] : memref<64x96xbf16, #tpu.memory_space<vmem>>, vector<64x32xbf16>
    %cst_14 = arith.constant dense<0.000000e+00> : vector<1x32xf32>
    %18 = tpu.matmul %16, %17, %cst_14 {dimension_numbers = #tpu.dot_dimension_numbers<[1], [0], [0], [1], [0, 0, 1, 1], [], []>} : vector<1x64xbf16>, vector<64x32xbf16>, vector<1x32xf32> -> vector<1x32xf32>
    %c0_15 = arith.constant 0 : index
    %c128 = arith.constant 128 : index
    %19 = vector.load %arg6[%c0_15, %c128] : memref<1x224xf32, #tpu.memory_space<vmem>>, vector<1x32xf32>
    %20 = arith.addf %18, %19 : vector<1x32xf32>
    %cst_16 = arith.constant 0.000000e+00 : f32
    %21 = vector.broadcast %cst_16 : f32 to vector<1x32xf32>
    %22 = arith.maximumf %20, %21 : vector<1x32xf32>
    %23 = arith.truncf %22 : vector<1x32xf32> to vector<1x32xbf16>
    %c0_17 = arith.constant 0 : index
    %c0_18 = arith.constant 0 : index
    %24 = vector.load %arg5[%c0_17, %c0_18] : memref<32x64xbf16, #tpu.memory_space<vmem>>, vector<32x32xbf16>
    %cst_19 = arith.constant dense<0.000000e+00> : vector<1x32xf32>
    %25 = tpu.matmul %23, %24, %cst_19 {dimension_numbers = #tpu.dot_dimension_numbers<[1], [0], [0], [1], [0, 0, 1, 1], [], []>} : vector<1x32xbf16>, vector<32x32xbf16>, vector<1x32xf32> -> vector<1x32xf32>
    %c0_20 = arith.constant 0 : index
    %c160 = arith.constant 160 : index
    %26 = vector.load %arg6[%c0_20, %c160] : memref<1x224xf32, #tpu.memory_space<vmem>>, vector<1x32xf32>
    %27 = arith.addf %25, %26 : vector<1x32xf32>
    %28 = arith.truncf %27 : vector<1x32xf32> to vector<1x32xbf16>
    %c0_21 = arith.constant 0 : index
    %c32 = arith.constant 32 : index
    %29 = vector.load %arg5[%c0_21, %c32] : memref<32x64xbf16, #tpu.memory_space<vmem>>, vector<32x32xbf16>
    %cst_22 = arith.constant dense<0.000000e+00> : vector<1x32xf32>
    %30 = tpu.matmul %28, %29, %cst_22 {dimension_numbers = #tpu.dot_dimension_numbers<[1], [0], [0], [1], [0, 0, 1, 1], [], []>} : vector<1x32xbf16>, vector<32x32xbf16>, vector<1x32xf32> -> vector<1x32xf32>
    %c0_23 = arith.constant 0 : index
    %c192 = arith.constant 192 : index
    %31 = vector.load %arg6[%c0_23, %c192] : memref<1x224xf32, #tpu.memory_space<vmem>>, vector<1x32xf32>
    %32 = arith.addf %30, %31 : vector<1x32xf32>
    %cst_24 = arith.constant dense<0xFF800000> : vector<1xf32>
    %33 = vector.multi_reduction <maximumf>, %32, %cst_24 [1] : vector<1x32xf32> to vector<1xf32>
    %34 = vector.shape_cast %33 : vector<1xf32> to vector<1x1xf32>
    %35 = vector.broadcast %34 : vector<1x1xf32> to vector<1x32xf32>
    %36 = arith.subf %32, %35 : vector<1x32xf32>
    %37 = math.exp %36 : vector<1x32xf32>
    %cst_25 = arith.constant dense<0.000000e+00> : vector<1xf32>
    %38 = vector.multi_reduction <add>, %37, %cst_25 [1] : vector<1x32xf32> to vector<1xf32>
    %39 = vector.shape_cast %38 : vector<1xf32> to vector<1x1xf32>
    %40 = tpu.reciprocal %39 {approx = true} : vector<1x1xf32> -> vector<1x1xf32>
    %41 = vector.broadcast %40 : vector<1x1xf32> to vector<1x32xf32>
    %42 = arith.mulf %37, %41 : vector<1x32xf32>
    %c0_26 = arith.constant 0 : index
    %c0_27 = arith.constant 0 : index
    %c0_28 = arith.constant 0 : index
    %43 = vector.load %arg2[%c0_26, %c0_27, %c0_28] : memref<1x34x768xf32, #tpu.memory_space<vmem>>, vector<1x34x768xf32>
    %44 = vector.shape_cast %43 : vector<1x34x768xf32> to vector<34x768xf32>
    %45 = arith.truncf %44 : vector<34x768xf32> to vector<34x768xbf16>
    %c0_29 = arith.constant 0 : index
    %c0_30 = arith.constant 0 : index
    %46 = vector.load %arg7[%c0_29, %c0_30] : memref<768x192xbf16, #tpu.memory_space<vmem>>, vector<768x192xbf16>
    %cst_31 = arith.constant dense<0.000000e+00> : vector<34x192xf32>
    %47 = tpu.matmul %45, %46, %cst_31 {dimension_numbers = #tpu.dot_dimension_numbers<[1], [0], [0], [1], [0, 0, 1, 1], [], []>} : vector<34x768xbf16>, vector<768x192xbf16>, vector<34x192xf32> -> vector<34x192xf32>
    %c0_32 = arith.constant 0 : index
    %c0_33 = arith.constant 0 : index
    %48 = vector.load %arg10[%c0_32, %c0_33] : memref<1x608xf32, #tpu.memory_space<vmem>>, vector<1x192xf32>
    %49 = vector.broadcast %48 : vector<1x192xf32> to vector<34x192xf32>
    %50 = arith.addf %47, %49 : vector<34x192xf32>
    %cst_34 = arith.constant 0.000000e+00 : f32
    %51 = vector.broadcast %cst_34 : f32 to vector<34x192xf32>
    %52 = arith.maximumf %50, %51 : vector<34x192xf32>
    %53 = vector.extract_strided_slice %52 {offsets = [0, 0], sizes = [34, 64], strides = [1, 1]} : vector<34x192xf32> to vector<34x64xf32>
    %54 = arith.truncf %53 : vector<34x64xf32> to vector<34x64xbf16>
    %c0_35 = arith.constant 0 : index
    %c0_36 = arith.constant 0 : index
    %c0_37 = arith.constant 0 : index
    %55 = vector.load %arg8[%c0_35, %c0_36, %c0_37] : memref<3x64x96xbf16, #tpu.memory_space<vmem>>, vector<1x64x96xbf16>
    %56 = vector.shape_cast %55 : vector<1x64x96xbf16> to vector<64x96xbf16>
    %c0_38 = arith.constant 0 : index
    %c192_39 = arith.constant 192 : index
    %57 = vector.load %arg10[%c0_38, %c192_39] : memref<1x608xf32, #tpu.memory_space<vmem>>, vector<1x64xf32>
    %c0_40 = arith.constant 0 : index
    %c384 = arith.constant 384 : index
    %58 = vector.load %arg10[%c0_40, %c384] : memref<1x608xf32, #tpu.memory_space<vmem>>, vector<1x32xf32>
    %59 = vector.extract_strided_slice %56 {offsets = [0, 0], sizes = [64, 64], strides = [1, 1]} : vector<64x96xbf16> to vector<64x64xbf16>
    %cst_41 = arith.constant dense<0.000000e+00> : vector<34x64xf32>
    %60 = tpu.matmul %54, %59, %cst_41 {dimension_numbers = #tpu.dot_dimension_numbers<[1], [0], [0], [1], [0, 0, 1, 1], [], []>} : vector<34x64xbf16>, vector<64x64xbf16>, vector<34x64xf32> -> vector<34x64xf32>
    %61 = vector.broadcast %57 : vector<1x64xf32> to vector<34x64xf32>
    %62 = arith.addf %60, %61 : vector<34x64xf32>
    %cst_42 = arith.constant 0.000000e+00 : f32
    %63 = vector.broadcast %cst_42 : f32 to vector<34x64xf32>
    %64 = arith.maximumf %62, %63 : vector<34x64xf32>
    %65 = arith.truncf %64 : vector<34x64xf32> to vector<34x64xbf16>
    %66 = vector.extract_strided_slice %56 {offsets = [0, 64], sizes = [64, 32], strides = [1, 1]} : vector<64x96xbf16> to vector<64x32xbf16>
    %cst_43 = arith.constant dense<0.000000e+00> : vector<34x32xf32>
    %67 = tpu.matmul %65, %66, %cst_43 {dimension_numbers = #tpu.dot_dimension_numbers<[1], [0], [0], [1], [0, 0, 1, 1], [], []>} : vector<34x64xbf16>, vector<64x32xbf16>, vector<34x32xf32> -> vector<34x32xf32>
    %68 = vector.broadcast %58 : vector<1x32xf32> to vector<34x32xf32>
    %69 = arith.addf %67, %68 : vector<34x32xf32>
    %70 = vector.extract_strided_slice %52 {offsets = [0, 64], sizes = [34, 64], strides = [1, 1]} : vector<34x192xf32> to vector<34x64xf32>
    %71 = arith.truncf %70 : vector<34x64xf32> to vector<34x64xbf16>
    %c1 = arith.constant 1 : index
    %c0_44 = arith.constant 0 : index
    %c0_45 = arith.constant 0 : index
    %72 = vector.load %arg8[%c1, %c0_44, %c0_45] : memref<3x64x96xbf16, #tpu.memory_space<vmem>>, vector<1x64x96xbf16>
    %73 = vector.shape_cast %72 : vector<1x64x96xbf16> to vector<64x96xbf16>
    %c0_46 = arith.constant 0 : index
    %c256 = arith.constant 256 : index
    %74 = vector.load %arg10[%c0_46, %c256] : memref<1x608xf32, #tpu.memory_space<vmem>>, vector<1x64xf32>
    %c0_47 = arith.constant 0 : index
    %c416 = arith.constant 416 : index
    %75 = vector.load %arg10[%c0_47, %c416] : memref<1x608xf32, #tpu.memory_space<vmem>>, vector<1x32xf32>
    %76 = vector.extract_strided_slice %73 {offsets = [0, 0], sizes = [64, 64], strides = [1, 1]} : vector<64x96xbf16> to vector<64x64xbf16>
    %cst_48 = arith.constant dense<0.000000e+00> : vector<34x64xf32>
    %77 = tpu.matmul %71, %76, %cst_48 {dimension_numbers = #tpu.dot_dimension_numbers<[1], [0], [0], [1], [0, 0, 1, 1], [], []>} : vector<34x64xbf16>, vector<64x64xbf16>, vector<34x64xf32> -> vector<34x64xf32>
    %78 = vector.broadcast %74 : vector<1x64xf32> to vector<34x64xf32>
    %79 = arith.addf %77, %78 : vector<34x64xf32>
    %cst_49 = arith.constant 0.000000e+00 : f32
    %80 = vector.broadcast %cst_49 : f32 to vector<34x64xf32>
    %81 = arith.maximumf %79, %80 : vector<34x64xf32>
    %82 = arith.truncf %81 : vector<34x64xf32> to vector<34x64xbf16>
    %83 = vector.extract_strided_slice %73 {offsets = [0, 64], sizes = [64, 32], strides = [1, 1]} : vector<64x96xbf16> to vector<64x32xbf16>
    %cst_50 = arith.constant dense<0.000000e+00> : vector<34x32xf32>
    %84 = tpu.matmul %82, %83, %cst_50 {dimension_numbers = #tpu.dot_dimension_numbers<[1], [0], [0], [1], [0, 0, 1, 1], [], []>} : vector<34x64xbf16>, vector<64x32xbf16>, vector<34x32xf32> -> vector<34x32xf32>
    %85 = vector.broadcast %75 : vector<1x32xf32> to vector<34x32xf32>
    %86 = arith.addf %84, %85 : vector<34x32xf32>
    %87 = vector.extract_strided_slice %52 {offsets = [0, 128], sizes = [34, 64], strides = [1, 1]} : vector<34x192xf32> to vector<34x64xf32>
    %88 = arith.truncf %87 : vector<34x64xf32> to vector<34x64xbf16>
    %c2 = arith.constant 2 : index
    %c0_51 = arith.constant 0 : index
    %c0_52 = arith.constant 0 : index
    %89 = vector.load %arg8[%c2, %c0_51, %c0_52] : memref<3x64x96xbf16, #tpu.memory_space<vmem>>, vector<1x64x96xbf16>
    %90 = vector.shape_cast %89 : vector<1x64x96xbf16> to vector<64x96xbf16>
    %c0_53 = arith.constant 0 : index
    %c320 = arith.constant 320 : index
    %91 = vector.load %arg10[%c0_53, %c320] : memref<1x608xf32, #tpu.memory_space<vmem>>, vector<1x64xf32>
    %c0_54 = arith.constant 0 : index
    %c448 = arith.constant 448 : index
    %92 = vector.load %arg10[%c0_54, %c448] : memref<1x608xf32, #tpu.memory_space<vmem>>, vector<1x32xf32>
    %93 = vector.extract_strided_slice %90 {offsets = [0, 0], sizes = [64, 64], strides = [1, 1]} : vector<64x96xbf16> to vector<64x64xbf16>
    %cst_55 = arith.constant dense<0.000000e+00> : vector<34x64xf32>
    %94 = tpu.matmul %88, %93, %cst_55 {dimension_numbers = #tpu.dot_dimension_numbers<[1], [0], [0], [1], [0, 0, 1, 1], [], []>} : vector<34x64xbf16>, vector<64x64xbf16>, vector<34x64xf32> -> vector<34x64xf32>
    %95 = vector.broadcast %91 : vector<1x64xf32> to vector<34x64xf32>
    %96 = arith.addf %94, %95 : vector<34x64xf32>
    %cst_56 = arith.constant 0.000000e+00 : f32
    %97 = vector.broadcast %cst_56 : f32 to vector<34x64xf32>
    %98 = arith.maximumf %96, %97 : vector<34x64xf32>
    %99 = arith.truncf %98 : vector<34x64xf32> to vector<34x64xbf16>
    %100 = vector.extract_strided_slice %90 {offsets = [0, 64], sizes = [64, 32], strides = [1, 1]} : vector<64x96xbf16> to vector<64x32xbf16>
    %cst_57 = arith.constant dense<0.000000e+00> : vector<34x32xf32>
    %101 = tpu.matmul %99, %100, %cst_57 {dimension_numbers = #tpu.dot_dimension_numbers<[1], [0], [0], [1], [0, 0, 1, 1], [], []>} : vector<34x64xbf16>, vector<64x32xbf16>, vector<34x32xf32> -> vector<34x32xf32>
    %102 = vector.broadcast %92 : vector<1x32xf32> to vector<34x32xf32>
    %103 = arith.addf %101, %102 : vector<34x32xf32>
    %cst_58 = arith.constant 0.000000e+00 : f32
    %104 = vector.broadcast %cst_58 : f32 to vector<34x32xf32>
    %105 = arith.maximumf %69, %104 : vector<34x32xf32>
    %cst_59 = arith.constant 0.000000e+00 : f32
    %106 = vector.broadcast %cst_59 : f32 to vector<34x32xf32>
    %107 = arith.maximumf %86, %106 : vector<34x32xf32>
    %cst_60 = arith.constant dense<0xFF800000> : vector<34xf32>
    %108 = vector.multi_reduction <maximumf>, %103, %cst_60 [1] : vector<34x32xf32> to vector<34xf32>
    %109 = vector.shape_cast %108 : vector<34xf32> to vector<34x1xf32>
    %110 = vector.broadcast %109 : vector<34x1xf32> to vector<34x32xf32>
    %111 = arith.subf %103, %110 : vector<34x32xf32>
    %112 = math.exp %111 : vector<34x32xf32>
    %cst_61 = arith.constant dense<0.000000e+00> : vector<34xf32>
    %113 = vector.multi_reduction <add>, %112, %cst_61 [1] : vector<34x32xf32> to vector<34xf32>
    %114 = vector.shape_cast %113 : vector<34xf32> to vector<34x1xf32>
    %115 = tpu.reciprocal %114 {approx = true} : vector<34x1xf32> -> vector<34x1xf32>
    %116 = vector.broadcast %115 : vector<34x1xf32> to vector<34x32xf32>
    %117 = arith.mulf %112, %116 : vector<34x32xf32>
    %c0_62 = arith.constant 0 : index
    %c480 = arith.constant 480 : index
    %118 = vector.load %arg10[%c0_62, %c480] : memref<1x608xf32, #tpu.memory_space<vmem>>, vector<1x32xf32>
    %119 = arith.truncf %117 : vector<34x32xf32> to vector<34x32xbf16>
    %c0_63 = arith.constant 0 : index
    %c0_64 = arith.constant 0 : index
    %c0_65 = arith.constant 0 : index
    %120 = vector.load %arg9[%c0_63, %c0_64, %c0_65] : memref<4x32x32xbf16, #tpu.memory_space<vmem>>, vector<1x32x32xbf16>
    %121 = vector.shape_cast %120 : vector<1x32x32xbf16> to vector<32x32xbf16>
    %cst_66 = arith.constant dense<0.000000e+00> : vector<34x32xf32>
    %122 = tpu.matmul %119, %121, %cst_66 {dimension_numbers = #tpu.dot_dimension_numbers<[1], [0], [0], [1], [0, 0, 1, 1], [], []>} : vector<34x32xbf16>, vector<32x32xbf16>, vector<34x32xf32> -> vector<34x32xf32>
    %123 = vector.broadcast %118 : vector<1x32xf32> to vector<34x32xf32>
    %124 = arith.addf %122, %123 : vector<34x32xf32>
    %125 = arith.truncf %124 : vector<34x32xf32> to vector<34x32xbf16>
    %126 = vector.shape_cast %125 : vector<34x32xbf16> to vector<1x34x32xbf16>
    %c0_67 = arith.constant 0 : index
    %c512 = arith.constant 512 : index
    %127 = vector.load %arg10[%c0_67, %c512] : memref<1x608xf32, #tpu.memory_space<vmem>>, vector<1x32xf32>
    %128 = arith.truncf %105 : vector<34x32xf32> to vector<34x32xbf16>
    %c1_68 = arith.constant 1 : index
    %c0_69 = arith.constant 0 : index
    %c0_70 = arith.constant 0 : index
    %129 = vector.load %arg9[%c1_68, %c0_69, %c0_70] : memref<4x32x32xbf16, #tpu.memory_space<vmem>>, vector<1x32x32xbf16>
    %130 = vector.shape_cast %129 : vector<1x32x32xbf16> to vector<32x32xbf16>
    %cst_71 = arith.constant dense<0.000000e+00> : vector<34x32xf32>
    %131 = tpu.matmul %128, %130, %cst_71 {dimension_numbers = #tpu.dot_dimension_numbers<[1], [0], [0], [1], [0, 0, 1, 1], [], []>} : vector<34x32xbf16>, vector<32x32xbf16>, vector<34x32xf32> -> vector<34x32xf32>
    %132 = vector.broadcast %127 : vector<1x32xf32> to vector<34x32xf32>
    %133 = arith.addf %131, %132 : vector<34x32xf32>
    %134 = arith.truncf %133 : vector<34x32xf32> to vector<34x32xbf16>
    %135 = vector.shape_cast %134 : vector<34x32xbf16> to vector<1x34x32xbf16>
    %c0_72 = arith.constant 0 : index
    %c544 = arith.constant 544 : index
    %136 = vector.load %arg10[%c0_72, %c544] : memref<1x608xf32, #tpu.memory_space<vmem>>, vector<1x32xf32>
    %137 = arith.truncf %107 : vector<34x32xf32> to vector<34x32xbf16>
    %c2_73 = arith.constant 2 : index
    %c0_74 = arith.constant 0 : index
    %c0_75 = arith.constant 0 : index
    %138 = vector.load %arg9[%c2_73, %c0_74, %c0_75] : memref<4x32x32xbf16, #tpu.memory_space<vmem>>, vector<1x32x32xbf16>
    %139 = vector.shape_cast %138 : vector<1x32x32xbf16> to vector<32x32xbf16>
    %cst_76 = arith.constant dense<0.000000e+00> : vector<34x32xf32>
    %140 = tpu.matmul %137, %139, %cst_76 {dimension_numbers = #tpu.dot_dimension_numbers<[1], [0], [0], [1], [0, 0, 1, 1], [], []>} : vector<34x32xbf16>, vector<32x32xbf16>, vector<34x32xf32> -> vector<34x32xf32>
    %141 = vector.broadcast %136 : vector<1x32xf32> to vector<34x32xf32>
    %142 = arith.addf %140, %141 : vector<34x32xf32>
    %143 = arith.truncf %142 : vector<34x32xf32> to vector<34x32xbf16>
    %144 = vector.shape_cast %143 : vector<34x32xbf16> to vector<1x34x32xbf16>
    %c3 = arith.constant 3 : index
    %c0_77 = arith.constant 0 : index
    %c0_78 = arith.constant 0 : index
    %145 = vector.load %arg9[%c3, %c0_77, %c0_78] : memref<4x32x32xbf16, #tpu.memory_space<vmem>>, vector<1x32x32xbf16>
    %146 = vector.shape_cast %145 : vector<1x32x32xbf16> to vector<32x32xbf16>
    %147 = vector.extract_strided_slice %126 {offsets = [0, 0, 0], sizes = [1, 34, 8], strides = [1, 1, 1]} : vector<1x34x32xbf16> to vector<1x34x8xbf16>
    %148 = vector.extract_strided_slice %135 {offsets = [0, 0, 0], sizes = [1, 34, 8], strides = [1, 1, 1]} : vector<1x34x32xbf16> to vector<1x34x8xbf16>
    "tpu.trace_start"() <{level = 10 : i32, message = "bqd,bkd->bqk"}> : () -> ()
    %cst_79 = arith.constant dense<0.000000e+00> : vector<1x34x34xf32>
    %149 = tpu.matmul %147, %148, %cst_79 {dimension_numbers = #tpu.dot_dimension_numbers<[2], [2], [1], [1], [0, 0, 0, 1, 1, 1], [0], [0]>} : vector<1x34x8xbf16>, vector<1x34x8xbf16>, vector<1x34x34xf32> -> vector<1x34x34xf32>
    "tpu.trace_stop"() : () -> ()
    %cst_80 = arith.constant 0.353553385 : f32
    %150 = vector.broadcast %cst_80 : f32 to vector<1x34x34xf32>
    %151 = arith.mulf %149, %150 : vector<1x34x34xf32>
    %cst_81 = arith.constant dense<0xFF800000> : vector<1x34xf32>
    %152 = vector.multi_reduction <maximumf>, %151, %cst_81 [2] : vector<1x34x34xf32> to vector<1x34xf32>
    %153 = vector.shape_cast %152 : vector<1x34xf32> to vector<1x34x1xf32>
    %154 = vector.broadcast %153 : vector<1x34x1xf32> to vector<1x34x34xf32>
    %155 = arith.subf %151, %154 : vector<1x34x34xf32>
    %156 = math.exp %155 : vector<1x34x34xf32>
    %cst_82 = arith.constant dense<0.000000e+00> : vector<1x34xf32>
    %157 = vector.multi_reduction <add>, %156, %cst_82 [2] : vector<1x34x34xf32> to vector<1x34xf32>
    %158 = vector.shape_cast %157 : vector<1x34xf32> to vector<1x34x1xf32>
    %159 = tpu.reciprocal %158 {approx = true} : vector<1x34x1xf32> -> vector<1x34x1xf32>
    %160 = vector.broadcast %159 : vector<1x34x1xf32> to vector<1x34x34xf32>
    %161 = arith.mulf %156, %160 : vector<1x34x34xf32>
    %162 = arith.truncf %161 : vector<1x34x34xf32> to vector<1x34x34xbf16>
    %163 = vector.extract_strided_slice %144 {offsets = [0, 0, 0], sizes = [1, 34, 8], strides = [1, 1, 1]} : vector<1x34x32xbf16> to vector<1x34x8xbf16>
    "tpu.trace_start"() <{level = 10 : i32, message = "bqk,bkd->bqd"}> : () -> ()
    %cst_83 = arith.constant dense<0.000000e+00> : vector<1x34x8xf32>
    %164 = tpu.matmul %162, %163, %cst_83 {dimension_numbers = #tpu.dot_dimension_numbers<[2], [1], [1], [2], [0, 0, 0, 1, 1, 2], [0], [0]>} : vector<1x34x34xbf16>, vector<1x34x8xbf16>, vector<1x34x8xf32> -> vector<1x34x8xf32>
    "tpu.trace_stop"() : () -> ()
    %165 = arith.truncf %164 : vector<1x34x8xf32> to vector<1x34x8xbf16>
    %166 = vector.extract_strided_slice %146 {offsets = [0, 0], sizes = [8, 32], strides = [1, 1]} : vector<32x32xbf16> to vector<8x32xbf16>
    "tpu.trace_start"() <{level = 10 : i32, message = "bqd,do->bqo"}> : () -> ()
    %cst_84 = arith.constant dense<0.000000e+00> : vector<1x34x32xf32>
    %167 = tpu.matmul %165, %166, %cst_84 {dimension_numbers = #tpu.dot_dimension_numbers<[2], [0], [0, 1], [1], [0, 0, 0, 1, 1, 1], [], []>} : vector<1x34x8xbf16>, vector<8x32xbf16>, vector<1x34x32xf32> -> vector<1x34x32xf32>
    "tpu.trace_stop"() : () -> ()
    %168 = vector.extract_strided_slice %126 {offsets = [0, 0, 8], sizes = [1, 34, 8], strides = [1, 1, 1]} : vector<1x34x32xbf16> to vector<1x34x8xbf16>
    %169 = vector.extract_strided_slice %135 {offsets = [0, 0, 8], sizes = [1, 34, 8], strides = [1, 1, 1]} : vector<1x34x32xbf16> to vector<1x34x8xbf16>
    "tpu.trace_start"() <{level = 10 : i32, message = "bqd,bkd->bqk"}> : () -> ()
    %cst_85 = arith.constant dense<0.000000e+00> : vector<1x34x34xf32>
    %170 = tpu.matmul %168, %169, %cst_85 {dimension_numbers = #tpu.dot_dimension_numbers<[2], [2], [1], [1], [0, 0, 0, 1, 1, 1], [0], [0]>} : vector<1x34x8xbf16>, vector<1x34x8xbf16>, vector<1x34x34xf32> -> vector<1x34x34xf32>
    "tpu.trace_stop"() : () -> ()
    %cst_86 = arith.constant 0.353553385 : f32
    %171 = vector.broadcast %cst_86 : f32 to vector<1x34x34xf32>
    %172 = arith.mulf %170, %171 : vector<1x34x34xf32>
    %cst_87 = arith.constant dense<0xFF800000> : vector<1x34xf32>
    %173 = vector.multi_reduction <maximumf>, %172, %cst_87 [2] : vector<1x34x34xf32> to vector<1x34xf32>
    %174 = vector.shape_cast %173 : vector<1x34xf32> to vector<1x34x1xf32>
    %175 = vector.broadcast %174 : vector<1x34x1xf32> to vector<1x34x34xf32>
    %176 = arith.subf %172, %175 : vector<1x34x34xf32>
    %177 = math.exp %176 : vector<1x34x34xf32>
    %cst_88 = arith.constant dense<0.000000e+00> : vector<1x34xf32>
    %178 = vector.multi_reduction <add>, %177, %cst_88 [2] : vector<1x34x34xf32> to vector<1x34xf32>
    %179 = vector.shape_cast %178 : vector<1x34xf32> to vector<1x34x1xf32>
    %180 = tpu.reciprocal %179 {approx = true} : vector<1x34x1xf32> -> vector<1x34x1xf32>
    %181 = vector.broadcast %180 : vector<1x34x1xf32> to vector<1x34x34xf32>
    %182 = arith.mulf %177, %181 : vector<1x34x34xf32>
    %183 = arith.truncf %182 : vector<1x34x34xf32> to vector<1x34x34xbf16>
    %184 = vector.extract_strided_slice %144 {offsets = [0, 0, 8], sizes = [1, 34, 8], strides = [1, 1, 1]} : vector<1x34x32xbf16> to vector<1x34x8xbf16>
    "tpu.trace_start"() <{level = 10 : i32, message = "bqk,bkd->bqd"}> : () -> ()
    %cst_89 = arith.constant dense<0.000000e+00> : vector<1x34x8xf32>
    %185 = tpu.matmul %183, %184, %cst_89 {dimension_numbers = #tpu.dot_dimension_numbers<[2], [1], [1], [2], [0, 0, 0, 1, 1, 2], [0], [0]>} : vector<1x34x34xbf16>, vector<1x34x8xbf16>, vector<1x34x8xf32> -> vector<1x34x8xf32>
    "tpu.trace_stop"() : () -> ()
    %186 = arith.truncf %185 : vector<1x34x8xf32> to vector<1x34x8xbf16>
    %187 = vector.extract_strided_slice %146 {offsets = [8, 0], sizes = [8, 32], strides = [1, 1]} : vector<32x32xbf16> to vector<8x32xbf16>
    "tpu.trace_start"() <{level = 10 : i32, message = "bqd,do->bqo"}> : () -> ()
    %cst_90 = arith.constant dense<0.000000e+00> : vector<1x34x32xf32>
    %188 = tpu.matmul %186, %187, %cst_90 {dimension_numbers = #tpu.dot_dimension_numbers<[2], [0], [0, 1], [1], [0, 0, 0, 1, 1, 1], [], []>} : vector<1x34x8xbf16>, vector<8x32xbf16>, vector<1x34x32xf32> -> vector<1x34x32xf32>
    "tpu.trace_stop"() : () -> ()
    %189 = arith.addf %167, %188 : vector<1x34x32xf32>
    %190 = vector.extract_strided_slice %126 {offsets = [0, 0, 16], sizes = [1, 34, 8], strides = [1, 1, 1]} : vector<1x34x32xbf16> to vector<1x34x8xbf16>
    %191 = vector.extract_strided_slice %135 {offsets = [0, 0, 16], sizes = [1, 34, 8], strides = [1, 1, 1]} : vector<1x34x32xbf16> to vector<1x34x8xbf16>
    "tpu.trace_start"() <{level = 10 : i32, message = "bqd,bkd->bqk"}> : () -> ()
    %cst_91 = arith.constant dense<0.000000e+00> : vector<1x34x34xf32>
    %192 = tpu.matmul %190, %191, %cst_91 {dimension_numbers = #tpu.dot_dimension_numbers<[2], [2], [1], [1], [0, 0, 0, 1, 1, 1], [0], [0]>} : vector<1x34x8xbf16>, vector<1x34x8xbf16>, vector<1x34x34xf32> -> vector<1x34x34xf32>
    "tpu.trace_stop"() : () -> ()
    %cst_92 = arith.constant 0.353553385 : f32
    %193 = vector.broadcast %cst_92 : f32 to vector<1x34x34xf32>
    %194 = arith.mulf %192, %193 : vector<1x34x34xf32>
    %cst_93 = arith.constant dense<0xFF800000> : vector<1x34xf32>
    %195 = vector.multi_reduction <maximumf>, %194, %cst_93 [2] : vector<1x34x34xf32> to vector<1x34xf32>
    %196 = vector.shape_cast %195 : vector<1x34xf32> to vector<1x34x1xf32>
    %197 = vector.broadcast %196 : vector<1x34x1xf32> to vector<1x34x34xf32>
    %198 = arith.subf %194, %197 : vector<1x34x34xf32>
    %199 = math.exp %198 : vector<1x34x34xf32>
    %cst_94 = arith.constant dense<0.000000e+00> : vector<1x34xf32>
    %200 = vector.multi_reduction <add>, %199, %cst_94 [2] : vector<1x34x34xf32> to vector<1x34xf32>
    %201 = vector.shape_cast %200 : vector<1x34xf32> to vector<1x34x1xf32>
    %202 = tpu.reciprocal %201 {approx = true} : vector<1x34x1xf32> -> vector<1x34x1xf32>
    %203 = vector.broadcast %202 : vector<1x34x1xf32> to vector<1x34x34xf32>
    %204 = arith.mulf %199, %203 : vector<1x34x34xf32>
    %205 = arith.truncf %204 : vector<1x34x34xf32> to vector<1x34x34xbf16>
    %206 = vector.extract_strided_slice %144 {offsets = [0, 0, 16], sizes = [1, 34, 8], strides = [1, 1, 1]} : vector<1x34x32xbf16> to vector<1x34x8xbf16>
    "tpu.trace_start"() <{level = 10 : i32, message = "bqk,bkd->bqd"}> : () -> ()
    %cst_95 = arith.constant dense<0.000000e+00> : vector<1x34x8xf32>
    %207 = tpu.matmul %205, %206, %cst_95 {dimension_numbers = #tpu.dot_dimension_numbers<[2], [1], [1], [2], [0, 0, 0, 1, 1, 2], [0], [0]>} : vector<1x34x34xbf16>, vector<1x34x8xbf16>, vector<1x34x8xf32> -> vector<1x34x8xf32>
    "tpu.trace_stop"() : () -> ()
    %208 = arith.truncf %207 : vector<1x34x8xf32> to vector<1x34x8xbf16>
    %209 = vector.extract_strided_slice %146 {offsets = [16, 0], sizes = [8, 32], strides = [1, 1]} : vector<32x32xbf16> to vector<8x32xbf16>
    "tpu.trace_start"() <{level = 10 : i32, message = "bqd,do->bqo"}> : () -> ()
    %cst_96 = arith.constant dense<0.000000e+00> : vector<1x34x32xf32>
    %210 = tpu.matmul %208, %209, %cst_96 {dimension_numbers = #tpu.dot_dimension_numbers<[2], [0], [0, 1], [1], [0, 0, 0, 1, 1, 1], [], []>} : vector<1x34x8xbf16>, vector<8x32xbf16>, vector<1x34x32xf32> -> vector<1x34x32xf32>
    "tpu.trace_stop"() : () -> ()
    %211 = arith.addf %189, %210 : vector<1x34x32xf32>
    %212 = vector.extract_strided_slice %126 {offsets = [0, 0, 24], sizes = [1, 34, 8], strides = [1, 1, 1]} : vector<1x34x32xbf16> to vector<1x34x8xbf16>
    %213 = vector.extract_strided_slice %135 {offsets = [0, 0, 24], sizes = [1, 34, 8], strides = [1, 1, 1]} : vector<1x34x32xbf16> to vector<1x34x8xbf16>
    "tpu.trace_start"() <{level = 10 : i32, message = "bqd,bkd->bqk"}> : () -> ()
    %cst_97 = arith.constant dense<0.000000e+00> : vector<1x34x34xf32>
    %214 = tpu.matmul %212, %213, %cst_97 {dimension_numbers = #tpu.dot_dimension_numbers<[2], [2], [1], [1], [0, 0, 0, 1, 1, 1], [0], [0]>} : vector<1x34x8xbf16>, vector<1x34x8xbf16>, vector<1x34x34xf32> -> vector<1x34x34xf32>
    "tpu.trace_stop"() : () -> ()
    %cst_98 = arith.constant 0.353553385 : f32
    %215 = vector.broadcast %cst_98 : f32 to vector<1x34x34xf32>
    %216 = arith.mulf %214, %215 : vector<1x34x34xf32>
    %cst_99 = arith.constant dense<0xFF800000> : vector<1x34xf32>
    %217 = vector.multi_reduction <maximumf>, %216, %cst_99 [2] : vector<1x34x34xf32> to vector<1x34xf32>
    %218 = vector.shape_cast %217 : vector<1x34xf32> to vector<1x34x1xf32>
    %219 = vector.broadcast %218 : vector<1x34x1xf32> to vector<1x34x34xf32>
    %220 = arith.subf %216, %219 : vector<1x34x34xf32>
    %221 = math.exp %220 : vector<1x34x34xf32>
    %cst_100 = arith.constant dense<0.000000e+00> : vector<1x34xf32>
    %222 = vector.multi_reduction <add>, %221, %cst_100 [2] : vector<1x34x34xf32> to vector<1x34xf32>
    %223 = vector.shape_cast %222 : vector<1x34xf32> to vector<1x34x1xf32>
    %224 = tpu.reciprocal %223 {approx = true} : vector<1x34x1xf32> -> vector<1x34x1xf32>
    %225 = vector.broadcast %224 : vector<1x34x1xf32> to vector<1x34x34xf32>
    %226 = arith.mulf %221, %225 : vector<1x34x34xf32>
    %227 = arith.truncf %226 : vector<1x34x34xf32> to vector<1x34x34xbf16>
    %228 = vector.extract_strided_slice %144 {offsets = [0, 0, 24], sizes = [1, 34, 8], strides = [1, 1, 1]} : vector<1x34x32xbf16> to vector<1x34x8xbf16>
    "tpu.trace_start"() <{level = 10 : i32, message = "bqk,bkd->bqd"}> : () -> ()
    %cst_101 = arith.constant dense<0.000000e+00> : vector<1x34x8xf32>
    %229 = tpu.matmul %227, %228, %cst_101 {dimension_numbers = #tpu.dot_dimension_numbers<[2], [1], [1], [2], [0, 0, 0, 1, 1, 2], [0], [0]>} : vector<1x34x34xbf16>, vector<1x34x8xbf16>, vector<1x34x8xf32> -> vector<1x34x8xf32>
    "tpu.trace_stop"() : () -> ()
    %230 = arith.truncf %229 : vector<1x34x8xf32> to vector<1x34x8xbf16>
    %231 = vector.extract_strided_slice %146 {offsets = [24, 0], sizes = [8, 32], strides = [1, 1]} : vector<32x32xbf16> to vector<8x32xbf16>
    "tpu.trace_start"() <{level = 10 : i32, message = "bqd,do->bqo"}> : () -> ()
    %cst_102 = arith.constant dense<0.000000e+00> : vector<1x34x32xf32>
    %232 = tpu.matmul %230, %231, %cst_102 {dimension_numbers = #tpu.dot_dimension_numbers<[2], [0], [0, 1], [1], [0, 0, 0, 1, 1, 1], [], []>} : vector<1x34x8xbf16>, vector<8x32xbf16>, vector<1x34x32xf32> -> vector<1x34x32xf32>
    "tpu.trace_stop"() : () -> ()
    %233 = arith.addf %211, %232 : vector<1x34x32xf32>
    %c0_103 = arith.constant 0 : index
    %c576 = arith.constant 576 : index
    %234 = vector.load %arg10[%c0_103, %c576] : memref<1x608xf32, #tpu.memory_space<vmem>>, vector<1x32xf32>
    %235 = vector.shape_cast %234 : vector<1x32xf32> to vector<1x1x32xf32>
    %236 = vector.broadcast %235 : vector<1x1x32xf32> to vector<1x34x32xf32>
    %237 = arith.addf %233, %236 : vector<1x34x32xf32>
    %238 = vector.shape_cast %42 : vector<1x32xf32> to vector<1x1x32xf32>
    %239 = vector.broadcast %238 : vector<1x1x32xf32> to vector<1x34x32xf32>
    %240 = arith.mulf %237, %239 : vector<1x34x32xf32>
    %241 = vector.shape_cast %240 : vector<1x34x32xf32> to vector<34x32xf32>
    %242 = arith.truncf %241 : vector<34x32xf32> to vector<34x32xbf16>
    %c0_104 = arith.constant 0 : index
    %c0_105 = arith.constant 0 : index
    %243 = vector.load %arg11[%c0_104, %c0_105] : memref<32x192xbf16, #tpu.memory_space<vmem>>, vector<32x192xbf16>
    %cst_106 = arith.constant dense<0.000000e+00> : vector<34x192xf32>
    %244 = tpu.matmul %242, %243, %cst_106 {dimension_numbers = #tpu.dot_dimension_numbers<[1], [0], [0], [1], [0, 0, 1, 1], [], []>} : vector<34x32xbf16>, vector<32x192xbf16>, vector<34x192xf32> -> vector<34x192xf32>
    %c0_107 = arith.constant 0 : index
    %c0_108 = arith.constant 0 : index
    %245 = vector.load %arg14[%c0_107, %c0_108] : memref<1x608xf32, #tpu.memory_space<vmem>>, vector<1x192xf32>
    %246 = vector.broadcast %245 : vector<1x192xf32> to vector<34x192xf32>
    %247 = arith.addf %244, %246 : vector<34x192xf32>
    %cst_109 = arith.constant 0.000000e+00 : f32
    %248 = vector.broadcast %cst_109 : f32 to vector<34x192xf32>
    %249 = arith.maximumf %247, %248 : vector<34x192xf32>
    %250 = vector.extract_strided_slice %249 {offsets = [0, 0], sizes = [34, 64], strides = [1, 1]} : vector<34x192xf32> to vector<34x64xf32>
    %251 = arith.truncf %250 : vector<34x64xf32> to vector<34x64xbf16>
    %c0_110 = arith.constant 0 : index
    %c0_111 = arith.constant 0 : index
    %c0_112 = arith.constant 0 : index
    %252 = vector.load %arg12[%c0_110, %c0_111, %c0_112] : memref<3x64x96xbf16, #tpu.memory_space<vmem>>, vector<1x64x96xbf16>
    %253 = vector.shape_cast %252 : vector<1x64x96xbf16> to vector<64x96xbf16>
    %c0_113 = arith.constant 0 : index
    %c192_114 = arith.constant 192 : index
    %254 = vector.load %arg14[%c0_113, %c192_114] : memref<1x608xf32, #tpu.memory_space<vmem>>, vector<1x64xf32>
    %c0_115 = arith.constant 0 : index
    %c384_116 = arith.constant 384 : index
    %255 = vector.load %arg14[%c0_115, %c384_116] : memref<1x608xf32, #tpu.memory_space<vmem>>, vector<1x32xf32>
    %256 = vector.extract_strided_slice %253 {offsets = [0, 0], sizes = [64, 64], strides = [1, 1]} : vector<64x96xbf16> to vector<64x64xbf16>
    %cst_117 = arith.constant dense<0.000000e+00> : vector<34x64xf32>
    %257 = tpu.matmul %251, %256, %cst_117 {dimension_numbers = #tpu.dot_dimension_numbers<[1], [0], [0], [1], [0, 0, 1, 1], [], []>} : vector<34x64xbf16>, vector<64x64xbf16>, vector<34x64xf32> -> vector<34x64xf32>
    %258 = vector.broadcast %254 : vector<1x64xf32> to vector<34x64xf32>
    %259 = arith.addf %257, %258 : vector<34x64xf32>
    %cst_118 = arith.constant 0.000000e+00 : f32
    %260 = vector.broadcast %cst_118 : f32 to vector<34x64xf32>
    %261 = arith.maximumf %259, %260 : vector<34x64xf32>
    %262 = arith.truncf %261 : vector<34x64xf32> to vector<34x64xbf16>
    %263 = vector.extract_strided_slice %253 {offsets = [0, 64], sizes = [64, 32], strides = [1, 1]} : vector<64x96xbf16> to vector<64x32xbf16>
    %cst_119 = arith.constant dense<0.000000e+00> : vector<34x32xf32>
    %264 = tpu.matmul %262, %263, %cst_119 {dimension_numbers = #tpu.dot_dimension_numbers<[1], [0], [0], [1], [0, 0, 1, 1], [], []>} : vector<34x64xbf16>, vector<64x32xbf16>, vector<34x32xf32> -> vector<34x32xf32>
    %265 = vector.broadcast %255 : vector<1x32xf32> to vector<34x32xf32>
    %266 = arith.addf %264, %265 : vector<34x32xf32>
    %267 = vector.extract_strided_slice %249 {offsets = [0, 64], sizes = [34, 64], strides = [1, 1]} : vector<34x192xf32> to vector<34x64xf32>
    %268 = arith.truncf %267 : vector<34x64xf32> to vector<34x64xbf16>
    %c1_120 = arith.constant 1 : index
    %c0_121 = arith.constant 0 : index
    %c0_122 = arith.constant 0 : index
    %269 = vector.load %arg12[%c1_120, %c0_121, %c0_122] : memref<3x64x96xbf16, #tpu.memory_space<vmem>>, vector<1x64x96xbf16>
    %270 = vector.shape_cast %269 : vector<1x64x96xbf16> to vector<64x96xbf16>
    %c0_123 = arith.constant 0 : index
    %c256_124 = arith.constant 256 : index
    %271 = vector.load %arg14[%c0_123, %c256_124] : memref<1x608xf32, #tpu.memory_space<vmem>>, vector<1x64xf32>
    %c0_125 = arith.constant 0 : index
    %c416_126 = arith.constant 416 : index
    %272 = vector.load %arg14[%c0_125, %c416_126] : memref<1x608xf32, #tpu.memory_space<vmem>>, vector<1x32xf32>
    %273 = vector.extract_strided_slice %270 {offsets = [0, 0], sizes = [64, 64], strides = [1, 1]} : vector<64x96xbf16> to vector<64x64xbf16>
    %cst_127 = arith.constant dense<0.000000e+00> : vector<34x64xf32>
    %274 = tpu.matmul %268, %273, %cst_127 {dimension_numbers = #tpu.dot_dimension_numbers<[1], [0], [0], [1], [0, 0, 1, 1], [], []>} : vector<34x64xbf16>, vector<64x64xbf16>, vector<34x64xf32> -> vector<34x64xf32>
    %275 = vector.broadcast %271 : vector<1x64xf32> to vector<34x64xf32>
    %276 = arith.addf %274, %275 : vector<34x64xf32>
    %cst_128 = arith.constant 0.000000e+00 : f32
    %277 = vector.broadcast %cst_128 : f32 to vector<34x64xf32>
    %278 = arith.maximumf %276, %277 : vector<34x64xf32>
    %279 = arith.truncf %278 : vector<34x64xf32> to vector<34x64xbf16>
    %280 = vector.extract_strided_slice %270 {offsets = [0, 64], sizes = [64, 32], strides = [1, 1]} : vector<64x96xbf16> to vector<64x32xbf16>
    %cst_129 = arith.constant dense<0.000000e+00> : vector<34x32xf32>
    %281 = tpu.matmul %279, %280, %cst_129 {dimension_numbers = #tpu.dot_dimension_numbers<[1], [0], [0], [1], [0, 0, 1, 1], [], []>} : vector<34x64xbf16>, vector<64x32xbf16>, vector<34x32xf32> -> vector<34x32xf32>
    %282 = vector.broadcast %272 : vector<1x32xf32> to vector<34x32xf32>
    %283 = arith.addf %281, %282 : vector<34x32xf32>
    %284 = vector.extract_strided_slice %249 {offsets = [0, 128], sizes = [34, 64], strides = [1, 1]} : vector<34x192xf32> to vector<34x64xf32>
    %285 = arith.truncf %284 : vector<34x64xf32> to vector<34x64xbf16>
    %c2_130 = arith.constant 2 : index
    %c0_131 = arith.constant 0 : index
    %c0_132 = arith.constant 0 : index
    %286 = vector.load %arg12[%c2_130, %c0_131, %c0_132] : memref<3x64x96xbf16, #tpu.memory_space<vmem>>, vector<1x64x96xbf16>
    %287 = vector.shape_cast %286 : vector<1x64x96xbf16> to vector<64x96xbf16>
    %c0_133 = arith.constant 0 : index
    %c320_134 = arith.constant 320 : index
    %288 = vector.load %arg14[%c0_133, %c320_134] : memref<1x608xf32, #tpu.memory_space<vmem>>, vector<1x64xf32>
    %c0_135 = arith.constant 0 : index
    %c448_136 = arith.constant 448 : index
    %289 = vector.load %arg14[%c0_135, %c448_136] : memref<1x608xf32, #tpu.memory_space<vmem>>, vector<1x32xf32>
    %290 = vector.extract_strided_slice %287 {offsets = [0, 0], sizes = [64, 64], strides = [1, 1]} : vector<64x96xbf16> to vector<64x64xbf16>
    %cst_137 = arith.constant dense<0.000000e+00> : vector<34x64xf32>
    %291 = tpu.matmul %285, %290, %cst_137 {dimension_numbers = #tpu.dot_dimension_numbers<[1], [0], [0], [1], [0, 0, 1, 1], [], []>} : vector<34x64xbf16>, vector<64x64xbf16>, vector<34x64xf32> -> vector<34x64xf32>
    %292 = vector.broadcast %288 : vector<1x64xf32> to vector<34x64xf32>
    %293 = arith.addf %291, %292 : vector<34x64xf32>
    %cst_138 = arith.constant 0.000000e+00 : f32
    %294 = vector.broadcast %cst_138 : f32 to vector<34x64xf32>
    %295 = arith.maximumf %293, %294 : vector<34x64xf32>
    %296 = arith.truncf %295 : vector<34x64xf32> to vector<34x64xbf16>
    %297 = vector.extract_strided_slice %287 {offsets = [0, 64], sizes = [64, 32], strides = [1, 1]} : vector<64x96xbf16> to vector<64x32xbf16>
    %cst_139 = arith.constant dense<0.000000e+00> : vector<34x32xf32>
    %298 = tpu.matmul %296, %297, %cst_139 {dimension_numbers = #tpu.dot_dimension_numbers<[1], [0], [0], [1], [0, 0, 1, 1], [], []>} : vector<34x64xbf16>, vector<64x32xbf16>, vector<34x32xf32> -> vector<34x32xf32>
    %299 = vector.broadcast %289 : vector<1x32xf32> to vector<34x32xf32>
    %300 = arith.addf %298, %299 : vector<34x32xf32>
    %cst_140 = arith.constant 0.000000e+00 : f32
    %301 = vector.broadcast %cst_140 : f32 to vector<34x32xf32>
    %302 = arith.maximumf %266, %301 : vector<34x32xf32>
    %cst_141 = arith.constant 0.000000e+00 : f32
    %303 = vector.broadcast %cst_141 : f32 to vector<34x32xf32>
    %304 = arith.maximumf %283, %303 : vector<34x32xf32>
    %cst_142 = arith.constant dense<0xFF800000> : vector<34xf32>
    %305 = vector.multi_reduction <maximumf>, %300, %cst_142 [1] : vector<34x32xf32> to vector<34xf32>
    %306 = vector.shape_cast %305 : vector<34xf32> to vector<34x1xf32>
    %307 = vector.broadcast %306 : vector<34x1xf32> to vector<34x32xf32>
    %308 = arith.subf %300, %307 : vector<34x32xf32>
    %309 = math.exp %308 : vector<34x32xf32>
    %cst_143 = arith.constant dense<0.000000e+00> : vector<34xf32>
    %310 = vector.multi_reduction <add>, %309, %cst_143 [1] : vector<34x32xf32> to vector<34xf32>
    %311 = vector.shape_cast %310 : vector<34xf32> to vector<34x1xf32>
    %312 = tpu.reciprocal %311 {approx = true} : vector<34x1xf32> -> vector<34x1xf32>
    %313 = vector.broadcast %312 : vector<34x1xf32> to vector<34x32xf32>
    %314 = arith.mulf %309, %313 : vector<34x32xf32>
    %c0_144 = arith.constant 0 : index
    %c480_145 = arith.constant 480 : index
    %315 = vector.load %arg14[%c0_144, %c480_145] : memref<1x608xf32, #tpu.memory_space<vmem>>, vector<1x32xf32>
    %316 = arith.truncf %314 : vector<34x32xf32> to vector<34x32xbf16>
    %c0_146 = arith.constant 0 : index
    %c0_147 = arith.constant 0 : index
    %c0_148 = arith.constant 0 : index
    %317 = vector.load %arg13[%c0_146, %c0_147, %c0_148] : memref<4x32x32xbf16, #tpu.memory_space<vmem>>, vector<1x32x32xbf16>
    %318 = vector.shape_cast %317 : vector<1x32x32xbf16> to vector<32x32xbf16>
    %cst_149 = arith.constant dense<0.000000e+00> : vector<34x32xf32>
    %319 = tpu.matmul %316, %318, %cst_149 {dimension_numbers = #tpu.dot_dimension_numbers<[1], [0], [0], [1], [0, 0, 1, 1], [], []>} : vector<34x32xbf16>, vector<32x32xbf16>, vector<34x32xf32> -> vector<34x32xf32>
    %320 = vector.broadcast %315 : vector<1x32xf32> to vector<34x32xf32>
    %321 = arith.addf %319, %320 : vector<34x32xf32>
    %322 = arith.truncf %321 : vector<34x32xf32> to vector<34x32xbf16>
    %323 = vector.shape_cast %322 : vector<34x32xbf16> to vector<1x34x32xbf16>
    %c0_150 = arith.constant 0 : index
    %c512_151 = arith.constant 512 : index
    %324 = vector.load %arg14[%c0_150, %c512_151] : memref<1x608xf32, #tpu.memory_space<vmem>>, vector<1x32xf32>
    %325 = arith.truncf %302 : vector<34x32xf32> to vector<34x32xbf16>
    %c1_152 = arith.constant 1 : index
    %c0_153 = arith.constant 0 : index
    %c0_154 = arith.constant 0 : index
    %326 = vector.load %arg13[%c1_152, %c0_153, %c0_154] : memref<4x32x32xbf16, #tpu.memory_space<vmem>>, vector<1x32x32xbf16>
    %327 = vector.shape_cast %326 : vector<1x32x32xbf16> to vector<32x32xbf16>
    %cst_155 = arith.constant dense<0.000000e+00> : vector<34x32xf32>
    %328 = tpu.matmul %325, %327, %cst_155 {dimension_numbers = #tpu.dot_dimension_numbers<[1], [0], [0], [1], [0, 0, 1, 1], [], []>} : vector<34x32xbf16>, vector<32x32xbf16>, vector<34x32xf32> -> vector<34x32xf32>
    %329 = vector.broadcast %324 : vector<1x32xf32> to vector<34x32xf32>
    %330 = arith.addf %328, %329 : vector<34x32xf32>
    %331 = arith.truncf %330 : vector<34x32xf32> to vector<34x32xbf16>
    %332 = vector.shape_cast %331 : vector<34x32xbf16> to vector<1x34x32xbf16>
    %c0_156 = arith.constant 0 : index
    %c544_157 = arith.constant 544 : index
    %333 = vector.load %arg14[%c0_156, %c544_157] : memref<1x608xf32, #tpu.memory_space<vmem>>, vector<1x32xf32>
    %334 = arith.truncf %304 : vector<34x32xf32> to vector<34x32xbf16>
    %c2_158 = arith.constant 2 : index
    %c0_159 = arith.constant 0 : index
    %c0_160 = arith.constant 0 : index
    %335 = vector.load %arg13[%c2_158, %c0_159, %c0_160] : memref<4x32x32xbf16, #tpu.memory_space<vmem>>, vector<1x32x32xbf16>
    %336 = vector.shape_cast %335 : vector<1x32x32xbf16> to vector<32x32xbf16>
    %cst_161 = arith.constant dense<0.000000e+00> : vector<34x32xf32>
    %337 = tpu.matmul %334, %336, %cst_161 {dimension_numbers = #tpu.dot_dimension_numbers<[1], [0], [0], [1], [0, 0, 1, 1], [], []>} : vector<34x32xbf16>, vector<32x32xbf16>, vector<34x32xf32> -> vector<34x32xf32>
    %338 = vector.broadcast %333 : vector<1x32xf32> to vector<34x32xf32>
    %339 = arith.addf %337, %338 : vector<34x32xf32>
    %340 = arith.truncf %339 : vector<34x32xf32> to vector<34x32xbf16>
    %341 = vector.shape_cast %340 : vector<34x32xbf16> to vector<1x34x32xbf16>
    %c3_162 = arith.constant 3 : index
    %c0_163 = arith.constant 0 : index
    %c0_164 = arith.constant 0 : index
    %342 = vector.load %arg13[%c3_162, %c0_163, %c0_164] : memref<4x32x32xbf16, #tpu.memory_space<vmem>>, vector<1x32x32xbf16>
    %343 = vector.shape_cast %342 : vector<1x32x32xbf16> to vector<32x32xbf16>
    %344 = vector.extract_strided_slice %323 {offsets = [0, 0, 0], sizes = [1, 34, 8], strides = [1, 1, 1]} : vector<1x34x32xbf16> to vector<1x34x8xbf16>
    %345 = vector.extract_strided_slice %332 {offsets = [0, 0, 0], sizes = [1, 34, 8], strides = [1, 1, 1]} : vector<1x34x32xbf16> to vector<1x34x8xbf16>
    "tpu.trace_start"() <{level = 10 : i32, message = "bqd,bkd->bqk"}> : () -> ()
    %cst_165 = arith.constant dense<0.000000e+00> : vector<1x34x34xf32>
    %346 = tpu.matmul %344, %345, %cst_165 {dimension_numbers = #tpu.dot_dimension_numbers<[2], [2], [1], [1], [0, 0, 0, 1, 1, 1], [0], [0]>} : vector<1x34x8xbf16>, vector<1x34x8xbf16>, vector<1x34x34xf32> -> vector<1x34x34xf32>
    "tpu.trace_stop"() : () -> ()
    %cst_166 = arith.constant 0.353553385 : f32
    %347 = vector.broadcast %cst_166 : f32 to vector<1x34x34xf32>
    %348 = arith.mulf %346, %347 : vector<1x34x34xf32>
    %cst_167 = arith.constant dense<0xFF800000> : vector<1x34xf32>
    %349 = vector.multi_reduction <maximumf>, %348, %cst_167 [2] : vector<1x34x34xf32> to vector<1x34xf32>
    %350 = vector.shape_cast %349 : vector<1x34xf32> to vector<1x34x1xf32>
    %351 = vector.broadcast %350 : vector<1x34x1xf32> to vector<1x34x34xf32>
    %352 = arith.subf %348, %351 : vector<1x34x34xf32>
    %353 = math.exp %352 : vector<1x34x34xf32>
    %cst_168 = arith.constant dense<0.000000e+00> : vector<1x34xf32>
    %354 = vector.multi_reduction <add>, %353, %cst_168 [2] : vector<1x34x34xf32> to vector<1x34xf32>
    %355 = vector.shape_cast %354 : vector<1x34xf32> to vector<1x34x1xf32>
    %356 = tpu.reciprocal %355 {approx = true} : vector<1x34x1xf32> -> vector<1x34x1xf32>
    %357 = vector.broadcast %356 : vector<1x34x1xf32> to vector<1x34x34xf32>
    %358 = arith.mulf %353, %357 : vector<1x34x34xf32>
    %359 = arith.truncf %358 : vector<1x34x34xf32> to vector<1x34x34xbf16>
    %360 = vector.extract_strided_slice %341 {offsets = [0, 0, 0], sizes = [1, 34, 8], strides = [1, 1, 1]} : vector<1x34x32xbf16> to vector<1x34x8xbf16>
    "tpu.trace_start"() <{level = 10 : i32, message = "bqk,bkd->bqd"}> : () -> ()
    %cst_169 = arith.constant dense<0.000000e+00> : vector<1x34x8xf32>
    %361 = tpu.matmul %359, %360, %cst_169 {dimension_numbers = #tpu.dot_dimension_numbers<[2], [1], [1], [2], [0, 0, 0, 1, 1, 2], [0], [0]>} : vector<1x34x34xbf16>, vector<1x34x8xbf16>, vector<1x34x8xf32> -> vector<1x34x8xf32>
    "tpu.trace_stop"() : () -> ()
    %362 = arith.truncf %361 : vector<1x34x8xf32> to vector<1x34x8xbf16>
    %363 = vector.extract_strided_slice %343 {offsets = [0, 0], sizes = [8, 32], strides = [1, 1]} : vector<32x32xbf16> to vector<8x32xbf16>
    "tpu.trace_start"() <{level = 10 : i32, message = "bqd,do->bqo"}> : () -> ()
    %cst_170 = arith.constant dense<0.000000e+00> : vector<1x34x32xf32>
    %364 = tpu.matmul %362, %363, %cst_170 {dimension_numbers = #tpu.dot_dimension_numbers<[2], [0], [0, 1], [1], [0, 0, 0, 1, 1, 1], [], []>} : vector<1x34x8xbf16>, vector<8x32xbf16>, vector<1x34x32xf32> -> vector<1x34x32xf32>
    "tpu.trace_stop"() : () -> ()
    %365 = vector.extract_strided_slice %323 {offsets = [0, 0, 8], sizes = [1, 34, 8], strides = [1, 1, 1]} : vector<1x34x32xbf16> to vector<1x34x8xbf16>
    %366 = vector.extract_strided_slice %332 {offsets = [0, 0, 8], sizes = [1, 34, 8], strides = [1, 1, 1]} : vector<1x34x32xbf16> to vector<1x34x8xbf16>
    "tpu.trace_start"() <{level = 10 : i32, message = "bqd,bkd->bqk"}> : () -> ()
    %cst_171 = arith.constant dense<0.000000e+00> : vector<1x34x34xf32>
    %367 = tpu.matmul %365, %366, %cst_171 {dimension_numbers = #tpu.dot_dimension_numbers<[2], [2], [1], [1], [0, 0, 0, 1, 1, 1], [0], [0]>} : vector<1x34x8xbf16>, vector<1x34x8xbf16>, vector<1x34x34xf32> -> vector<1x34x34xf32>
    "tpu.trace_stop"() : () -> ()
    %cst_172 = arith.constant 0.353553385 : f32
    %368 = vector.broadcast %cst_172 : f32 to vector<1x34x34xf32>
    %369 = arith.mulf %367, %368 : vector<1x34x34xf32>
    %cst_173 = arith.constant dense<0xFF800000> : vector<1x34xf32>
    %370 = vector.multi_reduction <maximumf>, %369, %cst_173 [2] : vector<1x34x34xf32> to vector<1x34xf32>
    %371 = vector.shape_cast %370 : vector<1x34xf32> to vector<1x34x1xf32>
    %372 = vector.broadcast %371 : vector<1x34x1xf32> to vector<1x34x34xf32>
    %373 = arith.subf %369, %372 : vector<1x34x34xf32>
    %374 = math.exp %373 : vector<1x34x34xf32>
    %cst_174 = arith.constant dense<0.000000e+00> : vector<1x34xf32>
    %375 = vector.multi_reduction <add>, %374, %cst_174 [2] : vector<1x34x34xf32> to vector<1x34xf32>
    %376 = vector.shape_cast %375 : vector<1x34xf32> to vector<1x34x1xf32>
    %377 = tpu.reciprocal %376 {approx = true} : vector<1x34x1xf32> -> vector<1x34x1xf32>
    %378 = vector.broadcast %377 : vector<1x34x1xf32> to vector<1x34x34xf32>
    %379 = arith.mulf %374, %378 : vector<1x34x34xf32>
    %380 = arith.truncf %379 : vector<1x34x34xf32> to vector<1x34x34xbf16>
    %381 = vector.extract_strided_slice %341 {offsets = [0, 0, 8], sizes = [1, 34, 8], strides = [1, 1, 1]} : vector<1x34x32xbf16> to vector<1x34x8xbf16>
    "tpu.trace_start"() <{level = 10 : i32, message = "bqk,bkd->bqd"}> : () -> ()
    %cst_175 = arith.constant dense<0.000000e+00> : vector<1x34x8xf32>
    %382 = tpu.matmul %380, %381, %cst_175 {dimension_numbers = #tpu.dot_dimension_numbers<[2], [1], [1], [2], [0, 0, 0, 1, 1, 2], [0], [0]>} : vector<1x34x34xbf16>, vector<1x34x8xbf16>, vector<1x34x8xf32> -> vector<1x34x8xf32>
    "tpu.trace_stop"() : () -> ()
    %383 = arith.truncf %382 : vector<1x34x8xf32> to vector<1x34x8xbf16>
    %384 = vector.extract_strided_slice %343 {offsets = [8, 0], sizes = [8, 32], strides = [1, 1]} : vector<32x32xbf16> to vector<8x32xbf16>
    "tpu.trace_start"() <{level = 10 : i32, message = "bqd,do->bqo"}> : () -> ()
    %cst_176 = arith.constant dense<0.000000e+00> : vector<1x34x32xf32>
    %385 = tpu.matmul %383, %384, %cst_176 {dimension_numbers = #tpu.dot_dimension_numbers<[2], [0], [0, 1], [1], [0, 0, 0, 1, 1, 1], [], []>} : vector<1x34x8xbf16>, vector<8x32xbf16>, vector<1x34x32xf32> -> vector<1x34x32xf32>
    "tpu.trace_stop"() : () -> ()
    %386 = arith.addf %364, %385 : vector<1x34x32xf32>
    %387 = vector.extract_strided_slice %323 {offsets = [0, 0, 16], sizes = [1, 34, 8], strides = [1, 1, 1]} : vector<1x34x32xbf16> to vector<1x34x8xbf16>
    %388 = vector.extract_strided_slice %332 {offsets = [0, 0, 16], sizes = [1, 34, 8], strides = [1, 1, 1]} : vector<1x34x32xbf16> to vector<1x34x8xbf16>
    "tpu.trace_start"() <{level = 10 : i32, message = "bqd,bkd->bqk"}> : () -> ()
    %cst_177 = arith.constant dense<0.000000e+00> : vector<1x34x34xf32>
    %389 = tpu.matmul %387, %388, %cst_177 {dimension_numbers = #tpu.dot_dimension_numbers<[2], [2], [1], [1], [0, 0, 0, 1, 1, 1], [0], [0]>} : vector<1x34x8xbf16>, vector<1x34x8xbf16>, vector<1x34x34xf32> -> vector<1x34x34xf32>
    "tpu.trace_stop"() : () -> ()
    %cst_178 = arith.constant 0.353553385 : f32
    %390 = vector.broadcast %cst_178 : f32 to vector<1x34x34xf32>
    %391 = arith.mulf %389, %390 : vector<1x34x34xf32>
    %cst_179 = arith.constant dense<0xFF800000> : vector<1x34xf32>
    %392 = vector.multi_reduction <maximumf>, %391, %cst_179 [2] : vector<1x34x34xf32> to vector<1x34xf32>
    %393 = vector.shape_cast %392 : vector<1x34xf32> to vector<1x34x1xf32>
    %394 = vector.broadcast %393 : vector<1x34x1xf32> to vector<1x34x34xf32>
    %395 = arith.subf %391, %394 : vector<1x34x34xf32>
    %396 = math.exp %395 : vector<1x34x34xf32>
    %cst_180 = arith.constant dense<0.000000e+00> : vector<1x34xf32>
    %397 = vector.multi_reduction <add>, %396, %cst_180 [2] : vector<1x34x34xf32> to vector<1x34xf32>
    %398 = vector.shape_cast %397 : vector<1x34xf32> to vector<1x34x1xf32>
    %399 = tpu.reciprocal %398 {approx = true} : vector<1x34x1xf32> -> vector<1x34x1xf32>
    %400 = vector.broadcast %399 : vector<1x34x1xf32> to vector<1x34x34xf32>
    %401 = arith.mulf %396, %400 : vector<1x34x34xf32>
    %402 = arith.truncf %401 : vector<1x34x34xf32> to vector<1x34x34xbf16>
    %403 = vector.extract_strided_slice %341 {offsets = [0, 0, 16], sizes = [1, 34, 8], strides = [1, 1, 1]} : vector<1x34x32xbf16> to vector<1x34x8xbf16>
    "tpu.trace_start"() <{level = 10 : i32, message = "bqk,bkd->bqd"}> : () -> ()
    %cst_181 = arith.constant dense<0.000000e+00> : vector<1x34x8xf32>
    %404 = tpu.matmul %402, %403, %cst_181 {dimension_numbers = #tpu.dot_dimension_numbers<[2], [1], [1], [2], [0, 0, 0, 1, 1, 2], [0], [0]>} : vector<1x34x34xbf16>, vector<1x34x8xbf16>, vector<1x34x8xf32> -> vector<1x34x8xf32>
    "tpu.trace_stop"() : () -> ()
    %405 = arith.truncf %404 : vector<1x34x8xf32> to vector<1x34x8xbf16>
    %406 = vector.extract_strided_slice %343 {offsets = [16, 0], sizes = [8, 32], strides = [1, 1]} : vector<32x32xbf16> to vector<8x32xbf16>
    "tpu.trace_start"() <{level = 10 : i32, message = "bqd,do->bqo"}> : () -> ()
    %cst_182 = arith.constant dense<0.000000e+00> : vector<1x34x32xf32>
    %407 = tpu.matmul %405, %406, %cst_182 {dimension_numbers = #tpu.dot_dimension_numbers<[2], [0], [0, 1], [1], [0, 0, 0, 1, 1, 1], [], []>} : vector<1x34x8xbf16>, vector<8x32xbf16>, vector<1x34x32xf32> -> vector<1x34x32xf32>
    "tpu.trace_stop"() : () -> ()
    %408 = arith.addf %386, %407 : vector<1x34x32xf32>
    %409 = vector.extract_strided_slice %323 {offsets = [0, 0, 24], sizes = [1, 34, 8], strides = [1, 1, 1]} : vector<1x34x32xbf16> to vector<1x34x8xbf16>
    %410 = vector.extract_strided_slice %332 {offsets = [0, 0, 24], sizes = [1, 34, 8], strides = [1, 1, 1]} : vector<1x34x32xbf16> to vector<1x34x8xbf16>
    "tpu.trace_start"() <{level = 10 : i32, message = "bqd,bkd->bqk"}> : () -> ()
    %cst_183 = arith.constant dense<0.000000e+00> : vector<1x34x34xf32>
    %411 = tpu.matmul %409, %410, %cst_183 {dimension_numbers = #tpu.dot_dimension_numbers<[2], [2], [1], [1], [0, 0, 0, 1, 1, 1], [0], [0]>} : vector<1x34x8xbf16>, vector<1x34x8xbf16>, vector<1x34x34xf32> -> vector<1x34x34xf32>
    "tpu.trace_stop"() : () -> ()
    %cst_184 = arith.constant 0.353553385 : f32
    %412 = vector.broadcast %cst_184 : f32 to vector<1x34x34xf32>
    %413 = arith.mulf %411, %412 : vector<1x34x34xf32>
    %cst_185 = arith.constant dense<0xFF800000> : vector<1x34xf32>
    %414 = vector.multi_reduction <maximumf>, %413, %cst_185 [2] : vector<1x34x34xf32> to vector<1x34xf32>
    %415 = vector.shape_cast %414 : vector<1x34xf32> to vector<1x34x1xf32>
    %416 = vector.broadcast %415 : vector<1x34x1xf32> to vector<1x34x34xf32>
    %417 = arith.subf %413, %416 : vector<1x34x34xf32>
    %418 = math.exp %417 : vector<1x34x34xf32>
    %cst_186 = arith.constant dense<0.000000e+00> : vector<1x34xf32>
    %419 = vector.multi_reduction <add>, %418, %cst_186 [2] : vector<1x34x34xf32> to vector<1x34xf32>
    %420 = vector.shape_cast %419 : vector<1x34xf32> to vector<1x34x1xf32>
    %421 = tpu.reciprocal %420 {approx = true} : vector<1x34x1xf32> -> vector<1x34x1xf32>
    %422 = vector.broadcast %421 : vector<1x34x1xf32> to vector<1x34x34xf32>
    %423 = arith.mulf %418, %422 : vector<1x34x34xf32>
    %424 = arith.truncf %423 : vector<1x34x34xf32> to vector<1x34x34xbf16>
    %425 = vector.extract_strided_slice %341 {offsets = [0, 0, 24], sizes = [1, 34, 8], strides = [1, 1, 1]} : vector<1x34x32xbf16> to vector<1x34x8xbf16>
    "tpu.trace_start"() <{level = 10 : i32, message = "bqk,bkd->bqd"}> : () -> ()
    %cst_187 = arith.constant dense<0.000000e+00> : vector<1x34x8xf32>
    %426 = tpu.matmul %424, %425, %cst_187 {dimension_numbers = #tpu.dot_dimension_numbers<[2], [1], [1], [2], [0, 0, 0, 1, 1, 2], [0], [0]>} : vector<1x34x34xbf16>, vector<1x34x8xbf16>, vector<1x34x8xf32> -> vector<1x34x8xf32>
    "tpu.trace_stop"() : () -> ()
    %427 = arith.truncf %426 : vector<1x34x8xf32> to vector<1x34x8xbf16>
    %428 = vector.extract_strided_slice %343 {offsets = [24, 0], sizes = [8, 32], strides = [1, 1]} : vector<32x32xbf16> to vector<8x32xbf16>
    "tpu.trace_start"() <{level = 10 : i32, message = "bqd,do->bqo"}> : () -> ()
    %cst_188 = arith.constant dense<0.000000e+00> : vector<1x34x32xf32>
    %429 = tpu.matmul %427, %428, %cst_188 {dimension_numbers = #tpu.dot_dimension_numbers<[2], [0], [0, 1], [1], [0, 0, 0, 1, 1, 1], [], []>} : vector<1x34x8xbf16>, vector<8x32xbf16>, vector<1x34x32xf32> -> vector<1x34x32xf32>
    "tpu.trace_stop"() : () -> ()
    %430 = arith.addf %408, %429 : vector<1x34x32xf32>
    %c0_189 = arith.constant 0 : index
    %c576_190 = arith.constant 576 : index
    %431 = vector.load %arg14[%c0_189, %c576_190] : memref<1x608xf32, #tpu.memory_space<vmem>>, vector<1x32xf32>
    %432 = vector.shape_cast %431 : vector<1x32xf32> to vector<1x1x32xf32>
    %433 = vector.broadcast %432 : vector<1x1x32xf32> to vector<1x34x32xf32>
    %434 = arith.addf %430, %433 : vector<1x34x32xf32>
    %c0_191 = arith.constant 0 : index
    %c0_192 = arith.constant 0 : index
    %c0_193 = arith.constant 0 : index
    %435 = vector.load %arg15[%c0_191, %c0_192, %c0_193] : memref<1x34x32xf32, #tpu.memory_space<vmem>>, vector<1x34x32xf32>
    tpu.vector_store %arg15[%c0_191, %c0_192, %c0_193], %434 {strides = array<i32>} : memref<1x34x32xf32, #tpu.memory_space<vmem>>, vector<1x34x32xf32>,
    return
  }
  func.func @transform_0(%arg0: i32) -> (i32, i32, i32) {
    %c0_i32 = arith.constant 0 : i32
    %c0_i32_0 = arith.constant 0 : i32
    %c0_i32_1 = arith.constant 0 : i32
    return %arg0, %c0_i32, %c0_i32_0 : i32, i32, i32
  }
  func.func @transform_1(%arg0: i32) -> (i32, i32, i32) {
    %c0_i32 = arith.constant 0 : i32
    %c0_i32_0 = arith.constant 0 : i32
    %c0_i32_1 = arith.constant 0 : i32
    return %arg0, %c0_i32, %c0_i32_0 : i32, i32, i32
  }
  func.func @transform_2(%arg0: i32) -> (i32, i32) {
    %c0_i32 = arith.constant 0 : i32
    %c0_i32_0 = arith.constant 0 : i32
    %c0_i32_1 = arith.constant 0 : i32
    return %c0_i32, %c0_i32_0 : i32, i32
  }
  func.func @transform_3(%arg0: i32) -> (i32, i32) {
    %c0_i32 = arith.constant 0 : i32
    %c0_i32_0 = arith.constant 0 : i32
    %c0_i32_1 = arith.constant 0 : i32
    return %c0_i32, %c0_i32_0 : i32, i32
  }
  func.func @transform_4(%arg0: i32) -> (i32, i32) {
    %c0_i32 = arith.constant 0 : i32
    %c0_i32_0 = arith.constant 0 : i32
    %c0_i32_1 = arith.constant 0 : i32
    return %c0_i32, %c0_i32_0 : i32, i32
  }
  func.func @transform_5(%arg0: i32) -> (i32, i32) {
    %c0_i32 = arith.constant 0 : i32
    %c0_i32_0 = arith.constant 0 : i32
    %c0_i32_1 = arith.constant 0 : i32
    return %c0_i32, %c0_i32_0 : i32, i32
  }
  func.func @transform_6(%arg0: i32) -> (i32, i32) {
    %c0_i32 = arith.constant 0 : i32
    %c0_i32_0 = arith.constant 0 : i32
    %c0_i32_1 = arith.constant 0 : i32
    return %c0_i32, %c0_i32_0 : i32, i32
  }
  func.func @transform_7(%arg0: i32) -> (i32, i32, i32) {
    %c0_i32 = arith.constant 0 : i32
    %c0_i32_0 = arith.constant 0 : i32
    %c0_i32_1 = arith.constant 0 : i32
    %c0_i32_2 = arith.constant 0 : i32
    return %c0_i32, %c0_i32_0, %c0_i32_1 : i32, i32, i32
  }
  func.func @transform_8(%arg0: i32) -> (i32, i32, i32) {
    %c0_i32 = arith.constant 0 : i32
    %c0_i32_0 = arith.constant 0 : i32
    %c0_i32_1 = arith.constant 0 : i32
    %c0_i32_2 = arith.constant 0 : i32
    return %c0_i32, %c0_i32_0, %c0_i32_1 : i32, i32, i32
  }
  func.func @transform_9(%arg0: i32) -> (i32, i32) {
    %c0_i32 = arith.constant 0 : i32
    %c0_i32_0 = arith.constant 0 : i32
    %c0_i32_1 = arith.constant 0 : i32
    return %c0_i32, %c0_i32_0 : i32, i32
  }
  func.func @transform_10(%arg0: i32) -> (i32, i32) {
    %c0_i32 = arith.constant 0 : i32
    %c0_i32_0 = arith.constant 0 : i32
    %c0_i32_1 = arith.constant 0 : i32
    return %c0_i32, %c0_i32_0 : i32, i32
  }
  func.func @transform_11(%arg0: i32) -> (i32, i32, i32) {
    %c0_i32 = arith.constant 0 : i32
    %c0_i32_0 = arith.constant 0 : i32
    %c0_i32_1 = arith.constant 0 : i32
    %c0_i32_2 = arith.constant 0 : i32
    return %c0_i32, %c0_i32_0, %c0_i32_1 : i32, i32, i32
  }
  func.func @transform_12(%arg0: i32) -> (i32, i32, i32) {
    %c0_i32 = arith.constant 0 : i32
    %c0_i32_0 = arith.constant 0 : i32
    %c0_i32_1 = arith.constant 0 : i32
    %c0_i32_2 = arith.constant 0 : i32
    return %c0_i32, %c0_i32_0, %c0_i32_1 : i32, i32, i32
  }
  func.func @transform_13(%arg0: i32) -> (i32, i32) {
    %c0_i32 = arith.constant 0 : i32
    %c0_i32_0 = arith.constant 0 : i32
    %c0_i32_1 = arith.constant 0 : i32
    return %c0_i32, %c0_i32_0 : i32, i32
  }
  func.func @transform_14(%arg0: i32) -> (i32, i32, i32) {
    %c0_i32 = arith.constant 0 : i32
    %c0_i32_0 = arith.constant 0 : i32
    %c0_i32_1 = arith.constant 0 : i32
    return %arg0, %c0_i32, %c0_i32_0 : i32, i32, i32
  }
}

</mosaic_0001>

<bundles_post_ra>
// kernel: space_act_optim_forward.1
= control target key start
LH: loop header
LB: loop body
LE: loop exit
PB: predicated region body
PF: predicated region fallthrough
CT: control target
= control target key end

     0   :  { %s8079_s29 = smov 0   ;;  %s9866_s0 = inlined_call_operand.vmem [shape: f32[2,1,21], index: 0, kind: input, shape index: {}]   ;;  %s9867_s1 = inlined_call_operand.vmem [shape: f32[2,34,768], index: 1, kind: input, shape index: {}]   ;;  %s9868_s2 = inlined_call_operand.vmem [shape: bf16[21,64], index: 2, kind: input, shape index: {}]   ;;  %s9869_s3 = inlined_call_operand.vmem [shape: bf16[64,96], index: 3, kind: input, shape index: {}]   ;;  %s9870_s4 = inlined_call_operand.vmem [shape: bf16[32,64], index: 4, kind: input, shape index: {}]   ;;  %s9871_s5 = inlined_call_operand.vmem [shape: f32[1,224], index: 5, kind: input, shape index: {}]   ;;  %s9872_s6 = inlined_call_operand.vmem [shape: bf16[768,192], index: 6, kind: input, shape index: {}]   ;;  %s9873_s7 = inlined_call_operand.vmem [shape: bf16[3,64,96], index: 7, kind: input, shape index: {}]   ;;  %s9874_s8 = inlined_call_operand.vmem [shape: bf16[4,32,32], index: 8, kind: input, shape index: {}]   ;;  %s9875_s9 = inlined_call_operand.vmem [shape: f32[1,608], index: 9, kind: input, shape index: {}]   ;;  %s9876_s10 = inlined_call_operand.vmem [shape: bf16[32,192], index: 10, kind: input, shape index: {}]   ;;  %s9877_s11 = inlined_call_operand.vmem [shape: bf16[3,64,96], index: 11, kind: input, shape index: {}]   ;;  %s9878_s12 = inlined_call_operand.vmem [shape: bf16[4,32,32], index: 12, kind: input, shape index: {}]   ;;  %s9879_s13 = inlined_call_operand.vmem [shape: f32[1,608], index: 13, kind: input, shape index: {}]   ;;  %s9880_s14 = inlined_call_operand.vmem [shape: f32[2,34,32], index: 14, kind: output, shape index: {}]  }
   0x1 LB: > { %s6136_s30 = sadd.s32 4294967295, %s7992_s29   ;;  %p6140_p0 = scmp.ge.s32.totalorder %s7992_s29, 1  ;;  %s7992_s29 = sphi %s8079_s29, %s24_s29  }
   0x2   : > { %p420_p1 = scmp.lt.s32.totalorder %s7992_s29, 3 }
   0x4   : > { %p421_p2 = pnand %p6140_p0, %p420_p1 }
   0x5   : > { %v7588_v0 = vld [vmem:[%s9868_s2] sm:$0xff] (!%p421_p2)   ;;  %v7994_v1 = vmov (!%p421_p2), 0.0   ;;  %v7589_v2 = vld [vmem:[%s9868_s2 + $0x8] ss:$0 sps:$4 sm:$0x77] (!%p421_p2)   ;;  %vm502_vm0 = vcmask (!%p421_p2), 1041408   ;;  %v584_v13 = vlaneseq (!%p421_p2) }
   0x6   : > { %424 = sbr.rel (%p421_p2) target bundleno = 9034 (0x234a), region = 76  ;;  %6750 = vmatprep.subr.bf16.mxu1 (!%p421_p2), %v7994_v1  ;;  %6770 = vmatprep.subr.bf16.mxu0 (!%p421_p2), %v7994_v1  ;;  %vm503_vm1 = vcmask (!%p421_p2), 1042432   ;;  %p469_p3 = scmp.lt.s32.totalorder (!%p421_p2), %s6136_s30, 1  ;;  %v7995_v3 = vmov (!%p421_p2), 65535   ;;  %vm7996_vm2 = vmmov (!%p421_p2), 0   ;;  %v7590_v7 = vld [vmem:[%s9869_s3] sm:$0xff] (!%p421_p2)  }
   0x7   : > { %6751 = vmatpush3.bf16.msra.mxu1 (!%p421_p2), %v7588_v0  ;;  %v504_v4 = vsel (!%p421_p2), %vm502_vm0, 4294967295, %v7995_v3  ;;  %6754 = vmatprep.mubr.msk.bf16.mxu1 (!%p421_p2), %vm7996_vm2, %v7994_v1  ;;  %vm498_vm3 = vcmask (!%p421_p2), 171008   ;;  %v7591_v10 = vld [vmem:[%s9869_s3 + $0x8] sm:$0xff] (!%p421_p2)   ;;  %v7592_v11 = vld [vmem:[%s9869_s3 + $0x10] sm:$0xff] (!%p421_p2)   ;;  %v7593_v12 = vld [vmem:[%s9869_s3 + $0x18] sm:$0xff] (!%p421_p2)   ;;  %v8125_v14 = vshrl.u32 (!%p421_p2), %v584_v13, 7 }
   0x8   : > { %6752 = vmatprep.subr.bf16.mxu1 (!%p421_p2), %v7994_v1  ;;  %v505_v5 = vsel (!%p421_p2), %vm503_vm1, %v504_v4, 0  ;;  %6778 = vmatprep.mubr.msk.bf16.mxu0 (!%p421_p2), %vm7996_vm2, %v7994_v1  ;;  %s7997_s16 = smov (!%p421_p2), 64   ;;  %v488_v16 = vld [vmem:[%s9871_s5] sm:$0x1] (!%p421_p2)  ;;  %vm591_vm4 = vcmask (!%p421_p2), 523264   ;;  %v7595_v38 = vld [vmem:[%s9870_s4 + $0x8] sm:$0xff] (!%p421_p2)  }
   0x9   : > { %v507_v6 = vand.u32 (!%p421_p2), %v7589_v2, %v505_v5  ;;  %638 = vrot.lane.b32.xlu0 (!%p421_p2), %v7590_v7, %s7997_s16  ;;  %642 = vrot.lane.b32.xlu1 (!%p421_p2), %v7592_v11, %s7997_s16  ;;  %v8130_v15 = vsub.s32 (!%p421_p2), 0, %v8125_v14  ;;  %v7594_v29 = vld [vmem:[%s9870_s4] sm:$0xff] (!%p421_p2)   ;;  %s7998_s25 = smov (!%p421_p2), 96   ;;  %vm719_vm5 = vcmask (!%p421_p2), 261120   ;;  %v7601_v53 = vld [vmem:[%s9872_s6 + $0x14] ss:$8 sps:$4 sm:$0xff] (!%p421_p2)  }
   0xa   : > { %v7598_v39 = vld [vmem:[%s9872_s6 + $0x4] ss:$8 sps:$4 sm:$0xff] (!%p421_p2)   ;;  %v637_v40 = vld [vmem:[%s9871_s5 + $0x1] sm:$0x1] (!%p421_p2)  ;;  %v7599_v54 = vld [vmem:[%s9872_s6 + $0x10] ss:$8 sps:$4 sm:$0xff] (!%p421_p2)  }
   0xb   : > { %6753 = vmatpush3.bf16.msra.mxu1 (!%p421_p2), %v507_v6  ;;  %v587_v17 = vrot.slane (!%p421_p2), %v488_v16, %v8130_v15  ;;  %v8164_v41 = vrot.slane (!%p421_p2), %v637_v40, %v8130_v15  ;;  %v7596_v50 = vld [vmem:[%s9872_s6] ss:$8 sps:$4 sm:$0xff] (!%p421_p2)   ;;  %v7604_v55 = vld [vmem:[%s9872_s6 + $0x24] ss:$8 sps:$4 sm:$0xff] (!%p421_p2)   ;;  %v7607_v57 = vld [vmem:[%s9872_s6 + $0x34] ss:$8 sps:$4 sm:$0xff] (!%p421_p2)  }
   0xc   : > { %6758 = vmatprep.subr.bf16.mxu1 (!%p421_p2), %v7994_v1  ;;  %v7602_v56 = vld [vmem:[%s9872_s6 + $0x20] ss:$8 sps:$4 sm:$0xff] (!%p421_p2)   ;;  %v7605_v58 = vld [vmem:[%s9872_s6 + $0x30] ss:$8 sps:$4 sm:$0xff] (!%p421_p2)   ;;  %v7610_v59 = vld [vmem:[%s9872_s6 + $0x44] ss:$8 sps:$4 sm:$0xff] (!%p421_p2)  }
   0xd   : > { %s9882_s30 = smov (!%p469_p3, %s6136_s30), 1  ;;  %640 = vrot.lane.b32.xlu0 %v7591_v10, %s7997_s16  ;;  %588 = vrot.lane.b32.xlu1 %v587_v17, %s7997_s16  ;;  %v7608_v60 = vld [vmem:[%s9872_s6 + $0x40] ss:$8 sps:$4 sm:$0xff]   ;;  %v7613_v61 = vld [vmem:[%s9872_s6 + $0x54] ss:$8 sps:$4 sm:$0xff]   ;;  %vm2274_vm6 = vcmask 254976  }
   0xe   : > { %s471_s23 = scalar_lea.vmem %s9866_s0, %s9882_s30  ;;  %s7568_s28 = smul.u32 240, %s9882_s30  ;;  %v7611_v62 = vld [vmem:[%s9872_s6 + $0x50] ss:$8 sps:$4 sm:$0xff]   ;;  %v7616_v63 = vld [vmem:[%s9872_s6 + $0x64] ss:$8 sps:$4 sm:$0xff]   ;;  %vm2599_vm7 = vcmask 64512  }
   0xf   : > { %v483_v8 = vld [vmem:[%s471_s23] sm:$0x1]  ;;  %v7619_v2 = vld [vmem:[%s9872_s6 + $0x74] ss:$8 sps:$4 sm:$0xff]   ;;  %v7617_v3 = vld [vmem:[%s9872_s6 + $0x70] ss:$8 sps:$4 sm:$0xff]  }
  0x10   : > { %v484_v9 = vpack.c.bf16 %v483_v8, %v483_v8  ;;  %s8173_s18 = scalar_lea.vmem %s9867_s1, %s7568_s28  ;;  %v7614_v0 = vld [vmem:[%s9872_s6 + $0x60] ss:$8 sps:$4 sm:$0xff]   ;;  %v7622_v4 = vld [vmem:[%s9872_s6 + $0x84] ss:$8 sps:$4 sm:$0xff]   ;;  %v7625_v6 = vld [vmem:[%s9872_s6 + $0x94] ss:$8 sps:$4 sm:$0xff]  }
  0x11   : > { %644 = vrot.lane.b32.xlu0 %v7593_v12, %s7997_s16  ;;  %764 = vrot.lane.b32.xlu1 %v7594_v29, %s7998_s25  ;;  %v829_v45 = vld [vmem:[%s8173_s18 + $0x8] sm:$0xff]  ;;  %v835_v46 = vld [vmem:[%s8173_s18 + $0x38] sm:$0xff]  ;;  %s7999_s22 = smov 32   ;;  %s8000_s15 = smov 120   ;;  %vm2679_vm8 = vcmask 277504   ;;  %vm2692_vm9 = vcmask 271360  }
  0x12   : > { %6755 = vmatmul.mubr.msk.bf16.vlgmr.msra.gmra.mrb[0].mxu1 %vm498_vm3, %v484_v9  ;;  %v859_v51 = vpack.c.bf16 %v835_v46, %v829_v45  ;;  %v7620_v5 = vld [vmem:[%s9872_s6 + $0x80] ss:$8 sps:$4 sm:$0xff]   ;;  %v7628_v8 = vld [vmem:[%s9872_s6 + $0xa4] ss:$8 sps:$4 sm:$0xff]   ;;  %v7635_v17 = vld [vmem:[%s9872_s6 + $0xd0] ss:$8 sps:$4 sm:$0xff]  }
  0x13   : > { %6759 = vmatpush3.bf16.msra.mxu1 %v7590_v7  ;;  %6766 = vmatprep.mubr.msk.bf16.mxu1 %vm7996_vm2, %v7994_v1  ;;  %v7623_v7 = vld [vmem:[%s9872_s6 + $0x90] ss:$8 sps:$4 sm:$0xff]   ;;  %v7626_v9 = vld [vmem:[%s9872_s6 + $0xa0] ss:$8 sps:$4 sm:$0xff]   ;;  %vm2748_vm10 = vcmask 1040384   ;;  %s8001_s23 = smov 112  }
  0x14   : > { %6760 = vmatprep.subr.bf16.mxu1 %v7994_v1  ;;  %v7632_v13 = vld [vmem:[%s9872_s6 + $0xc0] ss:$8 sps:$4 sm:$0xff]   ;;  %vm3057_vm11 = vcmask 1043456   ;;  %s8002_s28 = smov 104   ;;  %vm816_vm12 = vcmask 253952  }
  0x15   : > { %716 = vrot.lane.b32.xlu0 %v8164_v41, %s7998_s25  ;;  %766 = vrot.lane.b32.xlu1 %v7595_v38, %s7998_s25  ;;  %v837_v45 = vld [vmem:[%s8173_s18 + $0x48] sm:$0xff] }
  0x17   : > { %6761 = vmatpush3.bf16.msra.mxu1 %v7591_v10  ;;  %v7631_v10 = vld [vmem:[%s9872_s6 + $0xb4] ss:$8 sps:$4 sm:$0xff]  }
  0x18   : > { %6762 = vmatprep.subr.bf16.mxu1 %v7994_v1 }
  0x1b   : > { %6763 = vmatpush3.bf16.msra.mxu1 %v7592_v11  ;;  %v7629_v11 = vld [vmem:[%s9872_s6 + $0xb0] ss:$8 sps:$4 sm:$0xff]  }
  0x1c   : > { %6764 = vmatprep.subr.bf16.mxu1 %v7994_v1 }
  0x1f   : > { %6765 = vmatpush3.bf16.msra.mxu1 %v7593_v12  ;;  %v7634_v12 = vld [vmem:[%s9872_s6 + $0xc4] ss:$8 sps:$4 sm:$0xff]  }
  0x20   : > { %6782 = vmatprep.subr.bf16.mxu1 %v7994_v1 }
  0x7b   : > { %v639_v18 = vpop.permute.xlu0 %638  ;;  %v643_v21 = vpop.permute.xlu1 %642 }
  0x7c   : > { %6771 = vmatpush3.bf16.msra.mxu0 %v639_v18  ;;  %v7640_v18 = vld [vmem:[%s9872_s6 + $0xe4] ss:$8 sps:$4 sm:$0xff]  }
  0x7d   : > { %6772 = vmatprep.subr.bf16.mxu0 %v7994_v1 }
  0x7f   : > { %v641_v19 = vpop.permute.xlu0 %640  ;;  %v589_v30 = vpop.permute.xlu1 %588 }
  0x80   : > { %6773 = vmatpush3.bf16.msra.mxu0 %v641_v19  ;;  %v7638_v19 = vld [vmem:[%s9872_s6 + $0xe0] ss:$8 sps:$4 sm:$0xff]  }
  0x81   : > { %6774 = vmatprep.subr.bf16.mxu0 %v7994_v1 }
  0x83   : > { %v645_v28 = vpop.permute.xlu0 %644 }
  0x84   : > { %6775 = vmatpush3.bf16.msra.mxu0 %v643_v21  ;;  %v7641_v21 = vld [vmem:[%s9872_s6 + $0xf0] ss:$8 sps:$4 sm:$0xff]  }
  0x85   : > { %6776 = vmatprep.subr.bf16.mxu0 %v7994_v1 }
  0x88   : > { %6777 = vmatpush3.bf16.msra.mxu0 %v645_v28  ;;  %v7644_v28 = vld [vmem:[%s9872_s6 + $0x100] ss:$8 sps:$4 sm:$0xff]  }
  0x89   : > { %6790 = vmatprep.subr.bf16.mxu0 %v7994_v1 }
  0xe5   : > { %v543_v20 = vpop.f32.mrb[0].mxu1 }
  0xe6   : > { %v544_v22 = vadd.f32 %v543_v20, %v488_v16  ;;  %v6756_v23 = vpop.f32.mrb[1].mxu1  ;;  %v7637_v16 = vld [vmem:[%s9872_s6 + $0xd4] ss:$8 sps:$4 sm:$0xff]  }
  0xe7   : > { %v546_v24 = vpop.f32.mrb[2].mxu1  ;;  %v7643_v20 = vld [vmem:[%s9872_s6 + $0xf4] ss:$8 sps:$4 sm:$0xff]  }
  0xe8   : > { %v549_v25 = vmax.f32 %v544_v22, 0.0  ;;  %v6757_v26 = vpop.f32.mrb[3].mxu1  ;;  %v828_v22 = vld [vmem:[%s8173_s18] sm:$0xff]  ;;  %v834_v23 = vld [vmem:[%s8173_s18 + $0x30] sm:$0xff] }
  0xe9   : > { %v7646_v24 = vld [vmem:[%s9872_s6 + $0x104] ss:$8 sps:$4 sm:$0xff]   ;;  %v847_v26 = vld [vmem:[%s8173_s18 + $0x98] sm:$0xff] }
  0xea   : > { %v550_v27 = vpack.c.bf16 %v549_v25, %v549_v25  ;;  %v841_v25 = vld [vmem:[%s8173_s18 + $0x68] sm:$0xff] }
  0xec   : > { %6767 = vmatmul.mubr.msk.bf16.vlgmr.msra.gmra.mrb[4].mxu1 %vm591_vm4, %v550_v27  ;;  %v858_v27 = vpack.c.bf16 %v834_v23, %v828_v22  ;;  %v7697_v22 = vld [vmem:[%s9872_s6 + $0x214] ss:$8 sps:$4 sm:$0xff]   ;;  %v7695_v23 = vld [vmem:[%s9872_s6 + $0x210] ss:$8 sps:$4 sm:$0xff]  }
  0xed   : > { %6786 = vmatprep.mubr.msk.bf16.mxu1 %vm7996_vm2, %v7994_v1  ;;  %6783 = vmatpush3.bf16.msra.mxu1 %v7594_v29  ;;  %v865_v29 = vpack.c.bf16 %v847_v26, %v841_v25  ;;  %v848_v25 = vld [vmem:[%s8173_s18 + $0xa0] sm:$0xff] }
  0xee   : > { %6784 = vmatprep.subr.bf16.mxu1 %v7994_v1  ;;  %v7700_v26 = vld [vmem:[%s9872_s6 + $0x224] ss:$8 sps:$4 sm:$0xff]  }
  0xf1   : > { %6785 = vmatpush3.bf16.msra.mxu1 %v7595_v38 }
  0xf2   : > { %1464 = vmatprep.subr.bf16.mxu1 %v7598_v39  ;;  %v7655_v39 = vld [vmem:[%s9872_s6 + $0x134] ss:$8 sps:$4 sm:$0xff]  }
 0x1bf   : > { %v629_v31 = vpop.f32.mrb[4].mxu1 }
 0x1c0   : > { %v630_v32 = vadd.f32 %v629_v31, %v589_v30  ;;  %v6768_v33 = vpop.f32.mrb[5].mxu1  ;;  %v7649_v30 = vld [vmem:[%s9872_s6 + $0x114] ss:$8 sps:$4 sm:$0xff]   ;;  %v7647_v31 = vld [vmem:[%s9872_s6 + $0x110] ss:$8 sps:$4 sm:$0xff]  }
 0x1c1   : > { %v632_v34 = vpop.f32.mrb[6].mxu1  ;;  %v846_v33 = vld [vmem:[%s8173_s18 + $0x90] sm:$0xff] }
 0x1c2   : > { %v635_v35 = vmax.f32 %v630_v32, 0.0  ;;  %v6769_v36 = vpop.f32.mrb[7].mxu1  ;;  %v840_v32 = vld [vmem:[%s8173_s18 + $0x60] sm:$0xff] }
 0x1c3   : > { %v7652_v34 = vld [vmem:[%s9872_s6 + $0x124] ss:$8 sps:$4 sm:$0xff]   ;;  %v864_v36 = vpack.c.bf16 %v846_v33, %v840_v32  ;;  %v7701_v32 = vld [vmem:[%s9872_s6 + $0x230] ss:$8 sps:$4 sm:$0xff]  }
 0x1c4   : > { %v636_v37 = vpack.c.bf16 %v635_v35, %v635_v35  ;;  %v853_v35 = vld [vmem:[%s8173_s18 + $0xc8] sm:$0x3]  ;;  %v854_v33 = vld [vmem:[%s8173_s18 + $0xd0] sm:$0x3] }
 0x1c5   : > { %v871_v38 = vpack.c.bf16 %v853_v35, %v853_v35  ;;  %v833_v35 = vld [vmem:[%s8173_s18 + $0x28] sm:$0xff] }
 0x1c6   : > { %6779 = vmatmul.mubr.msk.bf16.vlgmr.msra.gmra.mrb[0].mxu0 %vm591_vm4, %v636_v37  ;;  %v7650_v37 = vld [vmem:[%s9872_s6 + $0x120] ss:$8 sps:$4 sm:$0xff]  }
 0x1c7   : > { %6794 = vmatprep.mubr.msk.bf16.mxu0 %vm7996_vm2, %v7994_v1 }
 0x299   : > { %v687_v42 = vpop.f32.mrb[0].mxu0 }
 0x29a   : > { %v688_v43 = vadd.f32 %v687_v42, %v637_v40  ;;  %v6780_v44 = vpop.f32.mrb[1].mxu0  ;;  %v7653_v40 = vld [vmem:[%s9872_s6 + $0x130] ss:$8 sps:$4 sm:$0xff]   ;;  %v852_v42 = vld [vmem:[%s8173_s18 + $0xc0] sm:$0x3] }
 0x29b   : > { %v690_v47 = vpop.f32.mrb[2].mxu0  ;;  %v831_v44 = vld [vmem:[%s8173_s18 + $0x18] sm:$0xff]  ;;  %v870_v46 = vpack.c.bf16 %v852_v42, %v852_v42 }
 0x29c   : > { %v693_v48 = vmax.f32 %v688_v43, 0.0  ;;  %v6781_v49 = vpop.f32.mrb[3].mxu0  ;;  %v7658_v43 = vld [vmem:[%s9872_s6 + $0x144] ss:$8 sps:$4 sm:$0xff]   ;;  %v7656_v47 = vld [vmem:[%s9872_s6 + $0x140] ss:$8 sps:$4 sm:$0xff]  }
 0x29d   : > { %v7661_v49 = vld [vmem:[%s9872_s6 + $0x154] ss:$8 sps:$4 sm:$0xff]   ;;  %v7707_v42 = vld [vmem:[%s9872_s6 + $0x250] ss:$8 sps:$4 sm:$0xff]  }
 0x29e   : > { %v694_v52 = vpack.c.bf16 %v693_v48, %v693_v48  ;;  %v861_v48 = vpack.c.bf16 %v837_v45, %v831_v44  ;;  %v7710_v44 = vld [vmem:[%s9872_s6 + $0x260] ss:$8 sps:$4 sm:$0xff]   ;;  %v7715_v45 = vld [vmem:[%s9872_s6 + $0x274] ss:$8 sps:$4 sm:$0xff]  }
 0x2a0   : > { %6787 = vmatmul.mubr.msk.bf16.vlgmr.msra.gmra.mrb[8].mxu1 %vm719_vm5, %v694_v52  ;;  %v7664_v52 = vld [vmem:[%s9872_s6 + $0x164] ss:$8 sps:$4 sm:$0xff]  }
 0x2a1   : > { %1465 = vmatpush1.bf16.msra.mxu1 %v7596_v50  ;;  %1496 = vmatprep.mubr.bf16.mxu1 %v859_v51  ;;  %v765_v50 = vpop.permute.xlu1 %764  ;;  %v7659_v51 = vld [vmem:[%s9872_s6 + $0x150] ss:$8 sps:$4 sm:$0xff]  }
 0x2a2   : > { %1466 = vmatprep.subr.bf16.mxu1 %v7601_v53  ;;  %6791 = vmatpush3.bf16.msra.mxu0 %v765_v50  ;;  %v7662_v53 = vld [vmem:[%s9872_s6 + $0x160] ss:$8 sps:$4 sm:$0xff]   ;;  %v7719_v50 = vld [vmem:[%s9872_s6 + $0x290] ss:$8 sps:$4 sm:$0xff]  }
 0x2a3   : > { %6792 = vmatprep.subr.bf16.mxu0 %v7994_v1 }
 0x2a5   : > { %1467 = vmatpush1.bf16.msra.mxu1 %v7599_v54  ;;  %v767_v54 = vpop.permute.xlu1 %766 }
 0x2a6   : > { %1468 = vmatprep.subr.bf16.mxu1 %v7604_v55  ;;  %v7667_v55 = vld [vmem:[%s9872_s6 + $0x174] ss:$8 sps:$4 sm:$0xff]   ;;  %6793 = vmatpush3.bf16.msra.mxu0 %v767_v54  ;;  %v7725_v54 = vld [vmem:[%s9872_s6 + $0x2b0] ss:$8 sps:$4 sm:$0xff]  }
 0x2a7   : > { %6798 = vmatprep.subr.bf16.mxu0 %v7994_v1 }
 0x2a9   : > { %1469 = vmatpush1.bf16.msra.mxu1 %v7602_v56  ;;  %v8331_v56 = vld [vmem:[%s9873_s7] sm:$0xff]  }
 0x2aa   : > { %1470 = vmatprep.subr.bf16.mxu1 %v7607_v57  ;;  %v7665_v57 = vld [vmem:[%s9872_s6 + $0x170] ss:$8 sps:$4 sm:$0xff]   ;;  %1781 = vrot.lane.b32.xlu0 %v8331_v56, %s7997_s16 }
 0x2ad   : > { %1471 = vmatpush1.bf16.msra.mxu1 %v7605_v58  ;;  %v7670_v58 = vld [vmem:[%s9872_s6 + $0x184] ss:$8 sps:$4 sm:$0xff]  }
 0x2ae   : > { %1472 = vmatprep.subr.bf16.mxu1 %v7610_v59  ;;  %v8342_v59 = vld [vmem:[%s9873_s7 + $0x8] sm:$0xff]  }
 0x2af   : > { %1783 = vrot.lane.b32.xlu1 %v8342_v59, %s7997_s16 }
 0x2b1   : > { %1473 = vmatpush1.bf16.msra.mxu1 %v7608_v60  ;;  %v7668_v60 = vld [vmem:[%s9872_s6 + $0x180] ss:$8 sps:$4 sm:$0xff]  }
 0x2b2   : > { %1474 = vmatprep.subr.bf16.mxu1 %v7613_v61  ;;  %v7673_v61 = vld [vmem:[%s9872_s6 + $0x194] ss:$8 sps:$4 sm:$0xff]  }
 0x2b5   : > { %1475 = vmatpush1.bf16.msra.mxu1 %v7611_v62  ;;  %v7671_v62 = vld [vmem:[%s9872_s6 + $0x190] ss:$8 sps:$4 sm:$0xff]  }
 0x2b6   : > { %1476 = vmatprep.subr.bf16.mxu1 %v7616_v63  ;;  %v7676_v63 = vld [vmem:[%s9872_s6 + $0x1a4] ss:$8 sps:$4 sm:$0xff]  }
 0x2b9   : > { %1477 = vmatpush1.bf16.msra.mxu1 %v7614_v0  ;;  %v7674_v0 = vld [vmem:[%s9872_s6 + $0x1a0] ss:$8 sps:$4 sm:$0xff]  }
 0x2ba   : > { %1478 = vmatprep.subr.bf16.mxu1 %v7619_v2  ;;  %v7679_v2 = vld [vmem:[%s9872_s6 + $0x1b4] ss:$8 sps:$4 sm:$0xff]  }
 0x2bd   : > { %1479 = vmatpush1.bf16.msra.mxu1 %v7617_v3  ;;  %v7677_v3 = vld [vmem:[%s9872_s6 + $0x1b0] ss:$8 sps:$4 sm:$0xff]  }
 0x2be   : > { %1480 = vmatprep.subr.bf16.mxu1 %v7622_v4  ;;  %v7682_v4 = vld [vmem:[%s9872_s6 + $0x1c4] ss:$8 sps:$4 sm:$0xff]  }
 0x2c1   : > { %1481 = vmatpush1.bf16.msra.mxu1 %v7620_v5  ;;  %v7680_v5 = vld [vmem:[%s9872_s6 + $0x1c0] ss:$8 sps:$4 sm:$0xff]  }
 0x2c2   : > { %1482 = vmatprep.subr.bf16.mxu1 %v7625_v6  ;;  %v7685_v6 = vld [vmem:[%s9872_s6 + $0x1d4] ss:$8 sps:$4 sm:$0xff]  }
 0x2c5   : > { %1483 = vmatpush1.bf16.msra.mxu1 %v7623_v7  ;;  %v7683_v7 = vld [vmem:[%s9872_s6 + $0x1d0] ss:$8 sps:$4 sm:$0xff]  }
 0x2c6   : > { %1484 = vmatprep.subr.bf16.mxu1 %v7628_v8  ;;  %v7688_v8 = vld [vmem:[%s9872_s6 + $0x1e4] ss:$8 sps:$4 sm:$0xff]  }
 0x2c9   : > { %1485 = vmatpush1.bf16.msra.mxu1 %v7626_v9  ;;  %v7686_v9 = vld [vmem:[%s9872_s6 + $0x1e0] ss:$8 sps:$4 sm:$0xff]  }
 0x2ca   : > { %1486 = vmatprep.subr.bf16.mxu1 %v7631_v10  ;;  %v7691_v10 = vld [vmem:[%s9872_s6 + $0x1f4] ss:$8 sps:$4 sm:$0xff]  }
 0x2cd   : > { %1487 = vmatpush1.bf16.msra.mxu1 %v7629_v11  ;;  %v7689_v11 = vld [vmem:[%s9872_s6 + $0x1f0] ss:$8 sps:$4 sm:$0xff]  }
 0x2ce   : > { %1488 = vmatprep.subr.bf16.mxu1 %v7634_v12  ;;  %v830_v12 = vld [vmem:[%s8173_s18 + $0x10] sm:$0xff] }
 0x2d1   : > { %1489 = vmatpush1.bf16.msra.mxu1 %v7632_v13  ;;  %v836_v13 = vld [vmem:[%s8173_s18 + $0x40] sm:$0xff] }
 0x2d2   : > { %1490 = vmatprep.subr.bf16.mxu1 %v7637_v16  ;;  %v7694_v16 = vld [vmem:[%s9872_s6 + $0x204] ss:$8 sps:$4 sm:$0xff]  }
 0x2d5   : > { %1491 = vmatpush1.bf16.msra.mxu1 %v7635_v17  ;;  %v843_v17 = vld [vmem:[%s8173_s18 + $0x78] sm:$0xff] }
 0x2d6   : > { %1492 = vmatprep.subr.bf16.mxu1 %v7640_v18  ;;  %v849_v18 = vld [vmem:[%s8173_s18 + $0xa8] sm:$0xff] }
 0x2d9   : > { %1493 = vmatpush1.bf16.msra.mxu1 %v7638_v19  ;;  %v860_v19 = vpack.c.bf16 %v836_v13, %v830_v12  ;;  %v856_v13 = vld [vmem:[%s8173_s18 + $0xe0] sm:$0x3] }
 0x2da   : > { %1494 = vmatprep.subr.bf16.mxu1 %v7643_v20  ;;  %v7692_v20 = vld [vmem:[%s9872_s6 + $0x200] ss:$8 sps:$4 sm:$0xff]  }
 0x2dd   : > { %1495 = vmatpush1.bf16.msra.mxu1 %v7641_v21  ;;  %v867_v21 = vpack.c.bf16 %v849_v18, %v843_v17  ;;  %v717_v17 = vpop.permute.xlu0 %716 }
 0x2de   : > { %1525 = vmatprep.subr.bf16.mxu1 %v7646_v24  ;;  %v842_v24 = vld [vmem:[%s8173_s18 + $0x70] sm:$0xff] }
 0x2e0   : > { %1497 = vmatmul.mubr.bf16.vlgmr.msra.gmra.mrb[12].mxu1 %v858_v27  ;;  %v855_v27 = vld [vmem:[%s8173_s18 + $0xd8] sm:$0x3] }
 0x2e1   : > { %1526 = vmatpush1.bf16.msra.mxu1 %v7644_v28  ;;  %1506 = vmatprep.mubr.bf16.mxu1 %v865_v29  ;;  %v866_v28 = vpack.c.bf16 %v848_v25, %v842_v24  ;;  %v7698_v29 = vld [vmem:[%s9872_s6 + $0x220] ss:$8 sps:$4 sm:$0xff]   ;;  %v7742_v24 = vld [vmem:[%s9873_s7 + $0x10] sm:$0xff]   ;;  %v7743_v25 = vld [vmem:[%s9873_s7 + $0x18] sm:$0xff]  }
 0x2e2   : > { %1527 = vmatprep.subr.bf16.mxu1 %v7649_v30  ;;  %v873_v30 = vpack.c.bf16 %v855_v27, %v855_v27  ;;  %1785 = vrot.lane.b32.xlu0 %v7742_v24, %s7997_s16 }
 0x2e5   : > { %1528 = vmatpush1.bf16.msra.mxu1 %v7647_v31  ;;  %v7703_v31 = vld [vmem:[%s9872_s6 + $0x234] ss:$8 sps:$4 sm:$0xff]  }
 0x2e6   : > { %1529 = vmatprep.subr.bf16.mxu1 %v7652_v34  ;;  %v7706_v34 = vld [vmem:[%s9872_s6 + $0x244] ss:$8 sps:$4 sm:$0xff]   ;;  %1787 = vrot.lane.b32.xlu0 %v7743_v25, %s7997_s16 }
 0x2e8   : > { %1507 = vmatmul.mubr.bf16.gmra.mrb[16].mxu1 %v864_v36  ;;  %v839_v36 = vld [vmem:[%s8173_s18 + $0x58] sm:$0xff] }
 0x2e9   : > { %1530 = vmatpush1.bf16.msra.mxu1 %v7650_v37  ;;  %1516 = vmatprep.mubr.bf16.mxu1 %v871_v38  ;;  %v872_v37 = vpack.c.bf16 %v854_v33, %v854_v33  ;;  %v7704_v38 = vld [vmem:[%s9872_s6 + $0x240] ss:$8 sps:$4 sm:$0xff]  }
 0x2ea   : > { %1531 = vmatprep.subr.bf16.mxu1 %v7655_v39  ;;  %v863_v39 = vpack.c.bf16 %v839_v36, %v833_v35 }
 0x2ed   : > { %1532 = vmatpush1.bf16.msra.mxu1 %v7653_v40  ;;  %v7709_v40 = vld [vmem:[%s9872_s6 + $0x254] ss:$8 sps:$4 sm:$0xff]  }
 0x2ee   : > { %1533 = vmatprep.subr.bf16.mxu1 %v7658_v43  ;;  %v7712_v43 = vld [vmem:[%s9872_s6 + $0x264] ss:$8 sps:$4 sm:$0xff]  }
 0x2f0   : > { %1517 = vmatmul.mubr.bf16.gmra.mrb[20].mxu1 %v870_v46  ;;  %v7713_v46 = vld [vmem:[%s9872_s6 + $0x270] ss:$8 sps:$4 sm:$0xff]  }
 0x2f1   : > { %1534 = vmatpush1.bf16.msra.mxu1 %v7656_v47  ;;  %1557 = vmatprep.mubr.bf16.mxu1 %v861_v48  ;;  %v7718_v47 = vld [vmem:[%s9872_s6 + $0x284] ss:$8 sps:$4 sm:$0xff]   ;;  %v7716_v48 = vld [vmem:[%s9872_s6 + $0x280] ss:$8 sps:$4 sm:$0xff]  }
 0x2f2   : > { %1535 = vmatprep.subr.bf16.mxu1 %v7661_v49  ;;  %v7721_v49 = vld [vmem:[%s9872_s6 + $0x294] ss:$8 sps:$4 sm:$0xff]  }
 0x2f5   : > { %1536 = vmatpush1.bf16.msra.mxu1 %v7659_v51  ;;  %v7724_v51 = vld [vmem:[%s9872_s6 + $0x2a4] ss:$8 sps:$4 sm:$0xff]  }
 0x2f6   : > { %1537 = vmatprep.subr.bf16.mxu1 %v7664_v52  ;;  %v7722_v52 = vld [vmem:[%s9872_s6 + $0x2a0] ss:$8 sps:$4 sm:$0xff]  }
 0x2f9   : > { %1538 = vmatpush1.bf16.msra.mxu1 %v7662_v53  ;;  %v7727_v53 = vld [vmem:[%s9872_s6 + $0x2b4] ss:$8 sps:$4 sm:$0xff]  }
 0x2fa   : > { %1539 = vmatprep.subr.bf16.mxu1 %v7667_v55  ;;  %v7730_v55 = vld [vmem:[%s9872_s6 + $0x2c4] ss:$8 sps:$4 sm:$0xff]  }
 0x2fd   : > { %1540 = vmatpush1.bf16.msra.mxu1 %v7665_v57  ;;  %v7728_v57 = vld [vmem:[%s9872_s6 + $0x2c0] ss:$8 sps:$4 sm:$0xff]  }
 0x2fe   : > { %1541 = vmatprep.subr.bf16.mxu1 %v7670_v58  ;;  %v7733_v58 = vld [vmem:[%s9872_s6 + $0x2d4] ss:$8 sps:$4 sm:$0xff]  }
 0x301   : > { %1542 = vmatpush1.bf16.msra.mxu1 %v7668_v60  ;;  %v7731_v60 = vld [vmem:[%s9872_s6 + $0x2d0] ss:$8 sps:$4 sm:$0xff]  }
 0x302   : > { %1543 = vmatprep.subr.bf16.mxu1 %v7673_v61  ;;  %v7736_v61 = vld [vmem:[%s9872_s6 + $0x2e4] ss:$8 sps:$4 sm:$0xff]  }
 0x305   : > { %1544 = vmatpush1.bf16.msra.mxu1 %v7671_v62  ;;  %v7734_v62 = vld [vmem:[%s9872_s6 + $0x2e0] ss:$8 sps:$4 sm:$0xff]  }
 0x306   : > { %1545 = vmatprep.subr.bf16.mxu1 %v7676_v63  ;;  %v7739_v63 = vld [vmem:[%s9872_s6 + $0x2f4] ss:$8 sps:$4 sm:$0xff]  }
 0x309   : > { %1546 = vmatpush1.bf16.msra.mxu1 %v7674_v0  ;;  %v7737_v0 = vld [vmem:[%s9872_s6 + $0x2f0] ss:$8 sps:$4 sm:$0xff]  }
 0x30a   : > { %1547 = vmatprep.subr.bf16.mxu1 %v7679_v2  ;;  %v832_v2 = vld [vmem:[%s8173_s18 + $0x20] sm:$0xff] }
 0x30d   : > { %1548 = vmatpush1.bf16.msra.mxu1 %v7677_v3  ;;  %v838_v3 = vld [vmem:[%s8173_s18 + $0x50] sm:$0xff] }
 0x30e   : > { %1549 = vmatprep.subr.bf16.mxu1 %v7682_v4  ;;  %v845_v4 = vld [vmem:[%s8173_s18 + $0x88] sm:$0xff] }
 0x311   : > { %1550 = vmatpush1.bf16.msra.mxu1 %v7680_v5  ;;  %v851_v5 = vld [vmem:[%s8173_s18 + $0xb8] sm:$0xff] }
 0x312   : > { %1551 = vmatprep.subr.bf16.mxu1 %v7685_v6  ;;  %v862_v6 = vpack.c.bf16 %v838_v3, %v832_v2 }
 0x315   : > { %1552 = vmatpush1.bf16.msra.mxu1 %v7683_v7  ;;  %v869_v7 = vpack.c.bf16 %v851_v5, %v845_v4 }
 0x316   : > { %1553 = vmatprep.subr.bf16.mxu1 %v7688_v8  ;;  %v844_v8 = vld [vmem:[%s8173_s18 + $0x80] sm:$0xff] }
 0x319   : > { %1554 = vmatpush1.bf16.msra.mxu1 %v7686_v9  ;;  %v850_v9 = vld [vmem:[%s8173_s18 + $0xb0] sm:$0xff] }
 0x31a   : > { %1555 = vmatprep.subr.bf16.mxu1 %v7691_v10  ;;  %v857_v10 = vld [vmem:[%s8173_s18 + $0xe8] sm:$0x3] }
 0x31b   : > { %v875_v12 = vpack.c.bf16 %v857_v10, %v857_v10 }
 0x31d   : > { %1556 = vmatpush1.bf16.msra.mxu1 %v7689_v11  ;;  %v868_v11 = vpack.c.bf16 %v850_v9, %v844_v8 }
 0x31e   : > { %1586 = vmatprep.subr.bf16.mxu1 %v7694_v16  ;;  %v874_v16 = vpack.c.bf16 %v856_v13, %v856_v13  ;;  %v7745_v13 = vld [vmem:[%s9873_s7 + $0x28] sm:$0xff]  }
 0x320   : > { %1558 = vmatmul.mubr.bf16.vlgmr.msra.gmra.mrb[12].mxu1 %v860_v19 }
 0x321   : > { %1587 = vmatpush1.bf16.msra.mxu1 %v7692_v20  ;;  %1567 = vmatprep.mubr.bf16.mxu1 %v867_v21 }
 0x322   : > { %1588 = vmatprep.subr.bf16.mxu1 %v7697_v22 }
 0x325   : > { %1589 = vmatpush1.bf16.msra.mxu1 %v7695_v23 }
 0x326   : > { %1590 = vmatprep.subr.bf16.mxu1 %v7700_v26  ;;  %v980_v26 = vsub.s32 1, %v8125_v14  ;;  %v7768_v14 = vld [vmem:[%s9877_s11 + $0x20] sm:$0xff]  }
 0x328   : > { %1568 = vmatmul.mubr.bf16.gmra.mrb[16].mxu1 %v866_v28 }
 0x329   : > { %1591 = vmatpush1.bf16.msra.mxu1 %v7698_v29  ;;  %1577 = vmatprep.mubr.bf16.mxu1 %v873_v30 }
 0x32a   : > { %1592 = vmatprep.subr.bf16.mxu1 %v7703_v31 }
 0x32d   : > { %1593 = vmatpush1.bf16.msra.mxu1 %v7701_v32 }
 0x32e   : > { %1594 = vmatprep.subr.bf16.mxu1 %v7706_v34 }
 0x330   : > { %1578 = vmatmul.mubr.bf16.gmra.mrb[20].mxu1 %v872_v37 }
 0x331   : > { %1595 = vmatpush1.bf16.msra.mxu1 %v7704_v38  ;;  %1618 = vmatprep.mubr.bf16.mxu1 %v863_v39 }
 0x332   : > { %1596 = vmatprep.subr.bf16.mxu1 %v7709_v40 }
 0x335   : > { %1597 = vmatpush1.bf16.msra.mxu1 %v7707_v42 }
 0x336   : > { %1598 = vmatprep.subr.bf16.mxu1 %v7712_v43 }
 0x339   : > { %1599 = vmatpush1.bf16.msra.mxu1 %v7710_v44 }
 0x33a   : > { %1600 = vmatprep.subr.bf16.mxu1 %v7715_v45 }
 0x33d   : > { %1601 = vmatpush1.bf16.msra.mxu1 %v7713_v46 }
 0x33e   : > { %1602 = vmatprep.subr.bf16.mxu1 %v7718_v47  ;;  %v1782_v47 = vpop.permute.xlu0 %1781 }
 0x341   : > { %1603 = vmatpush1.bf16.msra.mxu1 %v7716_v48 }
 0x342   : > { %1604 = vmatprep.subr.bf16.mxu1 %v7721_v49 }
 0x345   : > { %1605 = vmatpush1.bf16.msra.mxu1 %v7719_v50 }
 0x346   : > { %1606 = vmatprep.subr.bf16.mxu1 %v7724_v51 }
 0x349   : > { %1607 = vmatpush1.bf16.msra.mxu1 %v7722_v52 }
 0x34a   : > { %1608 = vmatprep.subr.bf16.mxu1 %v7727_v53 }
 0x34d   : > { %1609 = vmatpush1.bf16.msra.mxu1 %v7725_v54 }
 0x34e   : > { %1610 = vmatprep.subr.bf16.mxu1 %v7730_v55  ;;  %v1784_v55 = vpop.permute.xlu1 %1783 }
 0x351   : > { %1611 = vmatpush1.bf16.msra.mxu1 %v7728_v57 }
 0x352   : > { %1612 = vmatprep.subr.bf16.mxu1 %v7733_v58 }
 0x355   : > { %1613 = vmatpush1.bf16.msra.mxu1 %v7731_v60 }
 0x356   : > { %1614 = vmatprep.subr.bf16.mxu1 %v7736_v61  ;;  %v1786_v61 = vpop.permute.xlu0 %1785 }
 0x359   : > { %1615 = vmatpush1.bf16.msra.mxu1 %v7734_v62 }
 0x35a   : > { %1616 = vmatprep.subr.bf16.mxu1 %v7739_v63 }
 0x35d   : > { %1617 = vmatpush1.bf16.msra.mxu1 %v7737_v0 }
 0x35e   : > { %6966 = vmatprep.subr.bf16.mxu1 %v7994_v1 }
 0x360   : > { %1619 = vmatmul.mubr.bf16.vlgmr.msra.gmra.mrb[12].mxu1 %v862_v6 }
 0x361   : > { %1628 = vmatprep.mubr.bf16.mxu1 %v869_v7  ;;  %v1788_v7 = vpop.permute.xlu0 %1787 }
 0x368   : > { %1629 = vmatmul.mubr.bf16.gmra.mrb[16].mxu1 %v868_v11 }
 0x369   : > { %1638 = vmatprep.mubr.bf16.mxu1 %v875_v12  ;;  %v7744_v12 = vld [vmem:[%s9873_s7 + $0x20] sm:$0xff]  }
 0x370   : > { %1639 = vmatmul.mubr.bf16.gmra.mrb[20].mxu1 %v874_v16  ;;  %v7746_v16 = vld [vmem:[%s9873_s7 + $0x30] sm:$0xff]  }
 0x371   : > { %6972 = vmatprep.mubr.msk.bf16.mxu1 %vm7996_vm2, %v7994_v1 }
 0x373   : > { %v757_v18 = vpop.f32.mrb[8].mxu1 }
 0x374   : > { %v758_v19 = vadd.f32 %v757_v18, %v717_v17  ;;  %v6788_v20 = vpop.f32.mrb[9].mxu1  ;;  %v7747_v17 = vld [vmem:[%s9873_s7 + $0x38] sm:$0xff]  }
 0x375   : > { %v760_v21 = vpop.f32.mrb[10].mxu1 }
 0x376   : > { %v763_v22 = vpack.c.bf16 %v758_v19, %v758_v19  ;;  %v6789_v23 = vpop.f32.mrb[11].mxu1 }
 0x378   : > { %6795 = vmatmul.mubr.msk.bf16.vlgmr.msra.gmra.mrb[4].mxu0 %vm719_vm5, %v763_v22 }
 0x379   : > { %6799 = vmatpush3.bf16.msra.mxu0 %v8331_v56  ;;  %6806 = vmatprep.mubr.msk.bf16.mxu0 %vm7996_vm2, %v7994_v1  ;;  %v6252_v56 = vld [vmem:[%s9875_s9 + $0x1] ss:$0 sm:$0xff] }
 0x37a   : > { %6800 = vmatprep.subr.bf16.mxu0 %v7994_v1  ;;  %1699 = vrot.lane.b32.xlu1 %v6252_v56, %s7997_s16 }
 0x37d   : > { %6801 = vmatpush3.bf16.msra.mxu0 %v8342_v59  ;;  %v972_v59 = vld [vmem:[%s9875_s9] sm:$0x3] }
 0x37e   : > { %6802 = vmatprep.subr.bf16.mxu0 %v7994_v1  ;;  %v977_v27 = vrot.slane %v972_v59, %v8130_v15  ;;  %v8538_v28 = vrot.slane %v972_v59, %v980_v26 }
 0x381   : > { %6803 = vmatpush3.bf16.msra.mxu0 %v7742_v24 }
 0x382   : > { %6804 = vmatprep.subr.bf16.mxu0 %v7994_v1 }
 0x385   : > { %6805 = vmatpush3.bf16.msra.mxu0 %v7743_v25 }
 0x386   : > { %6818 = vmatprep.subr.bf16.mxu0 %v7994_v1 }
 0x3ec   : > { %v1700_v18 = vpop.permute.xlu1 %1699 }
 0x433   : > { %v1620_v29 = vpop.f32.mrb[12].mxu1 }
 0x434   : > { %v7534_v30 = vadd.f32 %v1620_v29, %v977_v27  ;;  %v1622_v31 = vpop.f32.mrb[13].mxu1 }
 0x435   : > { %v7535_v32 = vadd.f32 %v1622_v31, %v8538_v28  ;;  %v1624_v33 = vpop.f32.mrb[14].mxu1 }
 0x436   : > { %v7536_v34 = vadd.f32 %v1624_v33, %v977_v27  ;;  %v1626_v35 = vpop.f32.mrb[15].mxu1  ;;  %v1647_v37 = vmax.f32 %v7534_v30, 0.0 }
 0x437   : > { %v7537_v36 = vadd.f32 %v1626_v35, %v8538_v28  ;;  %v1648_v39 = vmax.f32 %v7535_v32, 0.0 }
 0x438   : > { %v1649_v38 = vmax.f32 %v7536_v34, 0.0 }
 0x439   : > { %v1650_v40 = vmax.f32 %v7537_v36, 0.0 }
 0x43a   : > { %v1657_v42 = vpack.c.bf16 %v1649_v38, %v1647_v37 }
 0x43b   : > { %v8542_v43 = vpack.c.bf16 %v1650_v40, %v1648_v39  ;;  %v1630_v44 = vpop.f32.mrb[16].mxu1 }
 0x43c   : > { %v7538_v45 = vadd.f32 %v1630_v44, %v977_v27  ;;  %v1632_v46 = vpop.f32.mrb[17].mxu1  ;;  %1877 = vrot.lane.b32.xlu1 %v1657_v42, %s7997_s16  ;;  %6807 = vmatmul.mubr.msk.bf16.vlgmr.msra.gmra.mrb[8].mxu0 %vm591_vm4, %v1657_v42 }
 0x43d   : > { %v7539_v48 = vadd.f32 %v1632_v46, %v8538_v28  ;;  %v1634_v49 = vpop.f32.mrb[18].mxu1  ;;  %6810 = vmatprep.mubr.msk.bf16.mxu0 %vm7996_vm2, %v7994_v1  ;;  %6819 = vmatpush3.bf16.msra.mxu0 %v1782_v47 }
 0x43e   : > { %v7540_v50 = vadd.f32 %v1634_v49, %v977_v27  ;;  %v1636_v51 = vpop.f32.mrb[19].mxu1  ;;  %6820 = vmatprep.subr.bf16.mxu0 %v7994_v1  ;;  %v1651_v53 = vmax.f32 %v7538_v45, 0.0 }
 0x43f   : > { %v7541_v52 = vadd.f32 %v1636_v51, %v8538_v28  ;;  %v1652_v57 = vmax.f32 %v7539_v48, 0.0 }
 0x440   : > { %v1653_v54 = vmax.f32 %v7540_v50, 0.0 }
 0x441   : > { %v1654_v58 = vmax.f32 %v7541_v52, 0.0  ;;  %6821 = vmatpush3.bf16.msra.mxu0 %v1784_v55  ;;  %v7750_v55 = vld [vmem:[%s9873_s7 + $0x50] sm:$0xff]  }
 0x442   : > { %v1658_v60 = vpack.c.bf16 %v1653_v54, %v1651_v53  ;;  %6822 = vmatprep.subr.bf16.mxu0 %v7994_v1  ;;  %v7748_v53 = vld [vmem:[%s9873_s7 + $0x40] sm:$0xff]   ;;  %v7749_v54 = vld [vmem:[%s9873_s7 + $0x48] sm:$0xff]  }
 0x443   : > { %v8552_v62 = vpack.c.bf16 %v1654_v58, %v1652_v57  ;;  %v1640_v63 = vpop.f32.mrb[20].mxu1  ;;  %v6272_v57 = vld [vmem:[%s9875_s9 + $0x2] ss:$0 sm:$0xff]  ;;  %v7751_v58 = vld [vmem:[%s9873_s7 + $0x58] sm:$0xff]  }
 0x444   : > { %v7542_v0 = vadd.f32 %v1640_v63, %v977_v27  ;;  %v8554_v2 = vpop.f32.mrb[21].mxu1  ;;  %1879 = vrot.lane.b32.xlu0 %v1658_v60, %s7997_s16  ;;  %6811 = vmatmul.mubr.msk.bf16.gmra.mrb[12].mxu0 %vm591_vm4, %v1658_v60  ;;  %v8632_v60 = vld [vmem:[%s9875_s9 + $0x3] ss:$0 sm:$0xff] }
 0x445   : > { %v1644_v3 = vpop.f32.mrb[22].mxu1  ;;  %6814 = vmatprep.mubr.msk.bf16.mxu0 %vm7996_vm2, %v7994_v1  ;;  %6823 = vmatpush3.bf16.msra.mxu0 %v1786_v61 }
 0x446   : > { %v1655_v4 = vmax.f32 %v7542_v0, 0.0  ;;  %v1645_v5 = vpop.f32.mrb[23].mxu1  ;;  %6824 = vmatprep.subr.bf16.mxu0 %v7994_v1 }
 0x448   : > { %v1659_v6 = vpack.c.bf16 %v1655_v4, %v1655_v4  ;;  %1980 = vrot.lane.b32.xlu0 %v7744_v12, %s7997_s16 }
 0x449   : > { %6825 = vmatpush3.bf16.msra.mxu0 %v1788_v7 }
 0x44a   : > { %1881 = vrot.lane.b32.xlu1 %v1659_v6, %s7997_s16  ;;  %6838 = vmatprep.subr.bf16.mxu0 %v7994_v1 }
 0x44b   : > { %v8563_v8 = vpop.f32.mrb[4].mxu0 }
 0x44c   : > { %6815 = vmatmul.mubr.msk.bf16.gmra.mrb[16].mxu0 %vm591_vm4, %v1659_v6  ;;  %v6796_v9 = vpop.f32.mrb[5].mxu0  ;;  %1984 = vrot.lane.b32.xlu0 %v7746_v16, %s7997_s16 }
 0x44d   : > { %v813_v10 = vpop.f32.mrb[6].mxu0  ;;  %6826 = vmatprep.mubr.msk.bf16.mxu0 %vm7996_vm2, %v7994_v1 }
 0x44e   : > { %v6797_v11 = vpop.f32.mrb[7].mxu0  ;;  %1982 = vrot.lane.b32.xlu1 %v7745_v13, %s7997_s16 }
 0x450   : > { %2172 = vrot.lane.b32.xlu0 %v7748_v53, %s7997_s16 }
 0x452   : > { %1986 = vrot.lane.b32.xlu1 %v7747_v17, %s7997_s16 }
 0x454   : > { %2176 = vrot.lane.b32.xlu0 %v7750_v55, %s7997_s16 }
 0x456   : > { %2174 = vrot.lane.b32.xlu1 %v7749_v54, %s7997_s16 }
 0x458   : > { %2178 = vrot.lane.b32.xlu0 %v7751_v58, %s7997_s16 }
 0x45a   : > { %2096 = vrot.lane.b32.xlu1 %v6272_v57, %s7997_s16 }
 0x45e   : > { %2184 = vrot.lane.b32.xlu1 %v8632_v60, %s7997_s16 }
 0x4ae   : > { %v1878_v46 = vpop.permute.xlu1 %1877 }
 0x4b6   : > { %v1880_v47 = vpop.permute.xlu0 %1879 }
 0x4ba   : > { %v1981_v49 = vpop.permute.xlu0 %1980 }
 0x4bc   : > { %v1882_v48 = vpop.permute.xlu1 %1881 }
 0x4be   : > { %v1985_v51 = vpop.permute.xlu0 %1984 }
 0x4c0   : > { %v1983_v50 = vpop.permute.xlu1 %1982 }
 0x4c4   : > { %v1987_v52 = vpop.permute.xlu1 %1986 }
 0x50f   : > { %v1745_v19 = vpop.f32.mrb[8].mxu0 }
 0x510   : > { %v1746_v20 = vadd.f32 %v1745_v19, %v1700_v18  ;;  %v6808_v21 = vpop.f32.mrb[9].mxu0 }
 0x511   : > { %v1748_v22 = vpop.f32.mrb[10].mxu0 }
 0x512   : > { %v1749_v23 = vadd.f32 %v1748_v22, %v1700_v18  ;;  %v6809_v24 = vpop.f32.mrb[11].mxu0  ;;  %v1767_v56 = vmax.f32 %v1746_v20, 0.0 }
 0x514   : > { %v1768_v25 = vmax.f32 %v1749_v23, 0.0 }
 0x516   : > { %v1772_v59 = vpack.c.bf16 %v1768_v25, %v1767_v56 }
 0x517   : > { %v1753_v27 = vpop.f32.mrb[12].mxu0 }
 0x518   : > { %v1754_v29 = vadd.f32 %v1753_v27, %v1700_v18  ;;  %v6812_v30 = vpop.f32.mrb[13].mxu0  ;;  %6827 = vmatmul.mubr.msk.bf16.vlgmr.msra.gmra.mrb[20].mxu0 %vm591_vm4, %v1772_v59 }
 0x519   : > { %v1756_v31 = vpop.f32.mrb[14].mxu0  ;;  %6830 = vmatprep.mubr.msk.bf16.mxu0 %vm7996_vm2, %v7994_v1  ;;  %6839 = vmatpush3.bf16.msra.mxu0 %v7744_v12 }
 0x51a   : > { %v1757_v32 = vadd.f32 %v1756_v31, %v1700_v18  ;;  %v6813_v33 = vpop.f32.mrb[15].mxu0  ;;  %6840 = vmatprep.subr.bf16.mxu0 %v7994_v1  ;;  %v1769_v34 = vmax.f32 %v1754_v29, 0.0 }
 0x51c   : > { %v1770_v35 = vmax.f32 %v1757_v32, 0.0 }
 0x51d   : > { %6841 = vmatpush3.bf16.msra.mxu0 %v7745_v13 }
 0x51e   : > { %v1773_v36 = vpack.c.bf16 %v1770_v35, %v1769_v34  ;;  %6842 = vmatprep.subr.bf16.mxu0 %v7994_v1 }
 0x51f   : > { %v1761_v37 = vpop.f32.mrb[16].mxu0 }
 0x520   : > { %v1762_v38 = vadd.f32 %v1761_v37, %v1700_v18  ;;  %v6816_v39 = vpop.f32.mrb[17].mxu0  ;;  %6831 = vmatmul.mubr.msk.bf16.gmra.mrb[24].mxu0 %vm591_vm4, %v1773_v36 }
 0x521   : > { %v1764_v40 = vpop.f32.mrb[18].mxu0  ;;  %6834 = vmatprep.mubr.msk.bf16.mxu0 %vm7996_vm2, %v7994_v1  ;;  %6843 = vmatpush3.bf16.msra.mxu0 %v7746_v16 }
 0x522   : > { %v1771_v42 = vmax.f32 %v1762_v38, 0.0  ;;  %v6817_v44 = vpop.f32.mrb[19].mxu0  ;;  %6844 = vmatprep.subr.bf16.mxu0 %v7994_v1 }
 0x524   : > { %v1774_v45 = vpack.c.bf16 %v1771_v42, %v1771_v42 }
 0x525   : > { %6845 = vmatpush3.bf16.msra.mxu0 %v7747_v17 }
 0x526   : > { %6858 = vmatprep.subr.bf16.mxu0 %v7994_v1 }
 0x528   : > { %6835 = vmatmul.mubr.msk.bf16.gmra.mrb[28].mxu0 %vm591_vm4, %v1774_v45 }
 0x529   : > { %6846 = vmatprep.mubr.msk.bf16.mxu0 %vm7996_vm2, %v7994_v1 }
 0x530   : > { %6847 = vmatmul.mubr.msk.bf16.vlgmr.msra.gmra.mrb[32].mxu0 %vm591_vm4, %v1878_v46 }
 0x531   : > { %6850 = vmatprep.mubr.msk.bf16.mxu0 %vm7996_vm2, %v7994_v1  ;;  %6859 = vmatpush3.bf16.msra.mxu0 %v1981_v49 }
 0x532   : > { %6860 = vmatprep.subr.bf16.mxu0 %v7994_v1 }
 0x535   : > { %6861 = vmatpush3.bf16.msra.mxu0 %v1983_v50 }
 0x536   : > { %6862 = vmatprep.subr.bf16.mxu0 %v7994_v1 }
 0x538   : > { %6851 = vmatmul.mubr.msk.bf16.gmra.mrb[36].mxu0 %vm591_vm4, %v1880_v47 }
 0x539   : > { %6854 = vmatprep.mubr.msk.bf16.mxu0 %vm7996_vm2, %v7994_v1  ;;  %6863 = vmatpush3.bf16.msra.mxu0 %v1985_v51 }
 0x53a   : > { %6864 = vmatprep.subr.bf16.mxu0 %v7994_v1 }
 0x53d   : > { %6865 = vmatpush3.bf16.msra.mxu0 %v1987_v52  ;;  %v7543_v52 = vadd.f32 %v8554_v2, %v8538_v28 }
 0x53e   : > { %6878 = vmatprep.subr.bf16.mxu0 %v7994_v1 }
 0x540   : > { %6855 = vmatmul.mubr.msk.bf16.gmra.mrb[40].mxu0 %vm591_vm4, %v1882_v48 }
 0x541   : > { %6866 = vmatprep.mubr.msk.bf16.mxu0 %vm7996_vm2, %v7994_v1 }
 0x5eb   : > { %v1836_v61 = vpop.f32.mrb[20].mxu0 }
 0x5ec   : > { %v1837_v63 = vadd.f32 %v8632_v60, %v1836_v61  ;;  %v6828_v0 = vpop.f32.mrb[21].mxu0 }
 0x5ed   : > { %v1839_v3 = vpop.f32.mrb[22].mxu0 }
 0x5ee   : > { %v1840_v4 = vadd.f32 %v8632_v60, %v1839_v3  ;;  %v6829_v5 = vpop.f32.mrb[23].mxu0  ;;  %v2252_v6 = vmax.f32 %v1837_v63, 0.0 }
 0x5f0   : > { %v2253_v7 = vmax.f32 %v1840_v4, 0.0 }
 0x5f2   : > { %v8639_v9 = vpack.c.bf16 %v2253_v7, %v2252_v6 }
 0x5f3   : > { %v1844_v10 = vpop.f32.mrb[24].mxu0 }
 0x5f4   : > { %v1845_v11 = vadd.f32 %v8632_v60, %v1844_v10  ;;  %v6832_v12 = vpop.f32.mrb[25].mxu0 }
 0x5f5   : > { %v1847_v13 = vpop.f32.mrb[26].mxu0 }
 0x5f6   : > { %v1848_v16 = vadd.f32 %v8632_v60, %v1847_v13  ;;  %v6833_v17 = vpop.f32.mrb[27].mxu0  ;;  %v2254_v18 = vmax.f32 %v1845_v11, 0.0 }
 0x5f8   : > { %v2255_v19 = vmax.f32 %v1848_v16, 0.0 }
 0x5fa   : > { %v8643_v20 = vpack.c.bf16 %v2255_v19, %v2254_v18 }
 0x5fb   : > { %v8645_v21 = vpop.f32.mrb[28].mxu0 }
 0x5fc   : > { %v6836_v22 = vpop.f32.mrb[29].mxu0 }
 0x5fd   : > { %v1855_v23 = vpop.f32.mrb[30].mxu0 }
 0x5fe   : > { %v6837_v24 = vpop.f32.mrb[31].mxu0 }
 0x603   : > { %v1950_v56 = vpop.f32.mrb[32].mxu0 }
 0x604   : > { %v1951_v25 = vadd.f32 %v6272_v57, %v1950_v56  ;;  %v6848_v59 = vpop.f32.mrb[33].mxu0 }
 0x605   : > { %v1953_v27 = vpop.f32.mrb[34].mxu0 }
 0x606   : > { %v1954_v29 = vadd.f32 %v6272_v57, %v1953_v27  ;;  %v6849_v30 = vpop.f32.mrb[35].mxu0  ;;  %v1972_v31 = vmax.f32 %v1951_v25, 0.0 }
 0x608   : > { %v1973_v32 = vmax.f32 %v1954_v29, 0.0 }
 0x60a   : > { %v1977_v33 = vpack.c.bf16 %v1973_v32, %v1972_v31 }
 0x60b   : > { %v1958_v34 = vpop.f32.mrb[36].mxu0 }
 0x60c   : > { %v1959_v35 = vadd.f32 %v6272_v57, %v1958_v34  ;;  %v6852_v36 = vpop.f32.mrb[37].mxu0  ;;  %6867 = vmatmul.mubr.msk.bf16.vlgmr.msra.gmra.mrb[44].mxu0 %vm591_vm4, %v1977_v33 }
 0x60d   : > { %v1961_v37 = vpop.f32.mrb[38].mxu0  ;;  %6870 = vmatprep.mubr.msk.bf16.mxu0 %vm7996_vm2, %v7994_v1  ;;  %6879 = vmatpush3.bf16.msra.mxu0 %v7748_v53  ;;  %v1656_v53 = vmax.f32 %v7543_v52, 0.0 }
 0x60e   : > { %v1962_v38 = vadd.f32 %v6272_v57, %v1961_v37  ;;  %v6853_v39 = vpop.f32.mrb[39].mxu0  ;;  %6880 = vmatprep.subr.bf16.mxu0 %v7994_v1  ;;  %v1974_v40 = vmax.f32 %v1959_v35, 0.0 }
 0x610   : > { %v1975_v42 = vmax.f32 %v1962_v38, 0.0 }
 0x611   : > { %6881 = vmatpush3.bf16.msra.mxu0 %v7749_v54  ;;  %v2062_v54 = vpack.c.bf16 %v1656_v53, %v1656_v53 }
 0x612   : > { %v1978_v44 = vpack.c.bf16 %v1975_v42, %v1974_v40  ;;  %6882 = vmatprep.subr.bf16.mxu0 %v7994_v1 }
 0x613   : > { %v1966_v45 = vpop.f32.mrb[40].mxu0 }
 0x614   : > { %v1967_v46 = vadd.f32 %v6272_v57, %v1966_v45  ;;  %v6856_v47 = vpop.f32.mrb[41].mxu0  ;;  %6871 = vmatmul.mubr.msk.bf16.gmra.mrb[48].mxu0 %vm591_vm4, %v1978_v44 }
 0x615   : > { %v1969_v48 = vpop.f32.mrb[42].mxu0  ;;  %6874 = vmatprep.mubr.msk.bf16.mxu0 %vm7996_vm2, %v7994_v1  ;;  %6883 = vmatpush3.bf16.msra.mxu0 %v7750_v55  ;;  %v2175_v55 = vpop.permute.xlu1 %2174 }
 0x616   : > { %v1976_v49 = vmax.f32 %v1967_v46, 0.0  ;;  %v6857_v50 = vpop.f32.mrb[43].mxu0  ;;  %6884 = vmatprep.subr.bf16.mxu0 %v7994_v1 }
 0x618   : > { %v1979_v51 = vpack.c.bf16 %v1976_v49, %v1976_v49 }
 0x619   : > { %6885 = vmatpush3.bf16.msra.mxu0 %v7751_v58  ;;  %v2097_v11 = vpop.permute.xlu1 %2096 }
 0x61a   : > { %6898 = vmatprep.subr.bf16.mxu0 %v7994_v1 }
 0x61c   : > { %6875 = vmatmul.mubr.msk.bf16.gmra.mrb[52].mxu0 %vm591_vm4, %v1979_v51 }
 0x61d   : > { %6886 = vmatprep.mubr.msk.bf16.mxu0 %vm7996_vm2, %v7994_v1  ;;  %v2185_v42 = vpop.permute.xlu1 %2184 }
 0x624   : > { %6887 = vmatmul.mubr.msk.bf16.vlgmr.msra.gmra.mrb[56].mxu0 %vm591_vm4, %v8542_v43  ;;  %v2173_v43 = vpop.permute.xlu0 %2172 }
 0x625   : > { %6890 = vmatprep.mubr.msk.bf16.mxu0 %vm7996_vm2, %v7994_v1  ;;  %6899 = vmatpush3.bf16.msra.mxu0 %v2173_v43 }
 0x626   : > { %6900 = vmatprep.subr.bf16.mxu0 %v7994_v1 }
 0x628   : > { %v2177_v28 = vpop.permute.xlu0 %2176 }
 0x629   : > { %6901 = vmatpush3.bf16.msra.mxu0 %v2175_v55 }
 0x62a   : > { %6902 = vmatprep.subr.bf16.mxu0 %v7994_v1 }
 0x62c   : > { %6891 = vmatmul.mubr.msk.bf16.gmra.mrb[60].mxu0 %vm591_vm4, %v8552_v62  ;;  %v2179_v62 = vpop.permute.xlu0 %2178 }
 0x62d   : > { %6894 = vmatprep.mubr.msk.bf16.mxu0 %vm7996_vm2, %v7994_v1  ;;  %6903 = vmatpush3.bf16.msra.mxu0 %v2177_v28 }
 0x62e   : > { %6904 = vmatprep.subr.bf16.mxu0 %v7994_v1 }
 0x631   : > { %6905 = vmatpush3.bf16.msra.mxu0 %v2179_v62 }
 0x632   : > { %6918 = vmatprep.subr.bf16.mxu0 %v7994_v1 }
 0x634   : > { %6895 = vmatmul.mubr.msk.bf16.gmra.mrb[64].mxu0 %vm591_vm4, %v2062_v54 }
 0x635   : > { %6906 = vmatprep.mubr.msk.bf16.mxu0 %vm7996_vm2, %v7994_v1 }
 0x6df   : > { %v8677_v2 = vpop.f32.mrb[44].mxu0 }
 0x6e0   : > { %v6868_v57 = vpop.f32.mrb[45].mxu0 }
 0x6e1   : > { %v8679_v58 = vpop.f32.mrb[46].mxu0 }
 0x6e2   : > { %v6869_v61 = vpop.f32.mrb[47].mxu0 }
 0x6e7   : > { %v8681_v63 = vpop.f32.mrb[48].mxu0 }
 0x6e8   : > { %v6872_v0 = vpop.f32.mrb[49].mxu0 }
 0x6e9   : > { %v8683_v3 = vpop.f32.mrb[50].mxu0 }
 0x6ea   : > { %v6873_v4 = vpop.f32.mrb[51].mxu0 }
 0x6ef   : > { %v8685_v5 = vpop.f32.mrb[52].mxu0 }
 0x6f0   : > { %v6876_v6 = vpop.f32.mrb[53].mxu0 }
 0x6f1   : > { %v2057_v7 = vpop.f32.mrb[54].mxu0 }
 0x6f2   : > { %v6877_v10 = vpop.f32.mrb[55].mxu0 }
 0x6f7   : > { %v2142_v12 = vpop.f32.mrb[56].mxu0 }
 0x6f8   : > { %v2143_v13 = vadd.f32 %v2142_v12, %v2097_v11  ;;  %v6888_v16 = vpop.f32.mrb[57].mxu0 }
 0x6f9   : > { %v2145_v17 = vpop.f32.mrb[58].mxu0 }
 0x6fa   : > { %v2146_v18 = vadd.f32 %v2145_v17, %v2097_v11  ;;  %v6889_v19 = vpop.f32.mrb[59].mxu0  ;;  %v2164_v22 = vmax.f32 %v2143_v13, 0.0 }
 0x6fc   : > { %v2165_v23 = vmax.f32 %v2146_v18, 0.0 }
 0x6fe   : > { %v2169_v24 = vpack.c.bf16 %v2165_v23, %v2164_v22 }
 0x6ff   : > { %v2150_v56 = vpop.f32.mrb[60].mxu0 }
 0x700   : > { %v2151_v25 = vadd.f32 %v2150_v56, %v2097_v11  ;;  %v6892_v59 = vpop.f32.mrb[61].mxu0  ;;  %6907 = vmatmul.mubr.msk.bf16.vlgmr.msra.gmra.mrb[68].mxu0 %vm591_vm4, %v2169_v24 }
 0x701   : > { %v2153_v27 = vpop.f32.mrb[62].mxu0  ;;  %6910 = vmatprep.mubr.msk.bf16.mxu0 %vm7996_vm2, %v7994_v1 }
 0x702   : > { %v2154_v29 = vadd.f32 %v2153_v27, %v2097_v11  ;;  %v6893_v30 = vpop.f32.mrb[63].mxu0  ;;  %v2166_v31 = vmax.f32 %v2151_v25, 0.0 }
 0x704   : > { %v2167_v32 = vmax.f32 %v2154_v29, 0.0 }
 0x706   : > { %v2170_v33 = vpack.c.bf16 %v2167_v32, %v2166_v31 }
 0x707   : > { %v2158_v34 = vpop.f32.mrb[64].mxu0 }
 0x708   : > { %v2159_v35 = vadd.f32 %v2158_v34, %v2097_v11  ;;  %v6896_v36 = vpop.f32.mrb[65].mxu0  ;;  %6911 = vmatmul.mubr.msk.bf16.gmra.mrb[72].mxu0 %vm591_vm4, %v2170_v33 }
 0x709   : > { %v2161_v37 = vpop.f32.mrb[66].mxu0  ;;  %6914 = vmatprep.mubr.msk.bf16.mxu0 %vm7996_vm2, %v7994_v1 }
 0x70a   : > { %v2168_v38 = vmax.f32 %v2159_v35, 0.0  ;;  %v6897_v39 = vpop.f32.mrb[67].mxu0 }
 0x70c   : > { %v2171_v40 = vpack.c.bf16 %v2168_v38, %v2168_v38 }
 0x710   : > { %6915 = vmatmul.mubr.msk.bf16.gmra.mrb[76].mxu0 %vm591_vm4, %v2171_v40  ;;  %v7752_v40 = vld [vmem:[%s9874_s8] sm:$0xff]  }
 0x711   : > { %6922 = vmatprep.mubr.msk.bf16.mxu0 %vm7996_vm2, %v7994_v1  ;;  %6919 = vmatpush3.bf16.msra.mxu0 %v7752_v40 }
 0x712   : > { %6920 = vmatprep.subr.bf16.mxu0 %v7994_v1 }
 0x7d3   : > { %v2230_v44 = vpop.f32.mrb[68].mxu0 }
 0x7d4   : > { %v2231_v45 = vadd.f32 %v2230_v44, %v2185_v42  ;;  %v6908_v46 = vpop.f32.mrb[69].mxu0 }
 0x7d5   : > { %v2233_v47 = vpop.f32.mrb[70].mxu0 }
 0x7d6   : > { %v2234_v48 = vadd.f32 %v2233_v47, %v2185_v42  ;;  %v6909_v49 = vpop.f32.mrb[71].mxu0  ;;  %v2262_v50 = vsel %vm719_vm5, %v2231_v45, -inf }
 0x7d7   : > { %2263 = vmax.xlane.f32.xlu0 %v2262_v50 }
 0x7d8   : > { %v2265_v51 = vsel %vm719_vm5, %v2234_v48, -inf }
 0x7d9   : > { %2266 = vmax.xlane.f32.xlu1 %v2265_v51 }
 0x7db   : > { %v2238_v52 = vpop.f32.mrb[72].mxu0 }
 0x7dc   : > { %v2239_v53 = vadd.f32 %v2238_v52, %v2185_v42  ;;  %v6912_v54 = vpop.f32.mrb[73].mxu0  ;;  %v7754_v52 = vld [vmem:[%s9874_s8 + $0x10] sm:$0xff]  }
 0x7dd   : > { %v2241_v43 = vpop.f32.mrb[74].mxu0 }
 0x7de   : > { %v2242_v55 = vadd.f32 %v2241_v43, %v2185_v42  ;;  %v6913_v28 = vpop.f32.mrb[75].mxu0  ;;  %v2268_v62 = vsel %vm719_vm5, %v2239_v53, -inf  ;;  %v7755_v43 = vld [vmem:[%s9874_s8 + $0x18] sm:$0xff]  }
 0x7df   : > { %2269 = vmax.xlane.f32.xlu0 %v2268_v62 }
 0x7e0   : > { %v2271_v57 = vsel %vm719_vm5, %v2242_v55, -inf }
 0x7e3   : > { %2272 = vmax.xlane.f32.xlu0 %v2271_v57  ;;  %v2246_v61 = vpop.f32.mrb[76].mxu0 }
 0x7e4   : > { %v2247_v0 = vadd.f32 %v2246_v61, %v2185_v42  ;;  %v6916_v4 = vpop.f32.mrb[77].mxu0  ;;  %v7753_v42 = vld [vmem:[%s9874_s8 + $0x8] sm:$0xff]  }
 0x7e5   : > { %v2249_v6 = vpop.f32.mrb[78].mxu0  ;;  %6921 = vmatpush3.bf16.msra.mxu0 %v7753_v42 }
 0x7e6   : > { %v6917_v7 = vpop.f32.mrb[79].mxu0  ;;  %v2275_v10 = vsel %vm2274_vm6, %v2247_v0, -inf  ;;  %6934 = vmatprep.subr.bf16.mxu0 %v7994_v1 }
 0x7e7   : > { %2276 = vmax.xlane.f32.xlu1 %v2275_v10  ;;  %v1853_v7 = vadd.f32 %v8632_v60, %v8645_v21 }
 0x7e9   : > { %v2256_v10 = vmax.f32 %v1853_v7, 0.0 }
 0x864   : > { %v2264_v11 = vpop.xlane.xlu0 %2263 }
 0x865   : > { %v2278_v12 = vsub.f32 %v2231_v45, %v2264_v11  ;;  %v2411_v11 = vpack.c.bf16 %v2256_v10, %v2256_v10 }
 0x866   : > { %v2267_v13 = vpop.xlane.xlu1 %2266 }
 0x867   : > { %v2283_v16 = vmul.f32 1.442695, %v2278_v12  ;;  %v2279_v17 = vsub.f32 %v2234_v48, %v2267_v13 }
 0x869   : > { %7782 = vpow2.f32 %v2283_v16  ;;  %v2285_v18 = vmul.f32 1.442695, %v2279_v17 }
 0x86b   : > { %7784 = vpow2.f32 %v2285_v18 }
 0x86c   : > { %v2270_v19 = vpop.xlane.xlu0 %2269 }
 0x86d   : > { %v2280_v22 = vsub.f32 %v2239_v53, %v2270_v19 }
 0x86f   : > { %v2287_v23 = vmul.f32 1.442695, %v2280_v22 }
 0x870   : > { %v2273_v24 = vpop.xlane.xlu0 %2272 }
 0x871   : > { %7786 = vpow2.f32 %v2287_v23  ;;  %v2281_v56 = vsub.f32 %v2242_v55, %v2273_v24 }
 0x873   : > { %v7783_v25 = vpop.eup %7782  ;;  %v2289_v59 = vmul.f32 1.442695, %v2281_v56 }
 0x874   : > { %v2277_v27 = vpop.xlane.xlu1 %2276  ;;  %v2293_v29 = vsel %vm719_vm5, %v7783_v25, 0.0 }
 0x875   : > { %v7785_v30 = vpop.eup %7784  ;;  %7788 = vpow2.f32 %v2289_v59  ;;  %v2282_v31 = vsub.f32 %v2247_v0, %v2277_v27  ;;  %2294 = vadd.xlane.f32.xlu0 %v2293_v29 }
 0x876   : > { %v2296_v32 = vsel %vm719_vm5, %v7785_v30, 0.0 }
 0x877   : > { %v2291_v33 = vmul.f32 1.442695, %v2282_v31  ;;  %2297 = vadd.xlane.f32.xlu1 %v2296_v32  ;;  %v8753_v32 = vld [vmem:[%s9875_s9 + $0x4] ss:$0 sm:$0xff] }
 0x879   : > { %7790 = vpow2.f32 %v2291_v33 }
 0x87b   : > { %v7787_v34 = vpop.eup %7786 }
 0x87c   : > { %v2299_v35 = vsel %vm719_vm5, %v7787_v34, 0.0 }
 0x87d   : > { %2300 = vadd.xlane.f32.xlu0 %v2299_v35 }
 0x87f   : > { %v7789_v36 = vpop.eup %7788 }
 0x880   : > { %v2302_v37 = vsel %vm719_vm5, %v7789_v36, 0.0 }
 0x881   : > { %2303 = vadd.xlane.f32.xlu1 %v2302_v37 }
 0x883   : > { %v7791_v38 = vpop.eup %7790 }
 0x884   : > { %v2305_v39 = vsel %vm2274_vm6, %v7791_v38, 0.0 }
 0x885   : > { %2306 = vadd.xlane.f32.xlu0 %v2305_v39 }
 0x892   : > { %2337 = vrot.lane.b32.xlu1 %v8632_v60, %s7999_s22 }
 0x902   : > { %v2295_v44 = vpop.xlane.xlu0 %2294 }
 0x903   : > { %7792 = vrcp.f32 %v2295_v44 }
 0x904   : > { %v2298_v45 = vpop.xlane.xlu1 %2297 }
 0x905   : > { %7794 = vrcp.f32 %v2298_v45 }
 0x90a   : > { %v2301_v46 = vpop.xlane.xlu0 %2300 }
 0x90b   : > { %7796 = vrcp.f32 %v2301_v46 }
 0x90d   : > { %v7793_v47 = vpop.eup %7792 }
 0x90e   : > { %v2304_v48 = vpop.xlane.xlu1 %2303  ;;  %v2313_v50 = vmul.f32 %v7793_v47, %v7783_v25 }
 0x90f   : > { %v7795_v49 = vpop.eup %7794  ;;  %7798 = vrcp.f32 %v2304_v48 }
 0x910   : > { %v2314_v51 = vmul.f32 %v7795_v49, %v7785_v30 }
 0x912   : > { %v2318_v53 = vpack.c.bf16 %v2314_v51, %v2313_v50  ;;  %v2307_v54 = vpop.xlane.xlu0 %2306  ;;  %v7756_v50 = vld [vmem:[%s9874_s8 + $0x20] sm:$0xff]  }
 0x913   : > { %7800 = vrcp.f32 %v2307_v54 }
 0x914   : > { %6923 = vmatmul.mubr.msk.bf16.vlgmr.msra.gmra.mrb[80].mxu0 %vm719_vm5, %v2318_v53 }
 0x915   : > { %6926 = vmatprep.mubr.msk.bf16.mxu0 %vm7996_vm2, %v7994_v1  ;;  %6935 = vmatpush3.bf16.msra.mxu0 %v7754_v52  ;;  %v7797_v55 = vpop.eup %7796 }
 0x916   : > { %6936 = vmatprep.subr.bf16.mxu0 %v7994_v1  ;;  %v2315_v62 = vmul.f32 %v7797_v55, %v7787_v34 }
 0x919   : > { %v7799_v28 = vpop.eup %7798  ;;  %6937 = vmatpush3.bf16.msra.mxu0 %v7755_v43 }
 0x91a   : > { %v2316_v57 = vmul.f32 %v7799_v28, %v7789_v36  ;;  %6950 = vmatprep.subr.bf16.mxu0 %v7994_v1  ;;  %v7757_v28 = vld [vmem:[%s9874_s8 + $0x28] sm:$0xff]  }
 0x91c   : > { %v2319_v61 = vpack.c.bf16 %v2316_v57, %v2315_v62 }
 0x91d   : > { %v7801_v0 = vpop.eup %7800 }
 0x91e   : > { %6927 = vmatmul.mubr.msk.bf16.gmra.mrb[84].mxu0 %vm719_vm5, %v2319_v61  ;;  %v2317_v4 = vmul.f32 %v7801_v0, %v7791_v38 }
 0x91f   : > { %6930 = vmatprep.mubr.msk.bf16.mxu0 %vm7996_vm2, %v7994_v1 }
 0x920   : > { %v2320_v6 = vpack.c.bf16 %v2317_v4, %v2317_v4 }
 0x926   : > { %6931 = vmatmul.mubr.msk.bf16.gmra.mrb[88].mxu0 %vm719_vm5, %v2320_v6 }
 0x927   : > { %6938 = vmatprep.mubr.msk.bf16.mxu0 %vm7996_vm2, %v7994_v1 }
 0x92e   : > { %6939 = vmatmul.mubr.msk.bf16.vlgmr.msra.gmra.mrb[92].mxu0 %vm719_vm5, %v8639_v9  ;;  %v2338_v9 = vpop.permute.xlu1 %2337 }
 0x92f   : > { %6942 = vmatprep.mubr.msk.bf16.mxu0 %vm7996_vm2, %v7994_v1  ;;  %6951 = vmatpush3.bf16.msra.mxu0 %v7756_v50 }
 0x930   : > { %6952 = vmatprep.subr.bf16.mxu0 %v7994_v1 }
 0x933   : > { %6953 = vmatpush3.bf16.msra.mxu0 %v7757_v28 }
 0x934   : > { %6984 = vmatprep.subr.bf16.mxu0 %v7994_v1 }
 0x936   : > { %6943 = vmatmul.mubr.msk.bf16.gmra.mrb[96].mxu0 %vm719_vm5, %v8643_v20 }
 0x937   : > { %6946 = vmatprep.mubr.msk.bf16.mxu0 %vm7996_vm2, %v7994_v1 }
 0x93e   : > { %6947 = vmatmul.mubr.msk.bf16.gmra.mrb[100].mxu0 %vm719_vm5, %v2411_v11 }
 0x93f   : > { %6954 = vmatprep.mubr.msk.bf16.mxu0 %vm7996_vm2, %v7994_v1 }
 0x9e7   : > { %v2383_v12 = vpop.f32.mrb[80].mxu0 }
 0x9e8   : > { %v6924_v13 = vpop.f32.mrb[81].mxu0  ;;  %v2384_v17 = vadd.f32 %v2383_v12, %v2338_v9 }
 0x9e9   : > { %v2386_v16 = vpop.f32.mrb[82].mxu0 }
 0x9ea   : > { %v2387_v18 = vadd.f32 %v2386_v16, %v2338_v9  ;;  %v6925_v21 = vpop.f32.mrb[83].mxu0 }
 0x9ec   : > { %v8746_v19 = vpack.c.bf16 %v2387_v18, %v2384_v17 }
 0x9f1   : > { %v2391_v20 = vpop.f32.mrb[84].mxu0 }
 0x9f2   : > { %v6928_v22 = vpop.f32.mrb[85].mxu0  ;;  %v2392_v24 = vadd.f32 %v2391_v20, %v2338_v9 }
 0x9f3   : > { %v2394_v23 = vpop.f32.mrb[86].mxu0 }
 0x9f4   : > { %v2395_v56 = vadd.f32 %v2394_v23, %v2338_v9  ;;  %v6929_v25 = vpop.f32.mrb[87].mxu0 }
 0x9f6   : > { %v8748_v59 = vpack.c.bf16 %v2395_v56, %v2392_v24 }
 0x9f9   : > { %v2399_v27 = vpop.f32.mrb[88].mxu0 }
 0x9fa   : > { %v6932_v29 = vpop.f32.mrb[89].mxu0  ;;  %v2400_v44 = vadd.f32 %v2399_v27, %v2338_v9 }
 0x9fb   : > { %v2402_v30 = vpop.f32.mrb[90].mxu0 }
 0x9fc   : > { %v6933_v31 = vpop.f32.mrb[91].mxu0  ;;  %v8771_v51 = vpack.c.bf16 %v2400_v44, %v2400_v44 }
 0xa01   : > { %v2478_v33 = vpop.f32.mrb[92].mxu0 }
 0xa02   : > { %v6940_v34 = vpop.f32.mrb[93].mxu0  ;;  %v2479_v36 = vadd.f32 %v8753_v32, %v2478_v33 }
 0xa03   : > { %v2481_v35 = vpop.f32.mrb[94].mxu0 }
 0xa04   : > { %v2482_v37 = vadd.f32 %v8753_v32, %v2481_v35  ;;  %v6941_v38 = vpop.f32.mrb[95].mxu0 }
 0xa06   : > { %v8757_v39 = vpack.c.bf16 %v2482_v37, %v2479_v36 }
 0xa08   : > { %2823 = vrot.lane.b32.xlu0 %v8757_v39, %s8000_s15  ;;  %v2610_v40 = vsel %vm2599_vm7, %v8757_v39, 0 }
 0xa09   : > { %v2486_v42 = vpop.f32.mrb[96].mxu0  ;;  %6967 = vmatpush3.bf16.xpose.msra.mxu1 %v2610_v40 }
 0xa0a   : > { %v6944_v45 = vpop.f32.mrb[97].mxu0  ;;  %6968 = vmatprep.subr.bf16.mxu1 %v7994_v1  ;;  %v2487_v47 = vadd.f32 %v8753_v32, %v2486_v42 }
 0xa0b   : > { %v2489_v46 = vpop.f32.mrb[98].mxu0 }
 0xa0c   : > { %v2490_v48 = vadd.f32 %v8753_v32, %v2489_v46  ;;  %2814 = vrot.lane.b32.xlu0 %v8746_v19, %s8000_s15  ;;  %v6945_v49 = vpop.f32.mrb[99].mxu0 }
 0xa0e   : > { %v8773_v52 = vpack.c.bf16 %v2490_v48, %v2487_v47 }
 0xa10   : > { %2818 = vrot.lane.b32.xlu0 %v8771_v51, %s8000_s15  ;;  %2825 = vrot.lane.b32.xlu1 %v8773_v52, %s8000_s15  ;;  %v2613_v53 = vsel %vm2599_vm7, %v8773_v52, 0 }
 0xa11   : > { %v2494_v54 = vpop.f32.mrb[100].mxu0  ;;  %6969 = vmatpush3.bf16.xpose.msra.mxu1 %v2613_v53 }
 0xa12   : > { %v2495_v43 = vadd.f32 %v8753_v32, %v2494_v54  ;;  %v6948_v55 = vpop.f32.mrb[101].mxu0  ;;  %6970 = vmatprep.subr.bf16.mxu1 %v7994_v1 }
 0xa13   : > { %v2497_v62 = vpop.f32.mrb[102].mxu0 }
 0xa14   : > { %v8787_v57 = vpack.c.bf16 %v2495_v43, %v2495_v43  ;;  %v6949_v61 = vpop.f32.mrb[103].mxu0 }
 0xa16   : > { %2827 = vrot.lane.b32.xlu1 %v8787_v57, %s8000_s15  ;;  %v2616_v0 = vsel %vm2599_vm7, %v8787_v57, 0 }
 0xa19   : > { %6971 = vmatpush3.bf16.xpose.msra.mxu1 %v2616_v0 }
 0xa1a   : > { %2816 = vrot.lane.b32.xlu1 %v8748_v59, %s8000_s15  ;;  %7002 = vmatprep.subr.bf16.mxu1 %v7994_v1 }
 0xa1e   : > { %1992 = vrot.lane.b32.xlu1 %v8632_v60, %s7998_s25 }
 0xa20   : > { %6973 = vmatmul.mubr.msk.bf16.vlgmr.msra.gmra.mrb[24].mxu1 %vm2599_vm7, %v8746_v19 }
 0xa21   : > { %6976 = vmatprep.mubr.msk.bf16.mxu1 %vm7996_vm2, %v7994_v1 }
 0xa28   : > { %6977 = vmatmul.mubr.msk.bf16.gmra.mrb[28].mxu1 %vm2599_vm7, %v8748_v59 }
 0xa29   : > { %6980 = vmatprep.mubr.msk.bf16.mxu1 %vm7996_vm2, %v7994_v1 }
 0xa30   : > { %6981 = vmatmul.mubr.msk.bf16.gmra.mrb[32].mxu1 %vm2599_vm7, %v8771_v51 }
 0xa31   : > { %7008 = vmatprep.mubr.msk.bf16.mxu1 %vm7996_vm2, %v7994_v1 }
 0xa7a   : > { %v2824_v4 = vpop.permute.xlu0 %2823 }
 0xa7b   : > { %v2839_v60 = vsel %vm2599_vm7, %v2824_v4, 0 }
 0xa7c   : > { %7003 = vmatpush3.bf16.xpose.msra.mxu1 %v2839_v60 }
 0xa7d   : > { %7004 = vmatprep.subr.bf16.mxu1 %v7994_v1 }
 0xa7e   : > { %v2815_v21 = vpop.permute.xlu0 %2814 }
 0xa82   : > { %v2826_v6 = vpop.permute.xlu1 %2825 }
 0xa83   : > { %v2842_v7 = vsel %vm2599_vm7, %v2826_v6, 0 }
 0xa84   : > { %7005 = vmatpush3.bf16.xpose.msra.mxu1 %v2842_v7 }
 0xa85   : > { %7006 = vmatprep.subr.bf16.mxu1 %v7994_v1 }
 0xa88   : > { %v2828_v10 = vpop.permute.xlu1 %2827 }
 0xa89   : > { %v2845_v11 = vsel %vm2599_vm7, %v2828_v10, 0 }
 0xa8c   : > { %v2817_v9 = vpop.permute.xlu1 %2816  ;;  %7007 = vmatpush3.bf16.xpose.msra.mxu1 %v2845_v11 }
 0xa8d   : > { %7038 = vmatprep.subr.bf16.mxu1 %v7994_v1 }
 0xa90   : > { %v1993_v12 = vpop.permute.xlu1 %1992 }
 0xa91   : > { %v2039_v13 = vadd.f32 %v8677_v2, %v1993_v12  ;;  %v2042_v16 = vadd.f32 %v8679_v58, %v1993_v12  ;;  %v2047_v17 = vadd.f32 %v8681_v63, %v1993_v12  ;;  %v2050_v18 = vadd.f32 %v8683_v3, %v1993_v12  ;;  %v2819_v63 = vpop.permute.xlu0 %2818 }
 0xa92   : > { %v2055_v2 = vadd.f32 %v8685_v5, %v1993_v12 }
 0xa93   : > { %v2257_v20 = vmax.f32 %v2039_v13, 0.0  ;;  %v2258_v22 = vmax.f32 %v2042_v16, 0.0  ;;  %7009 = vmatmul.mubr.msk.bf16.vlgmr.msra.gmra.mrb[36].mxu1 %vm2599_vm7, %v2815_v21  ;;  %v2259_v23 = vmax.f32 %v2047_v17, 0.0  ;;  %v2260_v24 = vmax.f32 %v2050_v18, 0.0 }
 0xa94   : > { %7012 = vmatprep.mubr.msk.bf16.mxu1 %vm7996_vm2, %v7994_v1  ;;  %v2261_v58 = vmax.f32 %v2055_v2, 0.0 }
 0xa95   : > { %v2503_v56 = vpack.c.bf16 %v2258_v22, %v2257_v20  ;;  %v2504_v25 = vpack.c.bf16 %v2260_v24, %v2259_v23 }
 0xa96   : > { %v2505_v3 = vpack.c.bf16 %v2261_v58, %v2261_v58 }
 0xa97   : > { %6955 = vmatmul.mubr.msk.bf16.vlgmr.msra.gmra.mrb[104].mxu0 %vm719_vm5, %v2503_v56 }
 0xa98   : > { %6958 = vmatprep.mubr.msk.bf16.mxu0 %vm7996_vm2, %v7994_v1 }
 0xa9b   : > { %7013 = vmatmul.mubr.msk.bf16.gmra.mrb[40].mxu1 %vm2599_vm7, %v2817_v9 }
 0xa9c   : > { %7016 = vmatprep.mubr.msk.bf16.mxu1 %vm7996_vm2, %v7994_v1 }
 0xa9f   : > { %6959 = vmatmul.mubr.msk.bf16.gmra.mrb[108].mxu0 %vm719_vm5, %v2504_v25 }
 0xaa0   : > { %6962 = vmatprep.mubr.msk.bf16.mxu0 %vm7996_vm2, %v7994_v1 }
 0xaa3   : > { %7017 = vmatmul.mubr.msk.bf16.gmra.mrb[44].mxu1 %vm2599_vm7, %v2819_v63 }
 0xaa4   : > { %7040 = vmatprep.mubr.msk.bf16.mxu1 %vm7996_vm2, %v7994_v1 }
 0xaa7   : > { %6963 = vmatmul.mubr.msk.bf16.gmra.mrb[112].mxu0 %vm719_vm5, %v2505_v3 }
 0xaa8   : > { %6990 = vmatprep.mubr.msk.bf16.mxu0 %vm7996_vm2, %v7994_v1 }
 0xaf3   : > { %v2652_v27 = vpop.f32.mrb[24].mxu1 }
 0xaf4   : > { %v8840_v5 = vmul.f32 0.35355338, %v2652_v27  ;;  %v6974_v29 = vpop.f32.mrb[25].mxu1 }
 0xaf5   : > { %v2655_v30 = vpop.f32.mrb[26].mxu1 }
 0xaf6   : > { %v8842_v31 = vmul.f32 0.35355338, %v2655_v30  ;;  %v6975_v33 = vpop.f32.mrb[27].mxu1  ;;  %v2680_v34 = vsel %vm2679_vm8, %v8840_v5, -inf }
 0xaf7   : > { %2681 = vmax.xlane.f32.xlu0 %v2680_v34 }
 0xaf8   : > { %v2683_v35 = vsel %vm2679_vm8, %v8842_v31, -inf }
 0xaf9   : > { %2684 = vmax.xlane.f32.xlu1 %v2683_v35 }
 0xafb   : > { %v2660_v36 = vpop.f32.mrb[28].mxu1 }
 0xafc   : > { %v8848_v37 = vmul.f32 0.35355338, %v2660_v36  ;;  %v6978_v38 = vpop.f32.mrb[29].mxu1 }
 0xafd   : > { %v2663_v40 = vpop.f32.mrb[30].mxu1 }
 0xafe   : > { %v8850_v42 = vmul.f32 0.35355338, %v2663_v40  ;;  %v6979_v44 = vpop.f32.mrb[31].mxu1  ;;  %v2686_v45 = vsel %vm2679_vm8, %v8848_v37, -inf }
 0xaff   : > { %2687 = vmax.xlane.f32.xlu0 %v2686_v45 }
 0xb00   : > { %v2689_v46 = vsel %vm2679_vm8, %v8850_v42, -inf }
 0xb03   : > { %2690 = vmax.xlane.f32.xlu0 %v2689_v46  ;;  %v2668_v47 = vpop.f32.mrb[32].mxu1 }
 0xb04   : > { %v2678_v48 = vmul.f32 0.35355338, %v2668_v47  ;;  %v6982_v49 = vpop.f32.mrb[33].mxu1 }
 0xb05   : > { %v2671_v50 = vpop.f32.mrb[34].mxu1 }
 0xb06   : > { %v6983_v53 = vpop.f32.mrb[35].mxu1  ;;  %v2693_v54 = vsel %vm2692_vm9, %v2678_v48, -inf }
 0xb07   : > { %2694 = vmax.xlane.f32.xlu1 %v2693_v54 }
 0xb66   : > { %v2881_v43 = vpop.f32.mrb[36].mxu1 }
 0xb67   : > { %v8857_v55 = vmul.f32 0.35355338, %v2881_v43  ;;  %v7010_v28 = vpop.f32.mrb[37].mxu1 }
 0xb68   : > { %v2884_v62 = vpop.f32.mrb[38].mxu1 }
 0xb69   : > { %v8859_v61 = vmul.f32 0.35355338, %v2884_v62  ;;  %v7011_v0 = vpop.f32.mrb[39].mxu1  ;;  %v2908_v4 = vsel %vm2679_vm8, %v8857_v55, -inf }
 0xb6a   : > { %2909 = vmax.xlane.f32.xlu0 %v2908_v4  ;;  %v2569_v60 = vpop.f32.mrb[104].mxu0 }
 0xb6b   : > { %v6956_v6 = vpop.f32.mrb[105].mxu0  ;;  %v2911_v7 = vsel %vm2679_vm8, %v8859_v61, -inf }
 0xb6c   : > { %2912 = vmax.xlane.f32.xlu1 %v2911_v7  ;;  %v2572_v10 = vpop.f32.mrb[106].mxu0 }
 0xb6d   : > { %v6957_v11 = vpop.f32.mrb[107].mxu0 }
 0xb6e   : > { %v2889_v9 = vpop.f32.mrb[40].mxu1 }
 0xb6f   : > { %v8865_v12 = vmul.f32 0.35355338, %v2889_v9  ;;  %v7014_v13 = vpop.f32.mrb[41].mxu1 }
 0xb70   : > { %v2892_v16 = vpop.f32.mrb[42].mxu1 }
 0xb71   : > { %v8867_v17 = vmul.f32 0.35355338, %v2892_v16  ;;  %v7015_v18 = vpop.f32.mrb[43].mxu1  ;;  %v2914_v21 = vsel %vm2679_vm8, %v8865_v12, -inf }
 0xb72   : > { %2915 = vmax.xlane.f32.xlu0 %v2914_v21  ;;  %v2577_v20 = vpop.f32.mrb[108].mxu0 }
 0xb73   : > { %v6960_v22 = vpop.f32.mrb[109].mxu0  ;;  %v2917_v23 = vsel %vm2679_vm8, %v8867_v17, -inf }
 0xb74   : > { %2918 = vmax.xlane.f32.xlu1 %v2917_v23  ;;  %v2580_v24 = vpop.f32.mrb[110].mxu0 }
 0xb75   : > { %v6961_v56 = vpop.f32.mrb[111].mxu0 }
 0xb76   : > { %v2897_v25 = vpop.f32.mrb[44].mxu1 }
 0xb77   : > { %v8873_v2 = vmul.f32 0.35355338, %v2897_v25  ;;  %v7018_v58 = vpop.f32.mrb[45].mxu1 }
 0xb78   : > { %v2900_v63 = vpop.f32.mrb[46].mxu1 }
 0xb79   : > { %v7019_v3 = vpop.f32.mrb[47].mxu1  ;;  %v2920_v27 = vsel %vm2692_vm9, %v8873_v2, -inf }
 0xb7a   : > { %2921 = vmax.xlane.f32.xlu0 %v2920_v27  ;;  %v2585_v29 = vpop.f32.mrb[112].mxu0 }
 0xb7b   : > { %v6964_v30 = vpop.f32.mrb[113].mxu0 }
 0xb7c   : > { %v2588_v33 = vpop.f32.mrb[114].mxu0 }
 0xb7d   : > { %v6965_v34 = vpop.f32.mrb[115].mxu0 }
 0xb84   : > { %v2682_v0 = vpop.xlane.xlu0 %2681 }
 0xb85   : > { %2523 = vrot.lane.b32.xlu1 %v8753_v32, %s7998_s25 }
 0xb86   : > { %v2685_v35 = vpop.xlane.xlu1 %2684 }
 0xb8c   : > { %v2688_v6 = vpop.xlane.xlu0 %2687 }
 0xb8d   : > { %v2698_v9 = vsub.f32 %v8848_v37, %v2688_v6 }
 0xb8f   : > { %v2705_v16 = vmul.f32 1.442695, %v2698_v9 }
 0xb90   : > { %v2691_v13 = vpop.xlane.xlu0 %2690 }
 0xb91   : > { %v2699_v18 = vsub.f32 %v8850_v42, %v2691_v13 }
 0xb94   : > { %v2695_v36 = vpop.xlane.xlu1 %2694 }
 0xb95   : > { %v2700_v38 = vsub.f32 %v2678_v48, %v2695_v36 }
 0xb97   : > { %v2709_v40 = vmul.f32 1.442695, %v2700_v38 }
 0xb99   : > { %7802 = vpow2.f32 %v2709_v40 }
 0xba3   : > { %v8879_v44 = vpop.eup %7802 }
 0xba4   : > { %v2723_v45 = vsel %vm2692_vm9, %v8879_v44, 0.0 }
 0xba9   : > { %2724 = vadd.xlane.f32.xlu1 %v2723_v45 }
 0xbf7   : > { %v2910_v21 = vpop.xlane.xlu0 %2909 }
 0xbf9   : > { %v2913_v46 = vpop.xlane.xlu1 %2912 }
 0xc01   : > { %v2919_v47 = vpop.xlane.xlu1 %2918 }
 0xc02   : > { %v2926_v3 = vsub.f32 %v8867_v17, %v2919_v47 }
 0xc04   : > { %v2934_v30 = vmul.f32 1.442695, %v2926_v3 }
 0xc05   : > { %v2524_v49 = vpop.permute.xlu1 %2523 }
 0xc06   : > { %v2570_v50 = vadd.f32 %v2569_v60, %v2524_v49  ;;  %v2573_v53 = vadd.f32 %v2572_v10, %v2524_v49  ;;  %v2578_v54 = vadd.f32 %v2577_v20, %v2524_v49  ;;  %v2581_v43 = vadd.f32 %v2580_v24, %v2524_v49 }
 0xc07   : > { %v2586_v32 = vadd.f32 %v2585_v29, %v2524_v49  ;;  %v2696_v60 = vsub.f32 %v8840_v5, %v2682_v0  ;;  %v2697_v10 = vsub.f32 %v8842_v31, %v2685_v35  ;;  %v2707_v5 = vmul.f32 1.442695, %v2699_v18  ;;  %v2916_v31 = vpop.xlane.xlu0 %2915 }
 0xc08   : > { %v8883_v28 = vpack.c.bf16 %v2573_v53, %v2570_v50  ;;  %v8885_v62 = vpack.c.bf16 %v2581_v43, %v2578_v54  ;;  %v2923_v20 = vsub.f32 %v8857_v55, %v2910_v21  ;;  %v2924_v24 = vsub.f32 %v8859_v61, %v2913_v46 }
 0xc09   : > { %v8893_v48 = vpack.c.bf16 %v2586_v32, %v2586_v32  ;;  %v2701_v7 = vmul.f32 1.442695, %v2696_v60  ;;  %v2703_v11 = vmul.f32 1.442695, %v2697_v10  ;;  %v2925_v58 = vsub.f32 %v8865_v12, %v2916_v31 }
 0xc0a   : > { %2969 = vrot.lane.b32.xlu0 %v8883_v28, %s8000_s15  ;;  %6985 = vmatpush3.bf16.msra.mxu0 %v8883_v28  ;;  %v2928_v23 = vmul.f32 1.442695, %v2923_v20  ;;  %v2930_v37 = vmul.f32 1.442695, %v2924_v24 }
 0xc0b   : > { %2971 = vrot.lane.b32.xlu1 %v8885_v62, %s8000_s15  ;;  %6986 = vmatprep.subr.bf16.mxu0 %v7994_v1  ;;  %v2750_v4 = vsel %vm2748_vm10, %v8893_v48, 0  ;;  %7804 = vpow2.f32 %v2701_v7  ;;  %v2932_v55 = vmul.f32 1.442695, %v2925_v58  ;;  %v2922_v27 = vpop.xlane.xlu0 %2921 }
 0xc0c   : > { %7806 = vpow2.f32 %v2703_v11  ;;  %v2927_v33 = vsub.f32 %v8873_v2, %v2922_v27 }
 0xc0d   : > { %7808 = vpow2.f32 %v2705_v16 }
 0xc0e   : > { %6987 = vmatpush3.bf16.msra.mxu0 %v8885_v62  ;;  %7810 = vpow2.f32 %v2707_v5  ;;  %v2936_v35 = vmul.f32 1.442695, %v2927_v33 }
 0xc0f   : > { %3195 = vrot.lane.b32.xlu1 %v8787_v57, %s8001_s23  ;;  %6988 = vmatprep.subr.bf16.mxu0 %v7994_v1  ;;  %7812 = vpow2.f32 %v2928_v23 }
 0xc10   : > { %7814 = vpow2.f32 %v2930_v37 }
 0xc11   : > { %7816 = vpow2.f32 %v2932_v55 }
 0xc12   : > { %6989 = vmatpush3.bf16.msra.mxu0 %v2750_v4  ;;  %7818 = vpow2.f32 %v2934_v30 }
 0xc13   : > { %3187 = vrot.lane.b32.xlu1 %v8748_v59, %s8001_s23  ;;  %7020 = vmatprep.subr.bf16.mxu0 %v7994_v1  ;;  %7820 = vpow2.f32 %v2936_v35 }
 0xc15   : > { %v7805_v22 = vpop.eup %7804 }
 0xc16   : > { %v2711_v56 = vsel %vm2679_vm8, %v7805_v22, 0.0  ;;  %v7807_v25 = vpop.eup %7806 }
 0xc17   : > { %v2714_v42 = vsel %vm2679_vm8, %v7807_v25, 0.0  ;;  %v8913_v63 = vpop.eup %7808 }
 0xc18   : > { %v2717_v61 = vsel %vm2679_vm8, %v8913_v63, 0.0  ;;  %v7811_v29 = vpop.eup %7810 }
 0xc19   : > { %v2720_v12 = vsel %vm2679_vm8, %v7811_v29, 0.0  ;;  %v8920_v34 = vpop.eup %7812 }
 0xc1a   : > { %v2938_v17 = vsel %vm2679_vm8, %v8920_v34, 0.0  ;;  %v8924_v36 = vpop.eup %7814 }
 0xc1b   : > { %v2941_v38 = vsel %vm2679_vm8, %v8924_v36, 0.0  ;;  %v8928_v40 = vpop.eup %7816 }
 0xc1c   : > { %v2944_v2 = vsel %vm2679_vm8, %v8928_v40, 0.0  ;;  %v8932_v45 = vpop.eup %7818 }
 0xc1d   : > { %v2947_v46 = vsel %vm2679_vm8, %v8932_v45, 0.0  ;;  %v8936_v47 = vpop.eup %7820 }
 0xc1e   : > { %v2950_v49 = vsel %vm2692_vm9, %v8936_v47, 0.0 }
 0xc29   : > { %2712 = vadd.xlane.f32.xlu0 %v2711_v56 }
 0xc2d   : > { %2715 = vadd.xlane.f32.xlu0 %v2714_v42 }
 0xc31   : > { %2718 = vadd.xlane.f32.xlu0 %v2717_v61 }
 0xc35   : > { %2721 = vadd.xlane.f32.xlu0 %v2720_v12 }
 0xc36   : > { %v2725_v4 = vpop.xlane.xlu1 %2724 }
 0xc39   : > { %2939 = vadd.xlane.f32.xlu0 %v2938_v17  ;;  %v6325_v17 = vld [vmem:[%s9874_s8 + $0x30] sm:$0xf] }
 0xc3d   : > { %2942 = vadd.xlane.f32.xlu0 %v2941_v38  ;;  %v6326_v38 = vld [vmem:[%s9874_s8 + $0x34] sm:$0xf] }
 0xc41   : > { %2945 = vadd.xlane.f32.xlu0 %v2944_v2 }
 0xc45   : > { %2948 = vadd.xlane.f32.xlu0 %v2947_v46 }
 0xc49   : > { %2951 = vadd.xlane.f32.xlu0 %v2950_v49 }
 0xc5f   : > { %2973 = vrot.lane.b32.xlu0 %v8893_v48, %s8000_s15 }
 0xc63   : > { %3191 = vrot.lane.b32.xlu0 %v8757_v39, %s8001_s23 }
 0xc67   : > { %3193 = vrot.lane.b32.xlu0 %v8773_v52, %s8001_s23 }
 0xc6b   : > { %3185 = vrot.lane.b32.xlu0 %v8746_v19, %s8001_s23 }
 0xc6f   : > { %3189 = vrot.lane.b32.xlu0 %v8771_v51, %s8001_s23 }
 0xc7c   : > { %v2970_v50 = vpop.permute.xlu0 %2969 }
 0xc7d   : > { %v2972_v18 = vpop.permute.xlu1 %2971 }
 0xcb6   : > { %v2713_v53 = vpop.xlane.xlu0 %2712 }
 0xcb7   : > { %7822 = vrcp.f32 %v2713_v53 }
 0xcba   : > { %v2716_v54 = vpop.xlane.xlu0 %2715 }
 0xcbb   : > { %7824 = vrcp.f32 %v2716_v54 }
 0xcbe   : > { %v2719_v43 = vpop.xlane.xlu0 %2718 }
 0xcbf   : > { %7826 = vrcp.f32 %v2719_v43 }
 0xcc1   : > { %v7823_v0 = vpop.eup %7822 }
 0xcc2   : > { %v2722_v32 = vpop.xlane.xlu0 %2721  ;;  %v2731_v6 = vmul.f32 %v7823_v0, %v7805_v22 }
 0xcc3   : > { %7828 = vrcp.f32 %v2722_v32 }
 0xcc4   : > { %7830 = vrcp.f32 %v2725_v4 }
 0xcc5   : > { %v7825_v60 = vpop.eup %7824 }
 0xcc6   : > { %v2732_v7 = vmul.f32 %v7825_v60, %v7807_v25  ;;  %v2940_v10 = vpop.xlane.xlu0 %2939 }
 0xcc8   : > { %v2736_v11 = vpack.c.bf16 %v2732_v7, %v2731_v6 }
 0xcc9   : > { %v7827_v13 = vpop.eup %7826 }
 0xcca   : > { %v2943_v9 = vpop.xlane.xlu0 %2942  ;;  %6991 = vmatmul.mubr.msk.bf16.vlgmr.msra.gmra.mrb[116].mxu0 %vm2679_vm8, %v2736_v11  ;;  %v2733_v5 = vmul.f32 %v7827_v13, %v8913_v63 }
 0xccb   : > { %7021 = vmatpush3.bf16.msra.mxu0 %v2970_v50  ;;  %6994 = vmatprep.mubr.msk.bf16.mxu0 %vm7996_vm2, %v7994_v1  ;;  %7832 = vrcp.f32 %v2943_v9 }
 0xccc   : > { %7022 = vmatprep.subr.bf16.mxu0 %v7994_v1  ;;  %7834 = vrcp.f32 %v2940_v10 }
 0xccd   : > { %v7829_v16 = vpop.eup %7828 }
 0xcce   : > { %v2946_v21 = vpop.xlane.xlu0 %2945  ;;  %v2734_v20 = vmul.f32 %v7829_v16, %v7811_v29  ;;  %v7831_v23 = vpop.eup %7830 }
 0xccf   : > { %7023 = vmatpush3.bf16.msra.mxu0 %v2972_v18  ;;  %v2735_v31 = vmul.f32 %v7831_v23, %v8879_v44 }
 0xcd0   : > { %v2737_v22 = vpack.c.bf16 %v2734_v20, %v2733_v5  ;;  %7024 = vmatprep.subr.bf16.mxu0 %v7994_v1 }
 0xcd1   : > { %v2738_v25 = vpack.c.bf16 %v2735_v31, %v2735_v31 }
 0xcd2   : > { %v2949_v24 = vpop.xlane.xlu0 %2948  ;;  %6995 = vmatmul.mubr.msk.bf16.gmra.mrb[120].mxu0 %vm2679_vm8, %v2737_v22 }
 0xcd3   : > { %6998 = vmatprep.mubr.msk.bf16.mxu0 %vm7996_vm2, %v7994_v1  ;;  %7836 = vrcp.f32 %v2949_v24 }
 0xcd4   : > { %7838 = vrcp.f32 %v2946_v21 }
 0xcd5   : > { %v7833_v37 = vpop.eup %7832 }
 0xcd6   : > { %v2952_v56 = vpop.xlane.xlu0 %2951  ;;  %v7835_v42 = vpop.eup %7834  ;;  %v2959_v55 = vmul.f32 %v7833_v37, %v8924_v36  ;;  %v3127_v36 = vsel %vm3057_vm11, %v6325_v17, 0 }
 0xcd7   : > { %v2958_v44 = vmul.f32 %v7835_v42, %v8920_v34  ;;  %7840 = vrcp.f32 %v2952_v56 }
 0xcd9   : > { %v2963_v3 = vpack.c.bf16 %v2959_v55, %v2958_v44 }
 0xcda   : > { %v2974_v58 = vpop.permute.xlu0 %2973  ;;  %6999 = vmatmul.mubr.msk.bf16.gmra.mrb[124].mxu0 %vm2679_vm8, %v2738_v25 }
 0xcdb   : > { %v2987_v63 = vsel %vm2748_vm10, %v2974_v58, 0  ;;  %7026 = vmatprep.mubr.msk.bf16.mxu0 %vm7996_vm2, %v7994_v1  ;;  %v3196_v58 = vpop.permute.xlu1 %3195 }
 0xcdc   : > { %7025 = vmatpush3.bf16.msra.mxu0 %v2987_v63  ;;  %v3213_v44 = vsel %vm2599_vm7, %v3196_v58, 0 }
 0xcdd   : > { %7052 = vmatprep.subr.bf16.mxu0 %v7994_v1  ;;  %v7837_v27 = vpop.eup %7836 }
 0xcde   : > { %v7839_v61 = vpop.eup %7838  ;;  %v2961_v29 = vmul.f32 %v7837_v27, %v8932_v45  ;;  %v3192_v9 = vpop.permute.xlu0 %3191 }
 0xcdf   : > { %v2960_v30 = vmul.f32 %v7839_v61, %v8928_v40  ;;  %v3059_v40 = vsel %vm3057_vm11, %v6326_v38, 0  ;;  %v3207_v21 = vsel %vm2599_vm7, %v3192_v9, 0  ;;  %v3188_v27 = vpop.permute.xlu1 %3187 }
 0xce0   : > { %7039 = vmatpush3.bf16.msra.mxu1 %v3059_v40 }
 0xce1   : > { %v2964_v33 = vpack.c.bf16 %v2961_v29, %v2960_v30  ;;  %v7841_v12 = vpop.eup %7840  ;;  %7066 = vmatprep.subr.bf16.mxu1 %v7994_v1 }
 0xce2   : > { %7027 = vmatmul.mubr.msk.bf16.vlgmr.msra.gmra.mrb[128].mxu0 %vm2679_vm8, %v2963_v3  ;;  %v2962_v34 = vmul.f32 %v7841_v12, %v8936_v47  ;;  %v3194_v22 = vpop.permute.xlu0 %3193 }
 0xce3   : > { %7030 = vmatprep.mubr.msk.bf16.mxu0 %vm7996_vm2, %v7994_v1  ;;  %7053 = vmatpush3.bf16.msra.mxu0 %v3127_v36  ;;  %v3210_v56 = vsel %vm2599_vm7, %v3194_v22, 0 }
 0xce4   : > { %v2965_v35 = vpack.c.bf16 %v2962_v34, %v2962_v34  ;;  %7084 = vmatprep.subr.bf16.mxu0 %v7994_v1 }
 0xce6   : > { %v3186_v3 = vpop.permute.xlu0 %3185 }
 0xcea   : > { %7031 = vmatmul.mubr.msk.bf16.gmra.mrb[132].mxu0 %vm2679_vm8, %v2964_v33  ;;  %v3190_v61 = vpop.permute.xlu0 %3189 }
 0xceb   : > { %7034 = vmatprep.mubr.msk.bf16.mxu0 %vm7996_vm2, %v7994_v1 }
 0xcf2   : > { %7035 = vmatmul.mubr.msk.bf16.gmra.mrb[136].mxu0 %vm2679_vm8, %v2965_v35 }
 0xcf3   : > { %7054 = vmatprep.mubr.msk.bf16.mxu0 %vm7996_vm2, %v7994_v1 }
 0xd9d   : > { %v2786_v2 = vpop.f32.mrb[116].mxu0 }
 0xd9e   : > { %v6992_v45 = vpop.f32.mrb[117].mxu0 }
 0xd9f   : > { %v2789_v46 = vpop.f32.mrb[118].mxu0 }
 0xda0   : > { %v2808_v47 = vpack.c.bf16 %v2789_v46, %v2786_v2  ;;  %v6993_v49 = vpop.f32.mrb[119].mxu0 }
 0xda2   : > { %7055 = vmatmul.mubr.msk.bf16.vlgmr.msra.gmra.mrb[140].mxu0 %vm2599_vm7, %v2808_v47 }
 0xda3   : > { %7058 = vmatprep.mubr.msk.bf16.mxu0 %vm7996_vm2, %v7994_v1 }
 0xda5   : > { %v2794_v50 = vpop.f32.mrb[120].mxu0 }
 0xda6   : > { %v6996_v53 = vpop.f32.mrb[121].mxu0 }
 0xda7   : > { %v2797_v54 = vpop.f32.mrb[122].mxu0 }
 0xda8   : > { %v2809_v43 = vpack.c.bf16 %v2797_v54, %v2794_v50  ;;  %v6997_v32 = vpop.f32.mrb[123].mxu0 }
 0xdaa   : > { %7059 = vmatmul.mubr.msk.bf16.gmra.mrb[144].mxu0 %vm2599_vm7, %v2809_v43 }
 0xdab   : > { %7062 = vmatprep.mubr.msk.bf16.mxu0 %vm7996_vm2, %v7994_v1 }
 0xdad   : > { %v2802_v0 = vpop.f32.mrb[124].mxu0 }
 0xdae   : > { %v7000_v4 = vpop.f32.mrb[125].mxu0  ;;  %v2810_v6 = vpack.c.bf16 %v2802_v0, %v2802_v0 }
 0xdaf   : > { %v2805_v60 = vpop.f32.mrb[126].mxu0 }
 0xdb0   : > { %v7001_v7 = vpop.f32.mrb[127].mxu0 }
 0xdb2   : > { %7063 = vmatmul.mubr.msk.bf16.gmra.mrb[148].mxu0 %vm2599_vm7, %v2810_v6 }
 0xdb3   : > { %7090 = vmatprep.mubr.msk.bf16.mxu0 %vm7996_vm2, %v7994_v1 }
 0xdb5   : > { %v3023_v10 = vpop.f32.mrb[128].mxu0 }
 0xdb6   : > { %v7028_v11 = vpop.f32.mrb[129].mxu0 }
 0xdb7   : > { %v3026_v13 = vpop.f32.mrb[130].mxu0 }
 0xdb8   : > { %v3045_v16 = vpack.c.bf16 %v3026_v13, %v3023_v10  ;;  %v7029_v18 = vpop.f32.mrb[131].mxu0 }
 0xdba   : > { %7041 = vmatmul.mubr.msk.bf16.vlgmr.msra.gmra.mrb[48].mxu1 %vm2599_vm7, %v3045_v16 }
 0xdbb   : > { %7067 = vmatpush3.bf16.xpose.msra.mxu1 %v3207_v21  ;;  %7044 = vmatprep.mubr.msk.bf16.mxu1 %vm7996_vm2, %v7994_v1 }
 0xdbc   : > { %7068 = vmatprep.subr.bf16.mxu1 %v7994_v1 }
 0xdbd   : > { %v3031_v5 = vpop.f32.mrb[132].mxu0 }
 0xdbe   : > { %v7032_v20 = vpop.f32.mrb[133].mxu0 }
 0xdbf   : > { %v3034_v23 = vpop.f32.mrb[134].mxu0 }
 0xdc0   : > { %v3046_v24 = vpack.c.bf16 %v3034_v23, %v3031_v5  ;;  %v7033_v31 = vpop.f32.mrb[135].mxu0 }
 0xdc2   : > { %7045 = vmatmul.mubr.msk.bf16.gmra.mrb[52].mxu1 %vm2599_vm7, %v3046_v24 }
 0xdc3   : > { %7069 = vmatpush3.bf16.xpose.msra.mxu1 %v3210_v56  ;;  %7048 = vmatprep.mubr.msk.bf16.mxu1 %vm7996_vm2, %v7994_v1 }
 0xdc4   : > { %7070 = vmatprep.subr.bf16.mxu1 %v7994_v1 }
 0xdc5   : > { %v3039_v25 = vpop.f32.mrb[136].mxu0 }
 0xdc6   : > { %v7036_v37 = vpop.f32.mrb[137].mxu0  ;;  %v3047_v63 = vpack.c.bf16 %v3039_v25, %v3039_v25 }
 0xdc7   : > { %v3042_v42 = vpop.f32.mrb[138].mxu0 }
 0xdc8   : > { %v7037_v55 = vpop.f32.mrb[139].mxu0 }
 0xdca   : > { %7049 = vmatmul.mubr.msk.bf16.gmra.mrb[56].mxu1 %vm2599_vm7, %v3047_v63 }
 0xdcb   : > { %7071 = vmatpush3.bf16.xpose.msra.mxu1 %v3213_v44  ;;  %7072 = vmatprep.mubr.msk.bf16.mxu1 %vm7996_vm2, %v7994_v1 }
 0xdcc   : > { %7102 = vmatprep.subr.bf16.mxu1 %v7994_v1 }
 0xdd2   : > { %7073 = vmatmul.mubr.msk.bf16.vlgmr.msra.gmra.mrb[60].mxu1 %vm2599_vm7, %v3186_v3 }
 0xdd3   : > { %7076 = vmatprep.mubr.msk.bf16.mxu1 %vm7996_vm2, %v7994_v1 }
 0xdda   : > { %7077 = vmatmul.mubr.msk.bf16.gmra.mrb[64].mxu1 %vm2599_vm7, %v3188_v27 }
 0xddb   : > { %7080 = vmatprep.mubr.msk.bf16.mxu1 %vm7996_vm2, %v7994_v1 }
 0xde2   : > { %7081 = vmatmul.mubr.msk.bf16.gmra.mrb[68].mxu1 %vm2599_vm7, %v3190_v61 }
 0xde3   : > { %7104 = vmatprep.mubr.msk.bf16.mxu1 %vm7996_vm2, %v7994_v1 }
 0xe75   : > { %v3163_v29 = vpop.f32.mrb[140].mxu0 }
 0xe76   : > { %v7056_v30 = vpop.f32.mrb[141].mxu0 }
 0xe77   : > { %v3166_v33 = vpop.f32.mrb[142].mxu0 }
 0xe78   : > { %v7057_v12 = vpop.f32.mrb[143].mxu0 }
 0xe7d   : > { %v3171_v34 = vpop.f32.mrb[144].mxu0 }
 0xe7e   : > { %v7060_v35 = vpop.f32.mrb[145].mxu0 }
 0xe7f   : > { %v3174_v17 = vpop.f32.mrb[146].mxu0 }
 0xe80   : > { %v7061_v36 = vpop.f32.mrb[147].mxu0 }
 0xe85   : > { %v3179_v38 = vpop.f32.mrb[148].mxu0 }
 0xe86   : > { %v7064_v40 = vpop.f32.mrb[149].mxu0 }
 0xe87   : > { %v3182_v2 = vpop.f32.mrb[150].mxu0 }
 0xe88   : > { %v7065_v45 = vpop.f32.mrb[151].mxu0 }
 0xe8d   : > { %v3095_v46 = vpop.f32.mrb[48].mxu1 }
 0xe8e   : > { %v9022_v47 = vadd.f32 %v3163_v29, %v3095_v46  ;;  %v7042_v49 = vpop.f32.mrb[49].mxu1 }
 0xe8f   : > { %v3098_v50 = vpop.f32.mrb[50].mxu1 }
 0xe90   : > { %v9024_v53 = vadd.f32 %v3166_v33, %v3098_v50  ;;  %v7043_v54 = vpop.f32.mrb[51].mxu1 }
 0xe95   : > { %v3103_v43 = vpop.f32.mrb[52].mxu1 }
 0xe96   : > { %v9026_v32 = vadd.f32 %v3171_v34, %v3103_v43  ;;  %v7046_v0 = vpop.f32.mrb[53].mxu1 }
 0xe97   : > { %v3106_v4 = vpop.f32.mrb[54].mxu1 }
 0xe98   : > { %v9028_v60 = vadd.f32 %v3174_v17, %v3106_v4  ;;  %v7047_v6 = vpop.f32.mrb[55].mxu1 }
 0xe9d   : > { %v3111_v7 = vpop.f32.mrb[56].mxu1 }
 0xe9e   : > { %v9030_v10 = vadd.f32 %v3179_v38, %v3111_v7  ;;  %v7050_v11 = vpop.f32.mrb[57].mxu1 }
 0xe9f   : > { %v3114_v9 = vpop.f32.mrb[58].mxu1 }
 0xea0   : > { %v7051_v13 = vpop.f32.mrb[59].mxu1 }
 0xea5   : > { %v3249_v16 = vpop.f32.mrb[60].mxu1 }
 0xea6   : > { %v3271_v18 = vmul.f32 0.35355338, %v3249_v16  ;;  %v7074_v21 = vpop.f32.mrb[61].mxu1 }
 0xea7   : > { %v3252_v5 = vpop.f32.mrb[62].mxu1 }
 0xea8   : > { %v3272_v20 = vmul.f32 0.35355338, %v3252_v5  ;;  %v7075_v22 = vpop.f32.mrb[63].mxu1  ;;  %v3276_v23 = vsel %vm2679_vm8, %v3271_v18, -inf }
 0xea9   : > { %3277 = vmax.xlane.f32.xlu1 %v3276_v23 }
 0xeaa   : > { %v3279_v24 = vsel %vm2679_vm8, %v3272_v20, -inf }
 0xeab   : > { %3280 = vmax.xlane.f32.xlu0 %v3279_v24 }
 0xead   : > { %v3257_v31 = vpop.f32.mrb[64].mxu1 }
 0xeae   : > { %v3273_v56 = vmul.f32 0.35355338, %v3257_v31  ;;  %v7078_v25 = vpop.f32.mrb[65].mxu1 }
 0xeaf   : > { %v3260_v37 = vpop.f32.mrb[66].mxu1 }
 0xeb0   : > { %v3274_v58 = vmul.f32 0.35355338, %v3260_v37  ;;  %v7079_v42 = vpop.f32.mrb[67].mxu1  ;;  %v3282_v63 = vsel %vm2679_vm8, %v3273_v56, -inf }
 0xeb1   : > { %3283 = vmax.xlane.f32.xlu0 %v3282_v63 }
 0xeb2   : > { %v3285_v55 = vsel %vm2679_vm8, %v3274_v58, -inf }
 0xeb3   : > { %3286 = vmax.xlane.f32.xlu1 %v3285_v55 }
 0xeb5   : > { %v3265_v44 = vpop.f32.mrb[68].mxu1 }
 0xeb6   : > { %v3275_v3 = vmul.f32 0.35355338, %v3265_v44  ;;  %v7082_v27 = vpop.f32.mrb[69].mxu1 }
 0xeb7   : > { %v3268_v61 = vpop.f32.mrb[70].mxu1 }
 0xeb8   : > { %v7083_v29 = vpop.f32.mrb[71].mxu1  ;;  %v3288_v30 = vsel %vm2692_vm9, %v3275_v3, -inf }
 0xeb9   : > { %3289 = vmax.xlane.f32.xlu0 %v3288_v30 }
 0xec4   : > { %3334 = vrot.lane.b32.xlu1 %v8883_v28, %s8001_s23 }
 0xf36   : > { %v3278_v33 = vpop.xlane.xlu1 %3277 }
 0xf37   : > { %v3291_v12 = vsub.f32 %v3271_v18, %v3278_v33 }
 0xf38   : > { %v3281_v34 = vpop.xlane.xlu0 %3280 }
 0xf39   : > { %v3296_v35 = vmul.f32 1.442695, %v3291_v12  ;;  %v3292_v17 = vsub.f32 %v3272_v20, %v3281_v34 }
 0xf3b   : > { %7842 = vpow2.f32 %v3296_v35  ;;  %v3298_v36 = vmul.f32 1.442695, %v3292_v17 }
 0xf3d   : > { %7844 = vpow2.f32 %v3298_v36 }
 0xf3e   : > { %v3284_v38 = vpop.xlane.xlu0 %3283 }
 0xf3f   : > { %v3293_v40 = vsub.f32 %v3273_v56, %v3284_v38  ;;  %v6327_v38 = vld [vmem:[%s9874_s8 + $0x38] sm:$0xf] }
 0xf40   : > { %v3287_v2 = vpop.xlane.xlu1 %3286 }
 0xf41   : > { %v3300_v45 = vmul.f32 1.442695, %v3293_v40  ;;  %v3294_v46 = vsub.f32 %v3274_v58, %v3287_v2  ;;  %v3423_v40 = vsel %vm3057_vm11, %v6327_v38, 0 }
 0xf42   : > { %7103 = vmatpush3.bf16.msra.mxu1 %v3423_v40 }
 0xf43   : > { %7846 = vpow2.f32 %v3300_v45  ;;  %v3302_v49 = vmul.f32 1.442695, %v3294_v46  ;;  %7134 = vmatprep.subr.bf16.mxu1 %v7994_v1 }
 0xf44   : > { %v3335_v50 = vpop.permute.xlu1 %3334 }
 0xf45   : > { %v7843_v54 = vpop.eup %7842  ;;  %7848 = vpow2.f32 %v3302_v49  ;;  %7085 = vmatpush3.bf16.msra.mxu0 %v3335_v50 }
 0xf46   : > { %v3306_v43 = vsel %vm2679_vm8, %v7843_v54, 0.0  ;;  %7086 = vmatprep.subr.bf16.mxu0 %v7994_v1  ;;  %v3290_v13 = vpop.xlane.xlu0 %3289 }
 0xf47   : > { %v7845_v0 = vpop.eup %7844  ;;  %3307 = vadd.xlane.f32.xlu1 %v3306_v43  ;;  %v3295_v16 = vsub.f32 %v3275_v3, %v3290_v13 }
 0xf48   : > { %v3309_v4 = vsel %vm2679_vm8, %v7845_v0, 0.0 }
 0xf49   : > { %3310 = vadd.xlane.f32.xlu0 %v3309_v4  ;;  %v3304_v18 = vmul.f32 1.442695, %v3295_v16 }
 0xf4b   : > { %7850 = vpow2.f32 %v3304_v18 }
 0xf4d   : > { %v7847_v6 = vpop.eup %7846 }
 0xf4e   : > { %v3312_v7 = vsel %vm2679_vm8, %v7847_v6, 0.0 }
 0xf4f   : > { %v7849_v11 = vpop.eup %7848  ;;  %3313 = vadd.xlane.f32.xlu1 %v3312_v7 }
 0xf50   : > { %v3315_v9 = vsel %vm2679_vm8, %v7849_v11, 0.0 }
 0xf51   : > { %3316 = vadd.xlane.f32.xlu0 %v3315_v9 }
 0xf55   : > { %v7851_v21 = vpop.eup %7850 }
 0xf56   : > { %v3318_v5 = vsel %vm2692_vm9, %v7851_v21, 0.0 }
 0xf60   : > { %3338 = vrot.lane.b32.xlu1 %v8893_v48, %s8001_s23 }
 0xf64   : > { %3492 = vrot.lane.b32.xlu1 %v8757_v39, %s8002_s28 }
 0xf67   : > { %3336 = vrot.lane.b32.xlu0 %v8885_v62, %s8001_s23 }
 0xf68   : > { %3494 = vrot.lane.b32.xlu1 %v8773_v52, %s8002_s28 }
 0xf6c   : > { %3486 = vrot.lane.b32.xlu1 %v8746_v19, %s8002_s28 }
 0xf70   : > { %3490 = vrot.lane.b32.xlu1 %v8771_v51, %s8002_s28 }
 0xf86   : > { %3319 = vadd.xlane.f32.xlu0 %v3318_v5 }
 0xf9c   : > { %3496 = vrot.lane.b32.xlu0 %v8787_v57, %s8002_s28 }
 0xfa0   : > { %3488 = vrot.lane.b32.xlu0 %v8748_v59, %s8002_s28 }
 0xfd4   : > { %v3308_v39 = vpop.xlane.xlu1 %3307 }
 0xfd6   : > { %v3311_v52 = vpop.xlane.xlu0 %3310 }
 0xfd7   : > { %7852 = vrcp.f32 %v3311_v52 }
 0xfd8   : > { %7854 = vrcp.f32 %v3308_v39 }
 0xfdc   : > { %v3314_v19 = vpop.xlane.xlu1 %3313 }
 0xfde   : > { %v3317_v20 = vpop.xlane.xlu0 %3316 }
 0xfdf   : > { %7856 = vrcp.f32 %v3317_v20 }
 0xfe0   : > { %7858 = vrcp.f32 %v3314_v19  ;;  %v3339_v24 = vpop.permute.xlu1 %3338 }
 0xfe1   : > { %v7853_v51 = vpop.eup %7852  ;;  %v3352_v56 = vsel %vm2748_vm10, %v3339_v24, 0 }
 0xfe2   : > { %v3337_v22 = vpop.permute.xlu0 %3336  ;;  %v7855_v23 = vpop.eup %7854  ;;  %v3327_v31 = vmul.f32 %v7853_v51, %v7845_v0 }
 0xfe3   : > { %7087 = vmatpush3.bf16.msra.mxu0 %v3337_v22  ;;  %v3326_v57 = vmul.f32 %v7855_v23, %v7843_v54 }
 0xfe4   : > { %7088 = vmatprep.subr.bf16.mxu0 %v7994_v1  ;;  %v3493_v58 = vpop.permute.xlu1 %3492 }
 0xfe5   : > { %v3331_v59 = vpack.c.bf16 %v3327_v31, %v3326_v57  ;;  %v3508_v55 = vsel %vm2599_vm7, %v3493_v58, 0 }
 0xfe7   : > { %7089 = vmatpush3.bf16.msra.mxu0 %v3352_v56 }
 0xfe8   : > { %7116 = vmatprep.subr.bf16.mxu0 %v7994_v1  ;;  %v3495_v3 = vpop.permute.xlu1 %3494 }
 0xfe9   : > { %v7857_v25 = vpop.eup %7856  ;;  %v3511_v27 = vsel %vm2599_vm7, %v3495_v3, 0 }
 0xfea   : > { %7091 = vmatmul.mubr.msk.bf16.vlgmr.msra.gmra.mrb[152].mxu0 %vm2679_vm8, %v3331_v59  ;;  %v7859_v37 = vpop.eup %7858  ;;  %v3329_v42 = vmul.f32 %v7857_v25, %v7849_v11 }
 0xfeb   : > { %7094 = vmatprep.mubr.msk.bf16.mxu0 %vm7996_vm2, %v7994_v1  ;;  %v3328_v63 = vmul.f32 %v7859_v37, %v7847_v6 }
 0xfec   : > { %v3487_v35 = vpop.permute.xlu1 %3486 }
 0xfed   : > { %v3332_v44 = vpack.c.bf16 %v3329_v42, %v3328_v63 }
 0xff0   : > { %7117 = vmatpush3.bf16.xpose.msra.mxu0 %v3508_v55  ;;  %v3491_v36 = vpop.permute.xlu1 %3490 }
 0xff1   : > { %7118 = vmatprep.subr.bf16.mxu0 %v7994_v1 }
 0xff2   : > { %7095 = vmatmul.mubr.msk.bf16.gmra.mrb[156].mxu0 %vm2679_vm8, %v3332_v44 }
 0xff3   : > { %7098 = vmatprep.mubr.msk.bf16.mxu0 %vm7996_vm2, %v7994_v1 }
 0xff8   : > { %7119 = vmatpush3.bf16.xpose.msra.mxu0 %v3511_v27 }
 0xff9   : > { %7120 = vmatprep.subr.bf16.mxu0 %v7994_v1 }
0x1013   : > { %v3320_v61 = vpop.xlane.xlu0 %3319 }
0x1014   : > { %7860 = vrcp.f32 %v3320_v61 }
0x1017   : > { %v3497_v29 = vpop.permute.xlu0 %3496 }
0x1018   : > { %v3514_v30 = vsel %vm2599_vm7, %v3497_v29, 0 }
0x1019   : > { %7121 = vmatpush3.bf16.xpose.msra.mxu0 %v3514_v30 }
0x101a   : > { %7152 = vmatprep.subr.bf16.mxu0 %v7994_v1 }
0x101b   : > { %v3489_v17 = vpop.permute.xlu0 %3488 }
0x101e   : > { %v7861_v33 = vpop.eup %7860 }
0x101f   : > { %v3330_v12 = vmul.f32 %v7861_v33, %v7851_v21 }
0x1021   : > { %v3333_v34 = vpack.c.bf16 %v3330_v12, %v3330_v12 }
0x1023   : > { %7099 = vmatmul.mubr.msk.bf16.gmra.mrb[160].mxu0 %vm2679_vm8, %v3333_v34 }
0x1024   : > { %7122 = vmatprep.mubr.msk.bf16.mxu0 %vm7996_vm2, %v7994_v1 }
0x102b   : > { %7123 = vmatmul.mubr.msk.bf16.vlgmr.msra.gmra.mrb[164].mxu0 %vm2599_vm7, %v3487_v35 }
0x102c   : > { %7126 = vmatprep.mubr.msk.bf16.mxu0 %vm7996_vm2, %v7994_v1 }
0x1033   : > { %7127 = vmatmul.mubr.msk.bf16.gmra.mrb[168].mxu0 %vm2599_vm7, %v3489_v17 }
0x1034   : > { %7130 = vmatprep.mubr.msk.bf16.mxu0 %vm7996_vm2, %v7994_v1 }
0x103b   : > { %7131 = vmatmul.mubr.msk.bf16.gmra.mrb[172].mxu0 %vm2599_vm7, %v3491_v36 }
0x103c   : > { %7154 = vmatprep.mubr.msk.bf16.mxu0 %vm7996_vm2, %v7994_v1 }
0x10bd   : > { %v3388_v2 = vpop.f32.mrb[152].mxu0 }
0x10be   : > { %v7092_v45 = vpop.f32.mrb[153].mxu0 }
0x10bf   : > { %v3391_v46 = vpop.f32.mrb[154].mxu0 }
0x10c0   : > { %v3410_v49 = vpack.c.bf16 %v3391_v46, %v3388_v2  ;;  %v7093_v50 = vpop.f32.mrb[155].mxu0 }
0x10c2   : > { %7105 = vmatmul.mubr.msk.bf16.vlgmr.msra.gmra.mrb[72].mxu1 %vm2599_vm7, %v3410_v49 }
0x10c3   : > { %7108 = vmatprep.mubr.msk.bf16.mxu1 %vm7996_vm2, %v7994_v1 }
0x10c5   : > { %v3396_v54 = vpop.f32.mrb[156].mxu0 }
0x10c6   : > { %v7096_v43 = vpop.f32.mrb[157].mxu0 }
0x10c7   : > { %v3399_v0 = vpop.f32.mrb[158].mxu0 }
0x10c8   : > { %v3411_v4 = vpack.c.bf16 %v3399_v0, %v3396_v54  ;;  %v7097_v6 = vpop.f32.mrb[159].mxu0 }
0x10ca   : > { %7109 = vmatmul.mubr.msk.bf16.gmra.mrb[76].mxu1 %vm2599_vm7, %v3411_v4 }
0x10cb   : > { %7112 = vmatprep.mubr.msk.bf16.mxu1 %vm7996_vm2, %v7994_v1 }
0x10f6   : > { %v3404_v7 = vpop.f32.mrb[160].mxu0 }
0x10f7   : > { %v3412_v11 = vpack.c.bf16 %v3404_v7, %v3404_v7  ;;  %v7100_v9 = vpop.f32.mrb[161].mxu0 }
0x10f8   : > { %v3407_v13 = vpop.f32.mrb[162].mxu0 }
0x10f9   : > { %v7101_v16 = vpop.f32.mrb[163].mxu0  ;;  %7113 = vmatmul.mubr.msk.bf16.gmra.mrb[80].mxu1 %vm2599_vm7, %v3412_v11 }
0x10fa   : > { %7140 = vmatprep.mubr.msk.bf16.mxu1 %vm7996_vm2, %v7994_v1 }
0x10fe   : > { %v3550_v18 = vpop.f32.mrb[164].mxu0 }
0x10ff   : > { %v3572_v21 = vmul.f32 0.35355338, %v3550_v18  ;;  %v7124_v5 = vpop.f32.mrb[165].mxu0 }
0x1100   : > { %v3553_v39 = vpop.f32.mrb[166].mxu0 }
0x1101   : > { %v3573_v52 = vmul.f32 0.35355338, %v3553_v39  ;;  %v7125_v19 = vpop.f32.mrb[167].mxu0  ;;  %v3577_v20 = vsel %vm2679_vm8, %v3572_v21, -inf }
0x1102   : > { %3578 = vmax.xlane.f32.xlu0 %v3577_v20 }
0x1103   : > { %v3580_v51 = vsel %vm2679_vm8, %v3573_v52, -inf }
0x1104   : > { %3581 = vmax.xlane.f32.xlu1 %v3580_v51 }
0x1106   : > { %v3558_v22 = vpop.f32.mrb[168].mxu0 }
0x1107   : > { %v3574_v23 = vmul.f32 0.35355338, %v3558_v22  ;;  %v7128_v24 = vpop.f32.mrb[169].mxu0 }
0x1108   : > { %v3561_v31 = vpop.f32.mrb[170].mxu0 }
0x1109   : > { %v3575_v57 = vmul.f32 0.35355338, %v3561_v31  ;;  %v7129_v56 = vpop.f32.mrb[171].mxu0  ;;  %v3583_v59 = vsel %vm2679_vm8, %v3574_v23, -inf }
0x110a   : > { %3584 = vmax.xlane.f32.xlu0 %v3583_v59 }
0x110b   : > { %v3586_v25 = vsel %vm2679_vm8, %v3575_v57, -inf }
0x110e   : > { %3587 = vmax.xlane.f32.xlu0 %v3586_v25  ;;  %v3566_v37 = vpop.f32.mrb[172].mxu0 }
0x110f   : > { %v3576_v58 = vmul.f32 0.35355338, %v3566_v37  ;;  %v7132_v42 = vpop.f32.mrb[173].mxu0 }
0x1110   : > { %v3569_v63 = vpop.f32.mrb[174].mxu0 }
0x1111   : > { %v7133_v55 = vpop.f32.mrb[175].mxu0  ;;  %v3589_v44 = vsel %vm2692_vm9, %v3576_v58, -inf }
0x1112   : > { %3590 = vmax.xlane.f32.xlu1 %v3589_v44 }
0x1124   : > { %3635 = vrot.lane.b32.xlu0 %v8883_v28, %s8002_s28 }
0x118f   : > { %v3579_v3 = vpop.xlane.xlu0 %3578 }
0x1190   : > { %v3592_v27 = vsub.f32 %v3572_v21, %v3579_v3 }
0x1191   : > { %v3582_v61 = vpop.xlane.xlu1 %3581 }
0x1192   : > { %v3597_v29 = vmul.f32 1.442695, %v3592_v27  ;;  %v3593_v30 = vsub.f32 %v3573_v52, %v3582_v61 }
0x1194   : > { %7862 = vpow2.f32 %v3597_v29  ;;  %v3599_v33 = vmul.f32 1.442695, %v3593_v30 }
0x1195   : > { %v3459_v12 = vpop.f32.mrb[72].mxu1 }
0x1196   : > { %7864 = vpow2.f32 %v3599_v33  ;;  %v9110_v34 = vadd.f32 %v3459_v12, %v9022_v47  ;;  %v7106_v35 = vpop.f32.mrb[73].mxu1 }
0x1197   : > { %v3462_v17 = vpop.f32.mrb[74].mxu1  ;;  %v3585_v36 = vpop.xlane.xlu0 %3584  ;;  %v6328_v35 = vld [vmem:[%s9874_s8 + $0x3c] sm:$0xf] }
0x1198   : > { %v9113_v38 = vadd.f32 %v3462_v17, %v9024_v53  ;;  %v3594_v40 = vsub.f32 %v3574_v23, %v3585_v36  ;;  %v7107_v28 = vpop.f32.mrb[75].mxu1  ;;  %v3724_v17 = vsel %vm3057_vm11, %v6328_v35, 0 }
0x1199   : > { %7153 = vmatpush3.bf16.msra.mxu0 %v3724_v17 }
0x119a   : > { %v3601_v2 = vmul.f32 1.442695, %v3594_v40  ;;  %7166 = vmatprep.subr.bf16.mxu0 %v7994_v1 }
0x119b   : > { %v3588_v45 = vpop.xlane.xlu0 %3587 }
0x119c   : > { %7866 = vpow2.f32 %v3601_v2  ;;  %v3595_v46 = vsub.f32 %v3575_v57, %v3588_v45 }
0x119d   : > { %v3467_v49 = vpop.f32.mrb[76].mxu1 }
0x119e   : > { %v7863_v50 = vpop.eup %7862  ;;  %v3603_v54 = vmul.f32 1.442695, %v3595_v46  ;;  %v9116_v43 = vadd.f32 %v3467_v49, %v9026_v32  ;;  %v7110_v47 = vpop.f32.mrb[77].mxu1  ;;  %v6365_v46 = vld [vmem:[%s9875_s9 + $0x4] ss:$0 sm:$0xff] }
0x119f   : > { %v3470_v0 = vpop.f32.mrb[78].mxu1  ;;  %v3636_v4 = vpop.permute.xlu0 %3635  ;;  %v3607_v6 = vsel %vm2679_vm8, %v7863_v50, 0.0  ;;  %v7758_v49 = vld [vmem:[%s9876_s10] ss:$8 sps:$4 sm:$0xff]  }
0x11a0   : > { %v7865_v7 = vpop.eup %7864  ;;  %7868 = vpow2.f32 %v3603_v54  ;;  %v9120_v53 = vadd.f32 %v3470_v0, %v9028_v60  ;;  %v3591_v11 = vpop.xlane.xlu1 %3590  ;;  %3608 = vadd.xlane.f32.xlu0 %v3607_v6  ;;  %7135 = vmatpush3.bf16.msra.mxu1 %v3636_v4 }
0x11a1   : > { %v7111_v9 = vpop.f32.mrb[79].mxu1  ;;  %v3596_v13 = vsub.f32 %v3576_v58, %v3591_v11  ;;  %v3610_v16 = vsel %vm2679_vm8, %v7865_v7, 0.0  ;;  %7136 = vmatprep.subr.bf16.mxu1 %v7994_v1 }
0x11a2   : > { %3611 = vadd.xlane.f32.xlu1 %v3610_v16 }
0x11a3   : > { %v3605_v32 = vmul.f32 1.442695, %v3596_v13 }
0x11a5   : > { %7870 = vpow2.f32 %v3605_v32 }
0x11a6   : > { %v7867_v18 = vpop.eup %7866 }
0x11a7   : > { %v3613_v21 = vsel %vm2679_vm8, %v7867_v18, 0.0 }
0x11a8   : > { %3614 = vadd.xlane.f32.xlu0 %v3613_v21 }
0x11aa   : > { %v7869_v5 = vpop.eup %7868 }
0x11ab   : > { %v3616_v60 = vsel %vm2679_vm8, %v7869_v5, 0.0 }
0x11ac   : > { %3617 = vadd.xlane.f32.xlu1 %v3616_v60 }
0x11af   : > { %v7871_v39 = vpop.eup %7870 }
0x11b0   : > { %v3619_v52 = vsel %vm2692_vm9, %v7871_v39, 0.0 }
0x11b1   : > { %3620 = vadd.xlane.f32.xlu1 %v3619_v52  ;;  %v7761_v52 = vld [vmem:[%s9876_s10 + $0x10] ss:$8 sps:$4 sm:$0xff]  }
0x11be   : > { %3639 = vrot.lane.b32.xlu0 %v8893_v48, %s8002_s28 }
0x11c2   : > { %3637 = vrot.lane.b32.xlu1 %v8885_v62, %s8002_s28 }
0x11c6   : > { %770 = vrot.lane.b32.xlu1 %v8164_v41, %s7997_s16 }
0x11cc   : > { %v3475_v19 = vpop.f32.mrb[80].mxu1 }
0x11cd   : > { %v9134_v20 = vadd.f32 %v3475_v19, %v9030_v10  ;;  %v7114_v51 = vpop.f32.mrb[81].mxu1  ;;  %v8003_v19 = vmov 0  }
0x11ce   : > { %v3478_v22 = vpop.f32.mrb[82].mxu1  ;;  %v9182_v51 = vld [vmem:[%s9877_s11] sm:$0xff]  }
0x11cf   : > { %v7115_v23 = vpop.f32.mrb[83].mxu1  ;;  %v9188_v22 = vld [vmem:[%s9877_s11 + $0x8] sm:$0xff]  }
0x122d   : > { %v3609_v31 = vpop.xlane.xlu0 %3608 }
0x122f   : > { %v3612_v24 = vpop.xlane.xlu1 %3611 }
0x1230   : > { %7872 = vrcp.f32 %v3612_v24 }
0x1231   : > { %7874 = vrcp.f32 %v3609_v31 }
0x1235   : > { %v3615_v56 = vpop.xlane.xlu0 %3614 }
0x1239   : > { %v3618_v57 = vpop.xlane.xlu1 %3617  ;;  %v3640_v41 = vpop.permute.xlu0 %3639 }
0x123a   : > { %7876 = vrcp.f32 %v3618_v57  ;;  %v7873_v59 = vpop.eup %7872  ;;  %v3653_v58 = vsel %vm2748_vm10, %v3640_v41, 0 }
0x123b   : > { %7878 = vrcp.f32 %v3615_v56  ;;  %v7875_v25 = vpop.eup %7874  ;;  %v3628_v37 = vmul.f32 %v7873_v59, %v7865_v7 }
0x123c   : > { %v3627_v10 = vmul.f32 %v7875_v25, %v7863_v50  ;;  %v7760_v50 = vld [vmem:[%s9876_s10 + $0x4] ss:$8 sps:$4 sm:$0xff]  }
0x123e   : > { %v3621_v48 = vpop.xlane.xlu1 %3620  ;;  %v3632_v55 = vpack.c.bf16 %v3628_v37, %v3627_v10 }
0x123f   : > { %7880 = vrcp.f32 %v3621_v48 }
0x1242   : > { %v3638_v62 = vpop.permute.xlu1 %3637 }
0x1243   : > { %7137 = vmatpush3.bf16.msra.mxu1 %v3638_v62 }
0x1244   : > { %7138 = vmatprep.subr.bf16.mxu1 %v7994_v1  ;;  %v7877_v44 = vpop.eup %7876 }
0x1245   : > { %v7879_v27 = vpop.eup %7878  ;;  %v3630_v61 = vmul.f32 %v7877_v44, %v7869_v5 }
0x1246   : > { %v771_v42 = vpop.permute.xlu1 %770  ;;  %v3629_v29 = vmul.f32 %v7879_v27, %v7867_v18 }
0x1247   : > { %v811_v63 = vadd.f32 %v8563_v8, %v771_v42  ;;  %7139 = vmatpush3.bf16.msra.mxu1 %v3653_v58 }
0x1248   : > { %v3633_v30 = vpack.c.bf16 %v3630_v61, %v3629_v29  ;;  %3858 = vmatprep.subr.bf16.mxu1 %v7760_v50 }
0x1249   : > { %v817_v3 = vsel %vm816_vm12, %v811_v63, -inf  ;;  %v7881_v33 = vpop.eup %7880 }
0x124a   : > { %7141 = vmatmul.mubr.msk.bf16.vlgmr.msra.gmra.mrb[84].mxu1 %vm2679_vm8, %v3632_v55  ;;  %818 = vmax.xlane.f32.xlu0 %v817_v3  ;;  %v3631_v8 = vmul.f32 %v7881_v33, %v7871_v39  ;;  %v7763_v39 = vld [vmem:[%s9876_s10 + $0x14] ss:$8 sps:$4 sm:$0xff]  }
0x124b   : > { %7144 = vmatprep.mubr.msk.bf16.mxu1 %vm7996_vm2, %v7994_v1  ;;  %3859 = vmatpush1.bf16.msra.mxu1 %v7758_v49 }
0x124c   : > { %v3634_v12 = vpack.c.bf16 %v3631_v8, %v3631_v8  ;;  %3860 = vmatprep.subr.bf16.mxu1 %v7763_v39 }
0x124f   : > { %3861 = vmatpush1.bf16.msra.mxu1 %v7761_v52 }
0x1250   : > { %7186 = vmatprep.subr.bf16.mxu1 %v7994_v1 }
0x1252   : > { %7145 = vmatmul.mubr.msk.bf16.gmra.mrb[88].mxu1 %vm2679_vm8, %v3633_v30 }
0x1253   : > { %7148 = vmatprep.mubr.msk.bf16.mxu1 %vm7996_vm2, %v7994_v1 }
0x125a   : > { %7149 = vmatmul.mubr.msk.bf16.gmra.mrb[92].mxu1 %vm2679_vm8, %v3634_v12 }
0x125b   : > { %3890 = vmatprep.mubr.bf16.mxu1 %v8003_v19 }
0x1260   : > { %3793 = vrot.lane.b32.xlu0 %v6365_v46, %s7997_s16  ;;  %v3817_v46 = vld [vmem:[%s9879_s13] sm:$0x3] }
0x1261   : > { %v3822_v49 = vrot.slane %v3817_v46, %v8130_v15  ;;  %v9224_v50 = vrot.slane %v3817_v46, %v980_v26 }
0x12d7   : > { %v819_v36 = vpop.xlane.xlu0 %818 }
0x12d8   : > { %v820_v40 = vsub.f32 %v811_v63, %v819_v36 }
0x12da   : > { %v821_v28 = vmul.f32 1.442695, %v820_v40 }
0x12db   : > { %v3794_v57 = vpop.permute.xlu0 %3793 }
0x12dc   : > { %7882 = vpow2.f32 %v821_v28 }
0x12e6   : > { %v7883_v2 = vpop.eup %7882 }
0x12e7   : > { %v823_v45 = vsel %vm816_vm12, %v7883_v2, 0.0 }
0x12e8   : > { %824 = vadd.xlane.f32.xlu1 %v823_v45  ;;  %v9207_v45 = vld [vmem:[%s9877_s11 + $0x10] sm:$0xff]  }
0x131d   : > { %v3689_v54 = vpop.f32.mrb[84].mxu1 }
0x131e   : > { %v7142_v47 = vpop.f32.mrb[85].mxu1 }
0x131f   : > { %v3692_v0 = vpop.f32.mrb[86].mxu1 }
0x1320   : > { %v3711_v4 = vpack.c.bf16 %v3692_v0, %v3689_v54  ;;  %v7143_v6 = vpop.f32.mrb[87].mxu1 }
0x1322   : > { %7155 = vmatmul.mubr.msk.bf16.vlgmr.msra.gmra.mrb[176].mxu0 %vm2599_vm7, %v3711_v4 }
0x1323   : > { %7158 = vmatprep.mubr.msk.bf16.mxu0 %vm7996_vm2, %v7994_v1  ;;  %7167 = vmatpush3.bf16.msra.mxu0 %v9182_v51 }
0x1324   : > { %7168 = vmatprep.subr.bf16.mxu0 %v7994_v1 }
0x1325   : > { %v3697_v7 = vpop.f32.mrb[88].mxu1 }
0x1326   : > { %v7146_v11 = vpop.f32.mrb[89].mxu1 }
0x1327   : > { %v3700_v9 = vpop.f32.mrb[90].mxu1  ;;  %7169 = vmatpush3.bf16.msra.mxu0 %v9188_v22 }
0x1328   : > { %v3712_v13 = vpack.c.bf16 %v3700_v9, %v3697_v7  ;;  %v7147_v16 = vpop.f32.mrb[91].mxu1  ;;  %7170 = vmatprep.subr.bf16.mxu0 %v7994_v1 }
0x132a   : > { %7159 = vmatmul.mubr.msk.bf16.gmra.mrb[180].mxu0 %vm2599_vm7, %v3712_v13 }
0x132b   : > { %7162 = vmatprep.mubr.msk.bf16.mxu0 %vm7996_vm2, %v7994_v1  ;;  %7171 = vmatpush3.bf16.msra.mxu0 %v9207_v45 }
0x132c   : > { %7172 = vmatprep.subr.bf16.mxu0 %v7994_v1 }
0x132d   : > { %v3705_v32 = vpop.f32.mrb[92].mxu1 }
0x132e   : > { %v7150_v18 = vpop.f32.mrb[93].mxu1  ;;  %v3713_v5 = vpack.c.bf16 %v3705_v32, %v3705_v32 }
0x132f   : > { %v3708_v21 = vpop.f32.mrb[94].mxu1 }
0x1330   : > { %v7151_v60 = vpop.f32.mrb[95].mxu1 }
0x1332   : > { %7163 = vmatmul.mubr.msk.bf16.gmra.mrb[184].mxu0 %vm2599_vm7, %v3713_v5 }
0x1333   : > { %7174 = vmatprep.mubr.msk.bf16.mxu0 %vm7996_vm2, %v7994_v1 }
0x1375   : > { %v825_v23 = vpop.xlane.xlu1 %824 }
0x1376   : > { %7884 = vrcp.f32 %v825_v23 }
0x1380   : > { %v7885_v24 = vpop.eup %7884 }
0x1381   : > { %v827_v56 = vmul.f32 %v7885_v24, %v7883_v2 }
0x1383   : > { %v3804_v10 = vrot.slane %v827_v56, %v8130_v15 }
0x13f5   : > { %v3760_v31 = vpop.f32.mrb[176].mxu0 }
0x13f6   : > { %v3782_v48 = vadd.f32 %v3760_v31, %v9110_v34  ;;  %v7156_v59 = vpop.f32.mrb[177].mxu0 }
0x13f7   : > { %v3763_v62 = vpop.f32.mrb[178].mxu0 }
0x13f8   : > { %v3796_v25 = vadd.f32 %v3794_v57, %v3782_v48  ;;  %v3783_v41 = vadd.f32 %v3763_v62, %v9113_v38  ;;  %v7157_v37 = vpop.f32.mrb[179].mxu0  ;;  %v7770_v62 = vld [vmem:[%s9877_s11 + $0x30] sm:$0xff]  }
0x13fa   : > { %v3797_v58 = vadd.f32 %v3794_v57, %v3783_v41  ;;  %v3805_v42 = vmul.f32 %v3804_v10, %v3796_v25 }
0x13fc   : > { %v3806_v63 = vmul.f32 %v3804_v10, %v3797_v58 }
0x13fd   : > { %v3768_v55 = vpop.f32.mrb[180].mxu0 }
0x13fe   : > { %v3810_v44 = vpack.c.bf16 %v3806_v63, %v3805_v42  ;;  %v3784_v3 = vadd.f32 %v3768_v55, %v9116_v43  ;;  %v7160_v27 = vpop.f32.mrb[181].mxu0  ;;  %v7771_v63 = vld [vmem:[%s9877_s11 + $0x38] sm:$0xff]  }
0x13ff   : > { %v3771_v61 = vpop.f32.mrb[182].mxu0  ;;  %v7773_v27 = vld [vmem:[%s9877_s11 + $0x48] sm:$0xff]  }
0x1400   : > { %v3798_v29 = vadd.f32 %v3794_v57, %v3784_v3  ;;  %v3785_v34 = vadd.f32 %v3771_v61, %v9120_v53  ;;  %v7161_v30 = vpop.f32.mrb[183].mxu0  ;;  %6370 = vmatmul.mubr.msk.bf16.vlgmr.msra.gmra.mrb[96].mxu1 %vm719_vm5, %v3810_v44  ;;  %v7774_v61 = vld [vmem:[%s9877_s11 + $0x50] sm:$0xff]  }
0x1401   : > { %3900 = vmatprep.mubr.bf16.mxu1 %v8003_v19 }
0x1402   : > { %v3799_v38 = vadd.f32 %v3794_v57, %v3785_v34  ;;  %v3807_v33 = vmul.f32 %v3804_v10, %v3798_v29  ;;  %v7775_v29 = vld [vmem:[%s9877_s11 + $0x58] sm:$0xff]   ;;  %v9299_v34 = vld [vmem:[%s9879_s13 + $0x2] ss:$0 sm:$0xff] }
0x1404   : > { %v3808_v8 = vmul.f32 %v3804_v10, %v3799_v38 }
0x1405   : > { %v3776_v12 = vpop.f32.mrb[184].mxu0 }
0x1406   : > { %v3811_v35 = vpack.c.bf16 %v3808_v8, %v3807_v33  ;;  %v3786_v17 = vadd.f32 %v3776_v12, %v9134_v20  ;;  %v7164_v36 = vpop.f32.mrb[185].mxu0  ;;  %v9214_v20 = vld [vmem:[%s9877_s11 + $0x18] sm:$0xff]  }
0x1407   : > { %v3779_v40 = vpop.f32.mrb[186].mxu0  ;;  %7173 = vmatpush3.bf16.msra.mxu0 %v9214_v20 }
0x1408   : > { %v3800_v28 = vadd.f32 %v3794_v57, %v3786_v17  ;;  %v7165_v43 = vpop.f32.mrb[187].mxu0  ;;  %6371 = vmatmul.mubr.msk.bf16.gmra.mrb[100].mxu1 %vm719_vm5, %v3811_v35  ;;  %7206 = vmatprep.subr.bf16.mxu0 %v7994_v1 }
0x1409   : > { %3910 = vmatprep.mubr.bf16.mxu1 %v8003_v19  ;;  %v7769_v19 = vld [vmem:[%s9877_s11 + $0x28] sm:$0xff]  }
0x140a   : > { %v3809_v2 = vmul.f32 %v3804_v10, %v3800_v28 }
0x140c   : > { %v3812_v53 = vpack.c.bf16 %v3809_v2, %v3809_v2 }
0x1410   : > { %6372 = vmatmul.mubr.msk.bf16.gmra.mrb[104].mxu1 %vm719_vm5, %v3812_v53 }
0x1411   : > { %7194 = vmatprep.mubr.msk.bf16.mxu1 %vm7996_vm2, %v7994_v1 }
0x14d3   : > { %v3892_v54 = vpop.f32.mrb[96].mxu1 }
0x14d4   : > { %v3893_v47 = vadd.f32 %v3892_v54, %v3822_v49  ;;  %v3894_v0 = vpop.f32.mrb[97].mxu1 }
0x14d5   : > { %v3895_v4 = vadd.f32 %v3894_v0, %v9224_v50  ;;  %v3896_v6 = vpop.f32.mrb[98].mxu1 }
0x14d6   : > { %v3897_v7 = vadd.f32 %v3896_v6, %v3822_v49  ;;  %v3898_v11 = vpop.f32.mrb[99].mxu1  ;;  %v3919_v13 = vmax.f32 %v3893_v47, 0.0 }
0x14d7   : > { %v3899_v9 = vadd.f32 %v3898_v11, %v9224_v50  ;;  %v3920_v32 = vmax.f32 %v3895_v4, 0.0 }
0x14d8   : > { %v3921_v16 = vmax.f32 %v3897_v7, 0.0 }
0x14d9   : > { %v3922_v18 = vmax.f32 %v3899_v9, 0.0 }
0x14da   : > { %v3929_v15 = vpack.c.bf16 %v3921_v16, %v3919_v13 }
0x14db   : > { %v9231_v26 = vpack.c.bf16 %v3922_v18, %v3920_v32  ;;  %v3902_v21 = vpop.f32.mrb[100].mxu1 }
0x14dc   : > { %v3903_v5 = vadd.f32 %v3902_v21, %v3822_v49  ;;  %4149 = vrot.lane.b32.xlu1 %v3929_v15, %s7997_s16  ;;  %v3904_v60 = vpop.f32.mrb[101].mxu1  ;;  %7175 = vmatmul.mubr.msk.bf16.vlgmr.msra.gmra.mrb[188].mxu0 %vm591_vm4, %v3929_v15 }
0x14dd   : > { %v3905_v39 = vadd.f32 %v3904_v60, %v9224_v50  ;;  %v3906_v52 = vpop.f32.mrb[102].mxu1  ;;  %7178 = vmatprep.mubr.msk.bf16.mxu0 %vm7996_vm2, %v7994_v1  ;;  %7207 = vmatpush3.bf16.msra.mxu0 %v7768_v14 }
0x14de   : > { %v3907_v23 = vadd.f32 %v3906_v52, %v3822_v49  ;;  %v3908_v24 = vpop.f32.mrb[103].mxu1  ;;  %7208 = vmatprep.subr.bf16.mxu0 %v7994_v1  ;;  %v3923_v57 = vmax.f32 %v3903_v5, 0.0 }
0x14df   : > { %v3909_v31 = vadd.f32 %v3908_v24, %v9224_v50  ;;  %v3924_v48 = vmax.f32 %v3905_v39, 0.0  ;;  %v9349_v24 = vld [vmem:[%s9879_s13 + $0x3] ss:$0 sm:$0xff] }
0x14e0   : > { %v3925_v56 = vmax.f32 %v3907_v23, 0.0 }
0x14e1   : > { %v3926_v59 = vmax.f32 %v3909_v31, 0.0  ;;  %7209 = vmatpush3.bf16.msra.mxu0 %v7769_v19 }
0x14e2   : > { %v3930_v25 = vpack.c.bf16 %v3925_v56, %v3923_v57  ;;  %7210 = vmatprep.subr.bf16.mxu0 %v7994_v1 }
0x14e3   : > { %v9247_v41 = vpack.c.bf16 %v3926_v59, %v3924_v48  ;;  %v3912_v37 = vpop.f32.mrb[104].mxu1 }
0x14e4   : > { %v3913_v10 = vadd.f32 %v3912_v37, %v3822_v49  ;;  %4151 = vrot.lane.b32.xlu0 %v3930_v25, %s7997_s16  ;;  %v9250_v58 = vpop.f32.mrb[105].mxu1  ;;  %7179 = vmatmul.mubr.msk.bf16.gmra.mrb[192].mxu0 %vm591_vm4, %v3930_v25 }
0x14e5   : > { %v3916_v42 = vpop.f32.mrb[106].mxu1  ;;  %7182 = vmatprep.mubr.msk.bf16.mxu0 %vm7996_vm2, %v7994_v1  ;;  %7211 = vmatpush3.bf16.msra.mxu0 %v7770_v62  ;;  %v3915_v36 = vadd.f32 %v9250_v58, %v9224_v50 }
0x14e6   : > { %v3927_v55 = vmax.f32 %v3913_v10, 0.0  ;;  %v3917_v44 = vpop.f32.mrb[107].mxu1  ;;  %7212 = vmatprep.subr.bf16.mxu0 %v7994_v1 }
0x14e7   : > { %v3928_v40 = vmax.f32 %v3915_v36, 0.0 }
0x14e8   : > { %v3931_v3 = vpack.c.bf16 %v3927_v55, %v3927_v55  ;;  %4053 = vrot.lane.b32.xlu0 %v9182_v51, %s7997_s16  ;;  %v6373_v51 = vld [vmem:[%s9879_s13 + $0x1] ss:$0 sm:$0xff] }
0x14e9   : > { %7213 = vmatpush3.bf16.msra.mxu0 %v7771_v63  ;;  %v4334_v28 = vpack.c.bf16 %v3928_v40, %v3928_v40 }
0x14ea   : > { %4153 = vrot.lane.b32.xlu1 %v3931_v3, %s7997_s16  ;;  %7246 = vmatprep.subr.bf16.mxu0 %v7994_v1 }
0x14ec   : > { %7183 = vmatmul.mubr.msk.bf16.gmra.mrb[196].mxu0 %vm591_vm4, %v3931_v3  ;;  %4057 = vrot.lane.b32.xlu0 %v9207_v45, %s7997_s16 }
0x14ed   : > { %7214 = vmatprep.mubr.msk.bf16.mxu0 %vm7996_vm2, %v7994_v1 }
0x14ee   : > { %4055 = vrot.lane.b32.xlu1 %v9188_v22, %s7997_s16  ;;  %v7772_v22 = vld [vmem:[%s9877_s11 + $0x40] sm:$0xff]  }
0x14f0   : > { %4059 = vrot.lane.b32.xlu0 %v9214_v20, %s7997_s16 }
0x14f2   : > { %3971 = vrot.lane.b32.xlu1 %v6373_v51, %s7997_s16 }
0x14f4   : > { %4254 = vrot.lane.b32.xlu0 %v7769_v19, %s7997_s16 }
0x14f6   : > { %4252 = vrot.lane.b32.xlu1 %v7768_v14, %s7997_s16 }
0x14f8   : > { %4258 = vrot.lane.b32.xlu0 %v7771_v63, %s7997_s16 }
0x14fa   : > { %4256 = vrot.lane.b32.xlu1 %v7770_v62, %s7997_s16 }
0x14fc   : > { %4446 = vrot.lane.b32.xlu0 %v7773_v27, %s7997_s16 }
0x14fe   : > { %4444 = vrot.lane.b32.xlu1 %v7772_v22, %s7997_s16 }
0x1500   : > { %4368 = vrot.lane.b32.xlu0 %v9299_v34, %s7997_s16 }
0x1502   : > { %4448 = vrot.lane.b32.xlu1 %v7774_v61, %s7997_s16 }
0x1504   : > { %4456 = vrot.lane.b32.xlu0 %v9349_v24, %s7997_s16 }
0x1506   : > { %4450 = vrot.lane.b32.xlu1 %v7775_v29, %s7997_s16 }
0x154e   : > { %v4150_v30 = vpop.permute.xlu1 %4149 }
0x154f   : > { %7215 = vmatmul.mubr.msk.bf16.vlgmr.msra.gmra.mrb[200].mxu0 %vm591_vm4, %v4150_v30 }
0x1550   : > { %7218 = vmatprep.mubr.msk.bf16.mxu0 %vm7996_vm2, %v7994_v1  ;;  %7247 = vmatpush3.bf16.msra.mxu0 %v7772_v22 }
0x1551   : > { %7248 = vmatprep.subr.bf16.mxu0 %v7994_v1 }
0x1554   : > { %7249 = vmatpush3.bf16.msra.mxu0 %v7773_v27 }
0x1555   : > { %7250 = vmatprep.subr.bf16.mxu0 %v7994_v1 }
0x1556   : > { %v4152_v38 = vpop.permute.xlu0 %4151 }
0x1557   : > { %7219 = vmatmul.mubr.msk.bf16.gmra.mrb[204].mxu0 %vm591_vm4, %v4152_v38 }
0x1558   : > { %7222 = vmatprep.mubr.msk.bf16.mxu0 %vm7996_vm2, %v7994_v1  ;;  %7251 = vmatpush3.bf16.msra.mxu0 %v7774_v61 }
0x1559   : > { %7252 = vmatprep.subr.bf16.mxu0 %v7994_v1 }
0x155a   : > { %v4054_v33 = vpop.permute.xlu0 %4053 }
0x155b   : > { %7187 = vmatpush3.bf16.msra.mxu1 %v4054_v33 }
0x155c   : > { %v4154_v8 = vpop.permute.xlu1 %4153  ;;  %7253 = vmatpush3.bf16.msra.mxu0 %v7775_v29  ;;  %7188 = vmatprep.subr.bf16.mxu1 %v7994_v1 }
0x155d   : > { %7286 = vmatprep.subr.bf16.mxu0 %v7994_v1 }
0x155e   : > { %v4058_v35 = vpop.permute.xlu0 %4057 }
0x155f   : > { %7223 = vmatmul.mubr.msk.bf16.gmra.mrb[208].mxu0 %vm591_vm4, %v4154_v8 }
0x1560   : > { %7254 = vmatprep.mubr.msk.bf16.mxu0 %vm7996_vm2, %v7994_v1  ;;  %v4056_v12 = vpop.permute.xlu1 %4055 }
0x1561   : > { %7189 = vmatpush3.bf16.msra.mxu1 %v4056_v12 }
0x1562   : > { %7190 = vmatprep.subr.bf16.mxu1 %v7994_v1  ;;  %v4060_v17 = vpop.permute.xlu0 %4059 }
0x1564   : > { %v3972_v43 = vpop.permute.xlu1 %3971 }
0x1565   : > { %7191 = vmatpush3.bf16.msra.mxu1 %v4058_v35 }
0x1566   : > { %7192 = vmatprep.subr.bf16.mxu1 %v7994_v1  ;;  %v4255_v16 = vpop.permute.xlu0 %4254 }
0x1567   : > { %7255 = vmatmul.mubr.msk.bf16.vlgmr.msra.gmra.mrb[212].mxu0 %vm591_vm4, %v9231_v26 }
0x1568   : > { %7258 = vmatprep.mubr.msk.bf16.mxu0 %vm7996_vm2, %v7994_v1  ;;  %v4253_v0 = vpop.permute.xlu1 %4252 }
0x1569   : > { %7193 = vmatpush3.bf16.msra.mxu1 %v4060_v17 }
0x156a   : > { %7226 = vmatprep.subr.bf16.mxu1 %v7994_v1  ;;  %v4259_v19 = vpop.permute.xlu0 %4258 }
0x156c   : > { %v4257_v15 = vpop.permute.xlu1 %4256 }
0x156e   : > { %v4447_v51 = vpop.permute.xlu0 %4446 }
0x156f   : > { %7259 = vmatmul.mubr.msk.bf16.gmra.mrb[216].mxu0 %vm591_vm4, %v9247_v41 }
0x1570   : > { %7262 = vmatprep.mubr.msk.bf16.mxu0 %vm7996_vm2, %v7994_v1  ;;  %v4445_v10 = vpop.permute.xlu1 %4444 }
0x1572   : > { %v4369_v36 = vpop.permute.xlu0 %4368 }
0x1574   : > { %v4449_v61 = vpop.permute.xlu1 %4448 }
0x1577   : > { %7263 = vmatmul.mubr.msk.bf16.gmra.mrb[220].mxu0 %vm591_vm4, %v4334_v28 }
0x1578   : > { %7290 = vmatprep.mubr.msk.bf16.mxu0 %vm7996_vm2, %v7994_v1  ;;  %v4451_v17 = vpop.permute.xlu1 %4450 }
0x15af   : > { %v4017_v2 = vpop.f32.mrb[188].mxu0 }
0x15b0   : > { %v4018_v53 = vadd.f32 %v4017_v2, %v3972_v43  ;;  %v7176_v45 = vpop.f32.mrb[189].mxu0 }
0x15b1   : > { %v4020_v20 = vpop.f32.mrb[190].mxu0 }
0x15b2   : > { %v4021_v46 = vadd.f32 %v4020_v20, %v3972_v43  ;;  %v7177_v49 = vpop.f32.mrb[191].mxu0  ;;  %v4039_v50 = vmax.f32 %v4018_v53, 0.0 }
0x15b3   : > { %v7776_v49 = vld [vmem:[%s9878_s12 + $0x10] sm:$0xff]  }
0x15b4   : > { %v4040_v54 = vmax.f32 %v4021_v46, 0.0 }
0x15b6   : > { %v4044_v47 = vpack.c.bf16 %v4040_v54, %v4039_v50 }
0x15b7   : > { %v4025_v4 = vpop.f32.mrb[192].mxu0 }
0x15b8   : > { %v4026_v6 = vadd.f32 %v4025_v4, %v3972_v43  ;;  %v7180_v7 = vpop.f32.mrb[193].mxu0  ;;  %7195 = vmatmul.mubr.msk.bf16.vlgmr.msra.gmra.mrb[108].mxu1 %vm591_vm4, %v4044_v47 }
0x15b9   : > { %v4028_v11 = vpop.f32.mrb[194].mxu0  ;;  %7198 = vmatprep.mubr.msk.bf16.mxu1 %vm7996_vm2, %v7994_v1  ;;  %7227 = vmatpush3.bf16.msra.mxu1 %v4253_v0 }
0x15ba   : > { %v4029_v9 = vadd.f32 %v4028_v11, %v3972_v43  ;;  %v7181_v13 = vpop.f32.mrb[195].mxu0  ;;  %7228 = vmatprep.subr.bf16.mxu1 %v7994_v1  ;;  %v4041_v32 = vmax.f32 %v4026_v6, 0.0  ;;  %v7777_v6 = vld [vmem:[%s9878_s12 + $0x18] sm:$0xff]  }
0x15bc   : > { %v4042_v18 = vmax.f32 %v4029_v9, 0.0 }
0x15bd   : > { %7229 = vmatpush3.bf16.msra.mxu1 %v4255_v16 }
0x15be   : > { %v4045_v14 = vpack.c.bf16 %v4042_v18, %v4041_v32  ;;  %7230 = vmatprep.subr.bf16.mxu1 %v7994_v1 }
0x15bf   : > { %v4033_v26 = vpop.f32.mrb[196].mxu0 }
0x15c0   : > { %v4034_v21 = vadd.f32 %v4033_v26, %v3972_v43  ;;  %v7184_v5 = vpop.f32.mrb[197].mxu0  ;;  %7199 = vmatmul.mubr.msk.bf16.gmra.mrb[112].mxu1 %vm591_vm4, %v4045_v14 }
0x15c1   : > { %v4036_v60 = vpop.f32.mrb[198].mxu0  ;;  %7202 = vmatprep.mubr.msk.bf16.mxu1 %vm7996_vm2, %v7994_v1  ;;  %7231 = vmatpush3.bf16.msra.mxu1 %v4257_v15 }
0x15c2   : > { %v4043_v39 = vmax.f32 %v4034_v21, 0.0  ;;  %v7185_v52 = vpop.f32.mrb[199].mxu0  ;;  %7232 = vmatprep.subr.bf16.mxu1 %v7994_v1 }
0x15c4   : > { %v4046_v23 = vpack.c.bf16 %v4043_v39, %v4043_v39 }
0x15c5   : > { %7233 = vmatpush3.bf16.msra.mxu1 %v4259_v19 }
0x15c6   : > { %7266 = vmatprep.subr.bf16.mxu1 %v7994_v1 }
0x15c8   : > { %7203 = vmatmul.mubr.msk.bf16.gmra.mrb[116].mxu1 %vm591_vm4, %v4046_v23 }
0x15c9   : > { %7234 = vmatprep.mubr.msk.bf16.mxu1 %vm7996_vm2, %v7994_v1 }
0x1622   : > { %v4222_v31 = vpop.f32.mrb[200].mxu0 }
0x1623   : > { %v4223_v57 = vadd.f32 %v9299_v34, %v4222_v31  ;;  %v7216_v56 = vpop.f32.mrb[201].mxu0 }
0x1624   : > { %v4225_v48 = vpop.f32.mrb[202].mxu0 }
0x1625   : > { %v4226_v59 = vadd.f32 %v9299_v34, %v4225_v48  ;;  %v7217_v62 = vpop.f32.mrb[203].mxu0  ;;  %v4244_v25 = vmax.f32 %v4223_v57, 0.0 }
0x1627   : > { %v4245_v41 = vmax.f32 %v4226_v59, 0.0 }
0x1629   : > { %v4249_v37 = vpack.c.bf16 %v4245_v41, %v4244_v25 }
0x162a   : > { %v4230_v58 = vpop.f32.mrb[204].mxu0 }
0x162b   : > { %v4231_v42 = vadd.f32 %v9299_v34, %v4230_v58  ;;  %v7220_v63 = vpop.f32.mrb[205].mxu0  ;;  %7235 = vmatmul.mubr.msk.bf16.vlgmr.msra.gmra.mrb[120].mxu1 %vm591_vm4, %v4249_v37 }
0x162c   : > { %v4233_v55 = vpop.f32.mrb[206].mxu0  ;;  %7238 = vmatprep.mubr.msk.bf16.mxu1 %vm7996_vm2, %v7994_v1  ;;  %7267 = vmatpush3.bf16.msra.mxu1 %v4445_v10 }
0x162d   : > { %v4234_v44 = vadd.f32 %v9299_v34, %v4233_v55  ;;  %v7221_v3 = vpop.f32.mrb[207].mxu0  ;;  %7268 = vmatprep.subr.bf16.mxu1 %v7994_v1  ;;  %v4246_v27 = vmax.f32 %v4231_v42, 0.0 }
0x162f   : > { %v4247_v22 = vmax.f32 %v4234_v44, 0.0 }
0x1630   : > { %7269 = vmatpush3.bf16.msra.mxu1 %v4447_v51 }
0x1631   : > { %v4250_v29 = vpack.c.bf16 %v4247_v22, %v4246_v27  ;;  %7270 = vmatprep.subr.bf16.mxu1 %v7994_v1 }
0x1632   : > { %v4238_v30 = vpop.f32.mrb[208].mxu0 }
0x1633   : > { %v4239_v38 = vadd.f32 %v9299_v34, %v4238_v30  ;;  %v7224_v33 = vpop.f32.mrb[209].mxu0  ;;  %7239 = vmatmul.mubr.msk.bf16.gmra.mrb[124].mxu1 %vm591_vm4, %v4250_v29 }
0x1634   : > { %v4241_v8 = vpop.f32.mrb[210].mxu0  ;;  %7242 = vmatprep.mubr.msk.bf16.mxu1 %vm7996_vm2, %v7994_v1  ;;  %7271 = vmatpush3.bf16.msra.mxu1 %v4449_v61 }
0x1635   : > { %v4248_v12 = vmax.f32 %v4239_v38, 0.0  ;;  %v7225_v35 = vpop.f32.mrb[211].mxu0  ;;  %7272 = vmatprep.subr.bf16.mxu1 %v7994_v1 }
0x1637   : > { %v4251_v40 = vpack.c.bf16 %v4248_v12, %v4248_v12 }
0x1638   : > { %7273 = vmatpush3.bf16.msra.mxu1 %v4451_v17 }
0x1639   : > { %7302 = vmatprep.subr.bf16.mxu1 %v7994_v1 }
0x163a   : > { %v4414_v28 = vpop.f32.mrb[212].mxu0 }
0x163b   : > { %v4415_v34 = vadd.f32 %v4414_v28, %v4369_v36  ;;  %7243 = vmatmul.mubr.msk.bf16.gmra.mrb[128].mxu1 %vm591_vm4, %v4251_v40  ;;  %v7256_v43 = vpop.f32.mrb[213].mxu0 }
0x163c   : > { %v4417_v2 = vpop.f32.mrb[214].mxu0  ;;  %7274 = vmatprep.mubr.msk.bf16.mxu1 %vm7996_vm2, %v7994_v1  ;;  %v4457_v43 = vpop.permute.xlu0 %4456 }
0x163d   : > { %v4418_v53 = vadd.f32 %v4417_v2, %v4369_v36  ;;  %v7257_v45 = vpop.f32.mrb[215].mxu0  ;;  %v4436_v20 = vmax.f32 %v4415_v34, 0.0 }
0x163f   : > { %v4437_v46 = vmax.f32 %v4418_v53, 0.0 }
0x1641   : > { %v4441_v50 = vpack.c.bf16 %v4437_v46, %v4436_v20 }
0x1642   : > { %v4422_v54 = vpop.f32.mrb[216].mxu0 }
0x1643   : > { %v4423_v47 = vadd.f32 %v4422_v54, %v4369_v36  ;;  %v7260_v0 = vpop.f32.mrb[217].mxu0  ;;  %7275 = vmatmul.mubr.msk.bf16.vlgmr.msra.gmra.mrb[132].mxu1 %vm591_vm4, %v4441_v50 }
0x1644   : > { %v4425_v4 = vpop.f32.mrb[218].mxu0  ;;  %7278 = vmatprep.mubr.msk.bf16.mxu1 %vm7996_vm2, %v7994_v1  ;;  %7303 = vmatpush3.bf16.msra.mxu1 %v7776_v49 }
0x1645   : > { %v4426_v7 = vadd.f32 %v4425_v4, %v4369_v36  ;;  %v7261_v11 = vpop.f32.mrb[219].mxu0  ;;  %7304 = vmatprep.subr.bf16.mxu1 %v7994_v1  ;;  %v4438_v9 = vmax.f32 %v4423_v47, 0.0 }
0x1647   : > { %v4439_v13 = vmax.f32 %v4426_v7, 0.0 }
0x1648   : > { %7305 = vmatpush3.bf16.msra.mxu1 %v7777_v6 }
0x1649   : > { %v4442_v16 = vpack.c.bf16 %v4439_v13, %v4438_v9  ;;  %7334 = vmatprep.subr.bf16.mxu1 %v7994_v1 }
0x164a   : > { %v4430_v32 = vpop.f32.mrb[220].mxu0 }
0x164b   : > { %v4431_v18 = vadd.f32 %v4430_v32, %v4369_v36  ;;  %v7264_v14 = vpop.f32.mrb[221].mxu0  ;;  %7279 = vmatmul.mubr.msk.bf16.gmra.mrb[136].mxu1 %vm591_vm4, %v4442_v16 }
0x164c   : > { %v4433_v15 = vpop.f32.mrb[222].mxu0  ;;  %7282 = vmatprep.mubr.msk.bf16.mxu1 %vm7996_vm2, %v7994_v1 }
0x164d   : > { %v4440_v26 = vmax.f32 %v4431_v18, 0.0  ;;  %v7265_v21 = vpop.f32.mrb[223].mxu0 }
0x164e   : > { %v9420_v21 = vld [vmem:[%s9879_s13 + $0x4] ss:$0 sm:$0xff] }
0x164f   : > { %v4443_v5 = vpack.c.bf16 %v4440_v26, %v4440_v26 }
0x1653   : > { %7283 = vmatmul.mubr.msk.bf16.gmra.mrb[140].mxu1 %vm591_vm4, %v4443_v5 }
0x1654   : > { %7306 = vmatprep.mubr.msk.bf16.mxu1 %vm7996_vm2, %v7994_v1 }
0x168b   : > { %v4108_v60 = vpop.f32.mrb[108].mxu1 }
0x168c   : > { %v4109_v39 = vadd.f32 %v9349_v24, %v4108_v60  ;;  %v7196_v52 = vpop.f32.mrb[109].mxu1 }
0x168d   : > { %v4111_v19 = vpop.f32.mrb[110].mxu1 }
0x168e   : > { %v4112_v23 = vadd.f32 %v9349_v24, %v4111_v19  ;;  %v7197_v31 = vpop.f32.mrb[111].mxu1  ;;  %v4524_v57 = vmax.f32 %v4109_v39, 0.0 }
0x1690   : > { %v4525_v56 = vmax.f32 %v4112_v23, 0.0 }
0x1692   : > { %v4680_v48 = vpack.c.bf16 %v4525_v56, %v4524_v57 }
0x1693   : > { %v4116_v59 = vpop.f32.mrb[112].mxu1 }
0x1694   : > { %v4117_v62 = vadd.f32 %v9349_v24, %v4116_v59  ;;  %v7200_v25 = vpop.f32.mrb[113].mxu1  ;;  %7307 = vmatmul.mubr.msk.bf16.vlgmr.msra.gmra.mrb[144].mxu1 %vm719_vm5, %v4680_v48 }
0x1695   : > { %v4119_v41 = vpop.f32.mrb[114].mxu1  ;;  %7310 = vmatprep.mubr.msk.bf16.mxu1 %vm7996_vm2, %v7994_v1 }
0x1696   : > { %v4120_v37 = vadd.f32 %v9349_v24, %v4119_v41  ;;  %v7201_v10 = vpop.f32.mrb[115].mxu1  ;;  %v4526_v58 = vmax.f32 %v4117_v62, 0.0 }
0x1698   : > { %v4527_v42 = vmax.f32 %v4120_v37, 0.0 }
0x169a   : > { %v4681_v63 = vpack.c.bf16 %v4527_v42, %v4526_v58 }
0x169b   : > { %v4124_v55 = vpop.f32.mrb[116].mxu1 }
0x169c   : > { %v4125_v44 = vadd.f32 %v9349_v24, %v4124_v55  ;;  %v7204_v3 = vpop.f32.mrb[117].mxu1  ;;  %7311 = vmatmul.mubr.msk.bf16.gmra.mrb[148].mxu1 %vm719_vm5, %v4681_v63 }
0x169d   : > { %v4127_v51 = vpop.f32.mrb[118].mxu1  ;;  %7314 = vmatprep.mubr.msk.bf16.mxu1 %vm7996_vm2, %v7994_v1 }
0x169e   : > { %v4528_v27 = vmax.f32 %v4125_v44, 0.0  ;;  %v7205_v22 = vpop.f32.mrb[119].mxu1 }
0x16a0   : > { %v4682_v61 = vpack.c.bf16 %v4528_v27, %v4528_v27 }
0x16a4   : > { %7315 = vmatmul.mubr.msk.bf16.gmra.mrb[152].mxu1 %vm719_vm5, %v4682_v61 }
0x16a5   : > { %7340 = vmatprep.mubr.msk.bf16.mxu1 %vm7996_vm2, %v7994_v1 }
0x16fe   : > { %v9402_v29 = vpop.f32.mrb[120].mxu1 }
0x16ff   : > { %v7236_v30 = vpop.f32.mrb[121].mxu1 }
0x1700   : > { %v9404_v38 = vpop.f32.mrb[122].mxu1 }
0x1701   : > { %v7237_v33 = vpop.f32.mrb[123].mxu1 }
0x1706   : > { %v9406_v8 = vpop.f32.mrb[124].mxu1 }
0x1707   : > { %v7240_v12 = vpop.f32.mrb[125].mxu1 }
0x1708   : > { %v9408_v35 = vpop.f32.mrb[126].mxu1 }
0x1709   : > { %v7241_v17 = vpop.f32.mrb[127].mxu1 }
0x170e   : > { %v9410_v36 = vpop.f32.mrb[128].mxu1 }
0x170f   : > { %v7244_v40 = vpop.f32.mrb[129].mxu1 }
0x1710   : > { %v4329_v28 = vpop.f32.mrb[130].mxu1 }
0x1711   : > { %v7245_v34 = vpop.f32.mrb[131].mxu1 }
0x1716   : > { %v4502_v2 = vpop.f32.mrb[132].mxu1 }
0x1717   : > { %v4503_v53 = vadd.f32 %v4502_v2, %v4457_v43  ;;  %v7276_v45 = vpop.f32.mrb[133].mxu1 }
0x1718   : > { %v4505_v20 = vpop.f32.mrb[134].mxu1 }
0x1719   : > { %v4506_v46 = vadd.f32 %v4505_v20, %v4457_v43  ;;  %v7277_v49 = vpop.f32.mrb[135].mxu1  ;;  %v4534_v50 = vsel %vm719_vm5, %v4503_v53, -inf }
0x171a   : > { %4535 = vmax.xlane.f32.xlu1 %v4534_v50 }
0x171b   : > { %v4537_v54 = vsel %vm719_vm5, %v4506_v46, -inf }
0x171c   : > { %4538 = vmax.xlane.f32.xlu0 %v4537_v54 }
0x171e   : > { %v4510_v47 = vpop.f32.mrb[136].mxu1 }
0x171f   : > { %v4511_v0 = vadd.f32 %v4510_v47, %v4457_v43  ;;  %v7280_v4 = vpop.f32.mrb[137].mxu1 }
0x1720   : > { %v4513_v6 = vpop.f32.mrb[138].mxu1 }
0x1721   : > { %v4514_v7 = vadd.f32 %v4513_v6, %v4457_v43  ;;  %v7281_v11 = vpop.f32.mrb[139].mxu1  ;;  %v4540_v9 = vsel %vm719_vm5, %v4511_v0, -inf }
0x1722   : > { %4541 = vmax.xlane.f32.xlu0 %v4540_v9  ;;  %v7778_v9 = vld [vmem:[%s9878_s12] sm:$0xff]  }
0x1723   : > { %v4543_v13 = vsel %vm719_vm5, %v4514_v7, -inf  ;;  %7287 = vmatpush3.bf16.msra.mxu0 %v7778_v9 }
0x1724   : > { %4544 = vmax.xlane.f32.xlu1 %v4543_v13  ;;  %7288 = vmatprep.subr.bf16.mxu0 %v7994_v1  ;;  %v7779_v13 = vld [vmem:[%s9878_s12 + $0x8] sm:$0xff]  }
0x1726   : > { %v4518_v16 = vpop.f32.mrb[140].mxu1 }
0x1727   : > { %v4519_v32 = vadd.f32 %v4518_v16, %v4457_v43  ;;  %v7284_v18 = vpop.f32.mrb[141].mxu1  ;;  %7289 = vmatpush3.bf16.msra.mxu0 %v7779_v13 }
0x1728   : > { %v4521_v14 = vpop.f32.mrb[142].mxu1  ;;  %7318 = vmatprep.subr.bf16.mxu0 %v7994_v1 }
0x1729   : > { %v7285_v15 = vpop.f32.mrb[143].mxu1  ;;  %v4546_v26 = vsel %vm2274_vm6, %v4519_v32, -inf }
0x172a   : > { %4547 = vmax.xlane.f32.xlu0 %v4546_v26 }
0x1767   : > { %v4749_v5 = vpop.f32.mrb[144].mxu1 }
0x1768   : > { %v7308_v60 = vpop.f32.mrb[145].mxu1  ;;  %v4750_v52 = vadd.f32 %v9420_v21, %v4749_v5 }
0x1769   : > { %v4752_v39 = vpop.f32.mrb[146].mxu1 }
0x176a   : > { %v4753_v19 = vadd.f32 %v9420_v21, %v4752_v39  ;;  %v7309_v23 = vpop.f32.mrb[147].mxu1 }
0x176c   : > { %v9424_v31 = vpack.c.bf16 %v4753_v19, %v4750_v52 }
0x176e   : > { %v4880_v57 = vsel %vm2599_vm7, %v9424_v31, 0 }
0x176f   : > { %v4757_v56 = vpop.f32.mrb[148].mxu1  ;;  %7335 = vmatpush3.bf16.xpose.msra.mxu1 %v4880_v57 }
0x1770   : > { %v7312_v48 = vpop.f32.mrb[149].mxu1  ;;  %7336 = vmatprep.subr.bf16.mxu1 %v7994_v1  ;;  %v4758_v62 = vadd.f32 %v9420_v21, %v4757_v56 }
0x1771   : > { %v4760_v59 = vpop.f32.mrb[150].mxu1 }
0x1772   : > { %v4761_v25 = vadd.f32 %v9420_v21, %v4760_v59  ;;  %v7313_v41 = vpop.f32.mrb[151].mxu1 }
0x1774   : > { %v9431_v37 = vpack.c.bf16 %v4761_v25, %v4758_v62 }
0x1776   : > { %v4883_v10 = vsel %vm2599_vm7, %v9431_v37, 0 }
0x1777   : > { %v4765_v58 = vpop.f32.mrb[152].mxu1  ;;  %7337 = vmatpush3.bf16.xpose.msra.mxu1 %v4883_v10 }
0x1778   : > { %v4766_v42 = vadd.f32 %v9420_v21, %v4765_v58  ;;  %v7316_v63 = vpop.f32.mrb[153].mxu1  ;;  %7338 = vmatprep.subr.bf16.mxu1 %v7994_v1 }
0x1779   : > { %v4768_v55 = vpop.f32.mrb[154].mxu1  ;;  %v7780_v63 = vld [vmem:[%s9878_s12 + $0x20] sm:$0xff]  }
0x177a   : > { %v9437_v44 = vpack.c.bf16 %v4766_v42, %v4766_v42  ;;  %v7317_v3 = vpop.f32.mrb[155].mxu1 }
0x177c   : > { %v4886_v51 = vsel %vm2599_vm7, %v9437_v44, 0 }
0x177f   : > { %7339 = vmatpush3.bf16.xpose.msra.mxu1 %v4886_v51 }
0x1780   : > { %7370 = vmatprep.subr.bf16.mxu1 %v7994_v1 }
0x17a7   : > { %v4536_v27 = vpop.xlane.xlu1 %4535 }
0x17a8   : > { %v4549_v22 = vsub.f32 %v4503_v53, %v4536_v27 }
0x17a9   : > { %v4539_v61 = vpop.xlane.xlu0 %4538 }
0x17aa   : > { %v4554_v30 = vmul.f32 1.442695, %v4549_v22  ;;  %v4550_v33 = vsub.f32 %v4506_v46, %v4539_v61 }
0x17ac   : > { %7886 = vpow2.f32 %v4554_v30  ;;  %v4556_v12 = vmul.f32 1.442695, %v4550_v33  ;;  %v7781_v33 = vld [vmem:[%s9878_s12 + $0x28] sm:$0xff]  }
0x17ae   : > { %7888 = vpow2.f32 %v4556_v12 }
0x17af   : > { %v4542_v17 = vpop.xlane.xlu0 %4541 }
0x17b0   : > { %v4551_v40 = vsub.f32 %v4511_v0, %v4542_v17 }
0x17b1   : > { %v4545_v28 = vpop.xlane.xlu1 %4544 }
0x17b2   : > { %v4558_v34 = vmul.f32 1.442695, %v4551_v40  ;;  %v4552_v43 = vsub.f32 %v4514_v7, %v4545_v28 }
0x17b4   : > { %7890 = vpow2.f32 %v4558_v34  ;;  %v4560_v2 = vmul.f32 1.442695, %v4552_v43 }
0x17b6   : > { %v7887_v45 = vpop.eup %7886  ;;  %7892 = vpow2.f32 %v4560_v2 }
0x17b7   : > { %v4548_v20 = vpop.xlane.xlu0 %4547  ;;  %v4564_v49 = vsel %vm719_vm5, %v7887_v45, 0.0 }
0x17b8   : > { %v7889_v50 = vpop.eup %7888  ;;  %v4553_v53 = vsub.f32 %v4519_v32, %v4548_v20  ;;  %4565 = vadd.xlane.f32.xlu1 %v4564_v49 }
0x17b9   : > { %v4567_v46 = vsel %vm719_vm5, %v7889_v50, 0.0 }
0x17ba   : > { %v4562_v54 = vmul.f32 1.442695, %v4553_v53  ;;  %4568 = vadd.xlane.f32.xlu0 %v4567_v46 }
0x17bc   : > { %7894 = vpow2.f32 %v4562_v54 }
0x17be   : > { %v7891_v47 = vpop.eup %7890 }
0x17bf   : > { %v4570_v0 = vsel %vm719_vm5, %v7891_v47, 0.0 }
0x17c0   : > { %v7893_v4 = vpop.eup %7892  ;;  %4571 = vadd.xlane.f32.xlu1 %v4570_v0 }
0x17c1   : > { %v4573_v6 = vsel %vm719_vm5, %v7893_v4, 0.0 }
0x17c2   : > { %4574 = vadd.xlane.f32.xlu0 %v4573_v6 }
0x17c6   : > { %v7895_v7 = vpop.eup %7894 }
0x17c7   : > { %v4576_v11 = vsel %vm2274_vm6, %v7895_v7, 0.0 }
0x17c8   : > { %4577 = vadd.xlane.f32.xlu1 %v4576_v11 }
0x17d8   : > { %4608 = vrot.lane.b32.xlu0 %v9349_v24, %s7999_s22 }
0x17d9   : > { %5090 = vrot.lane.b32.xlu1 %v9424_v31, %s8000_s15 }
0x17dc   : > { %5094 = vrot.lane.b32.xlu0 %v9437_v44, %s8000_s15 }
0x17dd   : > { %5092 = vrot.lane.b32.xlu1 %v9431_v37, %s8000_s15 }
0x1845   : > { %v4566_v16 = vpop.xlane.xlu1 %4565 }
0x1846   : > { %7896 = vrcp.f32 %v4566_v16 }
0x1847   : > { %v4569_v32 = vpop.xlane.xlu0 %4568 }
0x1848   : > { %7898 = vrcp.f32 %v4569_v32 }
0x184d   : > { %v4572_v18 = vpop.xlane.xlu1 %4571 }
0x184e   : > { %7900 = vrcp.f32 %v4572_v18 }
0x184f   : > { %v4575_v14 = vpop.xlane.xlu0 %4574 }
0x1850   : > { %v7897_v15 = vpop.eup %7896  ;;  %7902 = vrcp.f32 %v4575_v14 }
0x1851   : > { %v4584_v5 = vmul.f32 %v7897_v15, %v7887_v45 }
0x1852   : > { %v7899_v26 = vpop.eup %7898 }
0x1853   : > { %v4585_v60 = vmul.f32 %v7899_v26, %v7889_v50  ;;  %v4609_v58 = vpop.permute.xlu0 %4608 }
0x1855   : > { %v4589_v39 = vpack.c.bf16 %v4585_v60, %v4584_v5  ;;  %v4578_v52 = vpop.xlane.xlu1 %4577 }
0x1856   : > { %7904 = vrcp.f32 %v4578_v52 }
0x1857   : > { %7291 = vmatmul.mubr.msk.bf16.vlgmr.msra.gmra.mrb[224].mxu0 %vm719_vm5, %v4589_v39 }
0x1858   : > { %v7901_v19 = vpop.eup %7900  ;;  %7294 = vmatprep.mubr.msk.bf16.mxu0 %vm7996_vm2, %v7994_v1  ;;  %7319 = vmatpush3.bf16.msra.mxu0 %v7780_v63 }
0x1859   : > { %v4586_v57 = vmul.f32 %v7901_v19, %v7891_v47  ;;  %v5091_v27 = vpop.permute.xlu1 %5090  ;;  %7320 = vmatprep.subr.bf16.mxu0 %v7994_v1  ;;  %v5095_v47 = vpop.permute.xlu0 %5094 }
0x185a   : > { %v7903_v23 = vpop.eup %7902  ;;  %v5106_v61 = vsel %vm2599_vm7, %v5091_v27, 0  ;;  %v5112_v0 = vsel %vm2599_vm7, %v5095_v47, 0 }
0x185b   : > { %v4587_v56 = vmul.f32 %v7903_v23, %v7893_v4 }
0x185c   : > { %7321 = vmatpush3.bf16.msra.mxu0 %v7781_v33 }
0x185d   : > { %v4590_v48 = vpack.c.bf16 %v4587_v56, %v4586_v57  ;;  %7352 = vmatprep.subr.bf16.mxu0 %v7994_v1  ;;  %v5093_v43 = vpop.permute.xlu1 %5092 }
0x185e   : > { %v5109_v45 = vsel %vm2599_vm7, %v5093_v43, 0 }
0x185f   : > { %7295 = vmatmul.mubr.msk.bf16.gmra.mrb[228].mxu0 %vm719_vm5, %v4590_v48 }
0x1860   : > { %v7905_v59 = vpop.eup %7904  ;;  %7298 = vmatprep.mubr.msk.bf16.mxu0 %vm7996_vm2, %v7994_v1 }
0x1861   : > { %v4588_v62 = vmul.f32 %v7905_v59, %v7895_v7 }
0x1863   : > { %v4591_v25 = vpack.c.bf16 %v4588_v62, %v4588_v62 }
0x1867   : > { %7299 = vmatmul.mubr.msk.bf16.gmra.mrb[232].mxu0 %vm719_vm5, %v4591_v25 }
0x1868   : > { %7322 = vmatprep.mubr.msk.bf16.mxu0 %vm7996_vm2, %v7994_v1 }
0x192a   : > { %v4654_v41 = vpop.f32.mrb[224].mxu0 }
0x192b   : > { %v7292_v10 = vpop.f32.mrb[225].mxu0  ;;  %v4655_v55 = vadd.f32 %v4654_v41, %v4609_v58 }
0x192c   : > { %v4657_v42 = vpop.f32.mrb[226].mxu0 }
0x192d   : > { %v4658_v3 = vadd.f32 %v4657_v42, %v4609_v58  ;;  %v7293_v51 = vpop.f32.mrb[227].mxu0 }
0x192f   : > { %v9475_v22 = vpack.c.bf16 %v4658_v3, %v4655_v55 }
0x1931   : > { %5081 = vrot.lane.b32.xlu1 %v9475_v22, %s8000_s15  ;;  %7341 = vmatmul.mubr.msk.bf16.vlgmr.msra.gmra.mrb[156].mxu1 %vm2599_vm7, %v9475_v22 }
0x1932   : > { %7371 = vmatpush3.bf16.xpose.msra.mxu1 %v5106_v61  ;;  %v4662_v30 = vpop.f32.mrb[228].mxu0  ;;  %7344 = vmatprep.mubr.msk.bf16.mxu1 %vm7996_vm2, %v7994_v1 }
0x1933   : > { %v7296_v12 = vpop.f32.mrb[229].mxu0  ;;  %7372 = vmatprep.subr.bf16.mxu1 %v7994_v1  ;;  %v4663_v40 = vadd.f32 %v4662_v30, %v4609_v58 }
0x1934   : > { %v4665_v17 = vpop.f32.mrb[230].mxu0 }
0x1935   : > { %v4666_v28 = vadd.f32 %v4665_v17, %v4609_v58  ;;  %v7297_v34 = vpop.f32.mrb[231].mxu0 }
0x1937   : > { %v9490_v2 = vpack.c.bf16 %v4666_v28, %v4663_v40 }
0x1939   : > { %5083 = vrot.lane.b32.xlu0 %v9490_v2, %s8000_s15  ;;  %7345 = vmatmul.mubr.msk.bf16.gmra.mrb[160].mxu1 %vm2599_vm7, %v9490_v2 }
0x193a   : > { %7373 = vmatpush3.bf16.xpose.msra.mxu1 %v5109_v45  ;;  %v4670_v20 = vpop.f32.mrb[232].mxu0  ;;  %7348 = vmatprep.mubr.msk.bf16.mxu1 %vm7996_vm2, %v7994_v1 }
0x193b   : > { %v4671_v49 = vadd.f32 %v4670_v20, %v4609_v58  ;;  %v7300_v50 = vpop.f32.mrb[233].mxu0  ;;  %7374 = vmatprep.subr.bf16.mxu1 %v7994_v1 }
0x193c   : > { %v4673_v53 = vpop.f32.mrb[234].mxu0 }
0x193d   : > { %v9500_v46 = vpack.c.bf16 %v4671_v49, %v4671_v49  ;;  %4264 = vrot.lane.b32.xlu0 %v9349_v24, %s7998_s25  ;;  %v7301_v54 = vpop.f32.mrb[235].mxu0 }
0x193f   : > { %5085 = vrot.lane.b32.xlu1 %v9500_v46, %s8000_s15 }
0x1941   : > { %7349 = vmatmul.mubr.msk.bf16.gmra.mrb[164].mxu1 %vm2599_vm7, %v9500_v46 }
0x1942   : > { %7375 = vmatpush3.bf16.xpose.msra.mxu1 %v5112_v0  ;;  %7376 = vmatprep.mubr.msk.bf16.mxu1 %vm7996_vm2, %v7994_v1 }
0x1943   : > { %7406 = vmatprep.subr.bf16.mxu1 %v7994_v1 }
0x19a3   : > { %v5082_v4 = vpop.permute.xlu1 %5081 }
0x19a4   : > { %7377 = vmatmul.mubr.msk.bf16.vlgmr.msra.gmra.mrb[168].mxu1 %vm2599_vm7, %v5082_v4 }
0x19a5   : > { %7380 = vmatprep.mubr.msk.bf16.mxu1 %vm7996_vm2, %v7994_v1 }
0x19ab   : > { %v5084_v24 = vpop.permute.xlu0 %5083 }
0x19ac   : > { %7381 = vmatmul.mubr.msk.bf16.gmra.mrb[172].mxu1 %vm2599_vm7, %v5084_v24 }
0x19ad   : > { %7384 = vmatprep.mubr.msk.bf16.mxu1 %vm7996_vm2, %v7994_v1 }
0x19af   : > { %v4265_v6 = vpop.permute.xlu0 %4264 }
0x19b0   : > { %v4311_v7 = vadd.f32 %v9402_v29, %v4265_v6  ;;  %v4314_v11 = vadd.f32 %v9404_v38, %v4265_v6  ;;  %v4319_v9 = vadd.f32 %v9406_v8, %v4265_v6  ;;  %v4322_v13 = vadd.f32 %v9408_v35, %v4265_v6 }
0x19b1   : > { %v5086_v15 = vpop.permute.xlu1 %5085  ;;  %v4327_v29 = vadd.f32 %v9410_v36, %v4265_v6 }
0x19b2   : > { %v4529_v16 = vmax.f32 %v4311_v7, 0.0  ;;  %v4530_v32 = vmax.f32 %v4314_v11, 0.0  ;;  %v4531_v18 = vmax.f32 %v4319_v9, 0.0  ;;  %v4532_v14 = vmax.f32 %v4322_v13, 0.0 }
0x19b3   : > { %v4533_v38 = vmax.f32 %v4327_v29, 0.0 }
0x19b4   : > { %v4774_v26 = vpack.c.bf16 %v4530_v32, %v4529_v16  ;;  %7385 = vmatmul.mubr.msk.bf16.gmra.mrb[176].mxu1 %vm2599_vm7, %v5086_v15  ;;  %v4775_v5 = vpack.c.bf16 %v4532_v14, %v4531_v18 }
0x19b5   : > { %7408 = vmatprep.mubr.msk.bf16.mxu1 %vm7996_vm2, %v7994_v1  ;;  %v4776_v8 = vpack.c.bf16 %v4533_v38, %v4533_v38 }
0x19b6   : > { %7323 = vmatmul.mubr.msk.bf16.vlgmr.msra.gmra.mrb[236].mxu0 %vm719_vm5, %v4774_v26 }
0x19b7   : > { %7326 = vmatprep.mubr.msk.bf16.mxu0 %vm7996_vm2, %v7994_v1 }
0x19be   : > { %7327 = vmatmul.mubr.msk.bf16.gmra.mrb[240].mxu0 %vm719_vm5, %v4775_v5 }
0x19bf   : > { %7330 = vmatprep.mubr.msk.bf16.mxu0 %vm7996_vm2, %v7994_v1 }
0x19c6   : > { %7331 = vmatmul.mubr.msk.bf16.gmra.mrb[244].mxu0 %vm719_vm5, %v4776_v8 }
0x19c7   : > { %7358 = vmatprep.mubr.msk.bf16.mxu0 %vm7996_vm2, %v7994_v1 }
0x1a04   : > { %v4922_v35 = vpop.f32.mrb[156].mxu1 }
0x1a05   : > { %v9535_v60 = vmul.f32 0.35355338, %v4922_v35  ;;  %v7342_v39 = vpop.f32.mrb[157].mxu1 }
0x1a06   : > { %v4925_v52 = vpop.f32.mrb[158].mxu1 }
0x1a07   : > { %v9537_v19 = vmul.f32 0.35355338, %v4925_v52  ;;  %v7343_v36 = vpop.f32.mrb[159].mxu1  ;;  %v4949_v23 = vsel %vm2679_vm8, %v9535_v60, -inf }
0x1a08   : > { %4950 = vmax.xlane.f32.xlu1 %v4949_v23 }
0x1a09   : > { %v4952_v57 = vsel %vm2679_vm8, %v9537_v19, -inf }
0x1a0a   : > { %4953 = vmax.xlane.f32.xlu0 %v4952_v57 }
0x1a0c   : > { %v4930_v56 = vpop.f32.mrb[160].mxu1 }
0x1a0d   : > { %v9543_v48 = vmul.f32 0.35355338, %v4930_v56  ;;  %v7346_v59 = vpop.f32.mrb[161].mxu1 }
0x1a0e   : > { %v4933_v62 = vpop.f32.mrb[162].mxu1 }
0x1a0f   : > { %v9545_v25 = vmul.f32 0.35355338, %v4933_v62  ;;  %v7347_v41 = vpop.f32.mrb[163].mxu1  ;;  %v4955_v10 = vsel %vm2679_vm8, %v9543_v48, -inf }
0x1a10   : > { %4956 = vmax.xlane.f32.xlu0 %v4955_v10 }
0x1a11   : > { %v4958_v58 = vsel %vm2679_vm8, %v9545_v25, -inf }
0x1a12   : > { %4959 = vmax.xlane.f32.xlu1 %v4958_v58 }
0x1a14   : > { %v4938_v42 = vpop.f32.mrb[164].mxu1 }
0x1a15   : > { %v9551_v63 = vmul.f32 0.35355338, %v4938_v42  ;;  %v7350_v55 = vpop.f32.mrb[165].mxu1 }
0x1a16   : > { %v4941_v3 = vpop.f32.mrb[166].mxu1 }
0x1a17   : > { %v7351_v51 = vpop.f32.mrb[167].mxu1  ;;  %v4961_v27 = vsel %vm2692_vm9, %v9551_v63, -inf }
0x1a18   : > { %4962 = vmax.xlane.f32.xlu0 %v4961_v27 }
0x1a77   : > { %v5148_v61 = vpop.f32.mrb[168].mxu1 }
0x1a78   : > { %v5170_v30 = vmul.f32 0.35355338, %v5148_v61  ;;  %v7378_v33 = vpop.f32.mrb[169].mxu1 }
0x1a79   : > { %v5151_v12 = vpop.f32.mrb[170].mxu1 }
0x1a7a   : > { %v9555_v17 = vmul.f32 0.35355338, %v5151_v12  ;;  %v7379_v40 = vpop.f32.mrb[171].mxu1  ;;  %v5175_v28 = vsel %vm2679_vm8, %v5170_v30, -inf }
0x1a7b   : > { %5176 = vmax.xlane.f32.xlu1 %v5175_v28 }
0x1a7c   : > { %v5178_v34 = vsel %vm2679_vm8, %v9555_v17, -inf }
0x1a7d   : > { %5179 = vmax.xlane.f32.xlu0 %v5178_v34 }
0x1a7f   : > { %v5156_v43 = vpop.f32.mrb[172].mxu1 }
0x1a80   : > { %v9560_v45 = vmul.f32 0.35355338, %v5156_v43  ;;  %v7382_v20 = vpop.f32.mrb[173].mxu1 }
0x1a81   : > { %v5159_v49 = vpop.f32.mrb[174].mxu1 }
0x1a82   : > { %v9562_v50 = vmul.f32 0.35355338, %v5159_v49  ;;  %v7383_v53 = vpop.f32.mrb[175].mxu1  ;;  %v5181_v54 = vsel %vm2679_vm8, %v9560_v45, -inf }
0x1a83   : > { %5182 = vmax.xlane.f32.xlu1 %v5181_v54 }
0x1a84   : > { %v5184_v47 = vsel %vm2679_vm8, %v9562_v50, -inf }
0x1a85   : > { %5185 = vmax.xlane.f32.xlu0 %v5184_v47 }
0x1a87   : > { %v5164_v0 = vpop.f32.mrb[176].mxu1 }
0x1a88   : > { %v9568_v4 = vmul.f32 0.35355338, %v5164_v0  ;;  %v7386_v24 = vpop.f32.mrb[177].mxu1 }
0x1a89   : > { %v4840_v6 = vpop.f32.mrb[236].mxu0  ;;  %v5167_v7 = vpop.f32.mrb[178].mxu1 }
0x1a8a   : > { %v7324_v11 = vpop.f32.mrb[237].mxu0  ;;  %v7387_v9 = vpop.f32.mrb[179].mxu1  ;;  %v5187_v13 = vsel %vm2692_vm9, %v9568_v4, -inf }
0x1a8b   : > { %5188 = vmax.xlane.f32.xlu1 %v5187_v13  ;;  %v4843_v16 = vpop.f32.mrb[238].mxu0 }
0x1a8c   : > { %v7325_v32 = vpop.f32.mrb[239].mxu0 }
0x1a91   : > { %v4848_v18 = vpop.f32.mrb[240].mxu0 }
0x1a92   : > { %v7328_v14 = vpop.f32.mrb[241].mxu0 }
0x1a93   : > { %v4851_v15 = vpop.f32.mrb[242].mxu0 }
0x1a94   : > { %v7329_v26 = vpop.f32.mrb[243].mxu0 }
0x1a95   : > { %v4951_v35 = vpop.xlane.xlu1 %4950 }
0x1a96   : > { %v4964_v40 = vsub.f32 %v9535_v60, %v4951_v35 }
0x1a97   : > { %v4954_v39 = vpop.xlane.xlu0 %4953 }
0x1a98   : > { %v4969_v28 = vmul.f32 1.442695, %v4964_v40  ;;  %v4965_v34 = vsub.f32 %v9537_v19, %v4954_v39 }
0x1a99   : > { %v4856_v5 = vpop.f32.mrb[244].mxu0 }
0x1a9a   : > { %v7332_v29 = vpop.f32.mrb[245].mxu0  ;;  %v4971_v43 = vmul.f32 1.442695, %v4965_v34 }
0x1a9b   : > { %v4859_v38 = vpop.f32.mrb[246].mxu0  ;;  %4794 = vrot.lane.b32.xlu0 %v9420_v21, %s7998_s25 }
0x1a9c   : > { %v7333_v8 = vpop.f32.mrb[247].mxu0 }
0x1a9d   : > { %v4957_v36 = vpop.xlane.xlu0 %4956 }
0x1a9e   : > { %v4966_v20 = vsub.f32 %v9543_v48, %v4957_v36 }
0x1a9f   : > { %v4960_v52 = vpop.xlane.xlu1 %4959 }
0x1aa0   : > { %v4973_v49 = vmul.f32 1.442695, %v4966_v20  ;;  %v4967_v53 = vsub.f32 %v9545_v25, %v4960_v52 }
0x1aa2   : > { %v4975_v54 = vmul.f32 1.442695, %v4967_v53 }
0x1aa5   : > { %v4963_v56 = vpop.xlane.xlu0 %4962 }
0x1aa6   : > { %v4968_v60 = vsub.f32 %v9551_v63, %v4963_v56 }
0x1aa8   : > { %v4977_v19 = vmul.f32 1.442695, %v4968_v60 }
0x1b08   : > { %v5177_v23 = vpop.xlane.xlu1 %5176 }
0x1b09   : > { %v5190_v57 = vsub.f32 %v5170_v30, %v5177_v23 }
0x1b0a   : > { %v5180_v62 = vpop.xlane.xlu0 %5179 }
0x1b0b   : > { %v5195_v59 = vmul.f32 1.442695, %v5190_v57  ;;  %v5191_v0 = vsub.f32 %v9555_v17, %v5180_v62 }
0x1b0d   : > { %7906 = vpow2.f32 %v5195_v59  ;;  %v5197_v7 = vmul.f32 1.442695, %v5191_v0 }
0x1b0e   : > { %7908 = vpow2.f32 %v4969_v28 }
0x1b0f   : > { %7910 = vpow2.f32 %v4971_v43 }
0x1b10   : > { %7912 = vpow2.f32 %v4973_v49  ;;  %v5183_v24 = vpop.xlane.xlu1 %5182 }
0x1b11   : > { %7914 = vpow2.f32 %v4975_v54  ;;  %v5192_v11 = vsub.f32 %v9560_v45, %v5183_v24 }
0x1b12   : > { %v5186_v41 = vpop.xlane.xlu0 %5185  ;;  %7916 = vpow2.f32 %v4977_v19 }
0x1b13   : > { %7918 = vpow2.f32 %v5197_v7  ;;  %v5199_v63 = vmul.f32 1.442695, %v5192_v11  ;;  %v5193_v13 = vsub.f32 %v9562_v50, %v5186_v41 }
0x1b15   : > { %7920 = vpow2.f32 %v5199_v63 }
0x1b16   : > { %v4795_v10 = vpop.permute.xlu0 %4794 }
0x1b17   : > { %v9574_v58 = vpop.eup %7906  ;;  %v4841_v42 = vadd.f32 %v4840_v6, %v4795_v10  ;;  %v4844_v55 = vadd.f32 %v4843_v16, %v4795_v10  ;;  %v4849_v3 = vadd.f32 %v4848_v18, %v4795_v10  ;;  %v4852_v51 = vadd.f32 %v4851_v15, %v4795_v10 }
0x1b18   : > { %v5205_v21 = vsel %vm2679_vm8, %v9574_v58, 0.0  ;;  %v4857_v61 = vadd.f32 %v4856_v5, %v4795_v10  ;;  %v7909_v47 = vpop.eup %7908  ;;  %v5189_v16 = vpop.xlane.xlu1 %5188  ;;  %v5201_v18 = vmul.f32 1.442695, %v5193_v13 }
0x1b19   : > { %5206 = vadd.xlane.f32.xlu0 %v5205_v21  ;;  %v9578_v27 = vpack.c.bf16 %v4844_v55, %v4841_v42  ;;  %v9580_v30 = vpack.c.bf16 %v4852_v51, %v4849_v3  ;;  %v4979_v6 = vsel %vm2679_vm8, %v7909_v47, 0.0  ;;  %v7911_v48 = vpop.eup %7910  ;;  %v5194_v14 = vsub.f32 %v9568_v4, %v5189_v16 }
0x1b1a   : > { %v9586_v33 = vpack.c.bf16 %v4857_v61, %v4857_v61  ;;  %v4982_v25 = vsel %vm2679_vm8, %v7911_v48, 0.0  ;;  %v9606_v9 = vpop.eup %7912  ;;  %7922 = vpow2.f32 %v5201_v18  ;;  %v6446_v18 = vld [vmem:[%s9878_s12 + $0x30] sm:$0xf] }
0x1b1b   : > { %5236 = vrot.lane.b32.xlu1 %v9578_v27, %s8000_s15  ;;  %7353 = vmatpush3.bf16.msra.mxu0 %v9578_v27  ;;  %v4985_v17 = vsel %vm2679_vm8, %v9606_v9, 0.0  ;;  %v7915_v32 = vpop.eup %7914  ;;  %v5203_v26 = vmul.f32 1.442695, %v5194_v14  ;;  %v5393_v14 = vsel %vm3057_vm11, %v6446_v18, 0 }
0x1b1c   : > { %7354 = vmatprep.subr.bf16.mxu0 %v7994_v1  ;;  %v5017_v12 = vsel %vm2748_vm10, %v9586_v33, 0  ;;  %v4988_v45 = vsel %vm2679_vm8, %v7915_v32, 0.0  ;;  %v7917_v15 = vpop.eup %7916 }
0x1b1d   : > { %v4991_v5 = vsel %vm2692_vm9, %v7917_v15, 0.0  ;;  %v9614_v29 = vpop.eup %7918  ;;  %7924 = vpow2.f32 %v5203_v26 }
0x1b1e   : > { %v5208_v50 = vsel %vm2679_vm8, %v9614_v29, 0.0 }
0x1b1f   : > { %7355 = vmatpush3.bf16.msra.mxu0 %v9580_v30  ;;  %v9618_v38 = vpop.eup %7920 }
0x1b20   : > { %7356 = vmatprep.subr.bf16.mxu0 %v7994_v1  ;;  %v5211_v4 = vsel %vm2679_vm8, %v9618_v38, 0.0 }
0x1b23   : > { %7357 = vmatpush3.bf16.msra.mxu0 %v5017_v12 }
0x1b24   : > { %7388 = vmatprep.subr.bf16.mxu0 %v7994_v1  ;;  %v9622_v8 = vpop.eup %7922 }
0x1b25   : > { %v5214_v35 = vsel %vm2679_vm8, %v9622_v8, 0.0 }
0x1b27   : > { %v9626_v39 = vpop.eup %7924 }
0x1b28   : > { %v5217_v52 = vsel %vm2692_vm9, %v9626_v39, 0.0 }
0x1b2f   : > { %5238 = vrot.lane.b32.xlu0 %v9580_v30, %s8000_s15 }
0x1b33   : > { %5453 = vrot.lane.b32.xlu0 %v9490_v2, %s8001_s23 }
0x1b3f   : > { %4980 = vadd.xlane.f32.xlu1 %v4979_v6 }
0x1b43   : > { %4983 = vadd.xlane.f32.xlu1 %v4982_v25 }
0x1b47   : > { %4986 = vadd.xlane.f32.xlu1 %v4985_v17 }
0x1b4b   : > { %4989 = vadd.xlane.f32.xlu1 %v4988_v45  ;;  %v6447_v45 = vld [vmem:[%s9878_s12 + $0x34] sm:$0xf] }
0x1b4f   : > { %4992 = vadd.xlane.f32.xlu1 %v4991_v5 }
0x1b53   : > { %5209 = vadd.xlane.f32.xlu1 %v5208_v50 }
0x1b57   : > { %5212 = vadd.xlane.f32.xlu1 %v5211_v4 }
0x1b5b   : > { %5215 = vadd.xlane.f32.xlu1 %v5214_v35 }
0x1b5f   : > { %5218 = vadd.xlane.f32.xlu1 %v5217_v52 }
0x1b70   : > { %5240 = vrot.lane.b32.xlu1 %v9586_v33, %s8000_s15 }
0x1b74   : > { %5457 = vrot.lane.b32.xlu1 %v9424_v31, %s8001_s23 }
0x1b78   : > { %5459 = vrot.lane.b32.xlu1 %v9431_v37, %s8001_s23 }
0x1b7c   : > { %5461 = vrot.lane.b32.xlu1 %v9437_v44, %s8001_s23 }
0x1b80   : > { %5451 = vrot.lane.b32.xlu1 %v9475_v22, %s8001_s23 }
0x1b84   : > { %5455 = vrot.lane.b32.xlu1 %v9500_v46, %s8001_s23 }
0x1b8d   : > { %v5237_v36 = vpop.permute.xlu1 %5236 }
0x1ba6   : > { %v5207_v3 = vpop.xlane.xlu0 %5206 }
0x1baa   : > { %v5239_v40 = vpop.permute.xlu0 %5238 }
0x1bcc   : > { %v4981_v23 = vpop.xlane.xlu1 %4980 }
0x1bcd   : > { %7926 = vrcp.f32 %v4981_v23 }
0x1bd0   : > { %v4984_v57 = vpop.xlane.xlu1 %4983 }
0x1bd1   : > { %7928 = vrcp.f32 %v4984_v57 }
0x1bd4   : > { %v4987_v56 = vpop.xlane.xlu1 %4986 }
0x1bd5   : > { %7930 = vrcp.f32 %v4987_v56 }
0x1bd7   : > { %v7927_v62 = vpop.eup %7926 }
0x1bd8   : > { %v4990_v59 = vpop.xlane.xlu1 %4989  ;;  %v4999_v10 = vmul.f32 %v7927_v62, %v7909_v47 }
0x1bd9   : > { %7932 = vrcp.f32 %v4990_v59 }
0x1bdb   : > { %v7929_v41 = vpop.eup %7928 }
0x1bdc   : > { %v5000_v42 = vmul.f32 %v7929_v41, %v7911_v48  ;;  %v4993_v55 = vpop.xlane.xlu1 %4992 }
0x1bdd   : > { %7934 = vrcp.f32 %v4993_v55 }
0x1bde   : > { %v5004_v51 = vpack.c.bf16 %v5000_v42, %v4999_v10 }
0x1bdf   : > { %v7931_v61 = vpop.eup %7930 }
0x1be0   : > { %v5210_v21 = vpop.xlane.xlu1 %5209  ;;  %7359 = vmatmul.mubr.msk.bf16.vlgmr.msra.gmra.mrb[248].mxu0 %vm2679_vm8, %v5004_v51  ;;  %v5001_v34 = vmul.f32 %v7931_v61, %v9606_v9 }
0x1be1   : > { %7389 = vmatpush3.bf16.msra.mxu0 %v5237_v36  ;;  %7362 = vmatprep.mubr.msk.bf16.mxu0 %vm7996_vm2, %v7994_v1  ;;  %7936 = vrcp.f32 %v5210_v21 }
0x1be2   : > { %7390 = vmatprep.subr.bf16.mxu0 %v7994_v1  ;;  %7938 = vrcp.f32 %v5207_v3 }
0x1be3   : > { %v7933_v12 = vpop.eup %7932 }
0x1be4   : > { %v5213_v28 = vpop.xlane.xlu1 %5212  ;;  %v5002_v43 = vmul.f32 %v7933_v12, %v7915_v32 }
0x1be5   : > { %7391 = vmatpush3.bf16.msra.mxu0 %v5239_v40 }
0x1be6   : > { %v5005_v20 = vpack.c.bf16 %v5002_v43, %v5001_v34  ;;  %7392 = vmatprep.subr.bf16.mxu0 %v7994_v1 }
0x1be7   : > { %v7935_v49 = vpop.eup %7934 }
0x1be8   : > { %v5216_v53 = vpop.xlane.xlu1 %5215  ;;  %7363 = vmatmul.mubr.msk.bf16.gmra.mrb[252].mxu0 %vm2679_vm8, %v5005_v20  ;;  %v5003_v54 = vmul.f32 %v7935_v49, %v7917_v15  ;;  %v5325_v15 = vsel %vm3057_vm11, %v6447_v45, 0 }
0x1be9   : > { %7366 = vmatprep.mubr.msk.bf16.mxu0 %vm7996_vm2, %v7994_v1  ;;  %7940 = vrcp.f32 %v5216_v53  ;;  %7407 = vmatpush3.bf16.msra.mxu1 %v5325_v15 }
0x1bea   : > { %v5006_v47 = vpack.c.bf16 %v5003_v54, %v5003_v54  ;;  %7942 = vrcp.f32 %v5213_v28  ;;  %7434 = vmatprep.subr.bf16.mxu1 %v7994_v1 }
0x1beb   : > { %v7937_v19 = vpop.eup %7936 }
0x1bec   : > { %v5219_v60 = vpop.xlane.xlu1 %5218  ;;  %v7939_v24 = vpop.eup %7938  ;;  %v5226_v48 = vmul.f32 %v7937_v19, %v9614_v29 }
0x1bed   : > { %v5225_v7 = vmul.f32 %v7939_v24, %v9574_v58  ;;  %7944 = vrcp.f32 %v5219_v60  ;;  %v5454_v24 = vpop.permute.xlu0 %5453 }
0x1bef   : > { %v5230_v11 = vpack.c.bf16 %v5226_v48, %v5225_v7 }
0x1bf0   : > { %v5241_v0 = vpop.permute.xlu1 %5240  ;;  %7367 = vmatmul.mubr.msk.bf16.gmra.mrb[0].mxu0 %vm2679_vm8, %v5006_v47 }
0x1bf1   : > { %v5254_v6 = vsel %vm2748_vm10, %v5241_v0, 0  ;;  %7394 = vmatprep.mubr.msk.bf16.mxu0 %vm7996_vm2, %v7994_v1 }
0x1bf2   : > { %7393 = vmatpush3.bf16.msra.mxu0 %v5254_v6 }
0x1bf3   : > { %7420 = vmatprep.subr.bf16.mxu0 %v7994_v1  ;;  %v7941_v25 = vpop.eup %7940 }
0x1bf4   : > { %v7943_v9 = vpop.eup %7942  ;;  %v5228_v63 = vmul.f32 %v7941_v25, %v9622_v8  ;;  %v5458_v10 = vpop.permute.xlu1 %5457 }
0x1bf5   : > { %v5227_v13 = vmul.f32 %v7943_v9, %v9618_v38  ;;  %v5473_v51 = vsel %vm2599_vm7, %v5458_v10, 0 }
0x1bf7   : > { %v5231_v16 = vpack.c.bf16 %v5228_v63, %v5227_v13  ;;  %v7945_v17 = vpop.eup %7944 }
0x1bf8   : > { %7395 = vmatmul.mubr.msk.bf16.vlgmr.msra.gmra.mrb[4].mxu0 %vm2679_vm8, %v5230_v11  ;;  %v5229_v58 = vmul.f32 %v7945_v17, %v9626_v39  ;;  %v5460_v12 = vpop.permute.xlu1 %5459 }
0x1bf9   : > { %7398 = vmatprep.mubr.msk.bf16.mxu0 %vm7996_vm2, %v7994_v1  ;;  %7421 = vmatpush3.bf16.msra.mxu0 %v5393_v14  ;;  %v5476_v43 = vsel %vm2599_vm7, %v5460_v12, 0 }
0x1bfa   : > { %v5232_v32 = vpack.c.bf16 %v5229_v58, %v5229_v58  ;;  %7452 = vmatprep.subr.bf16.mxu0 %v7994_v1 }
0x1bfc   : > { %v5462_v53 = vpop.permute.xlu1 %5461 }
0x1bfd   : > { %v5479_v19 = vsel %vm2599_vm7, %v5462_v53, 0 }
0x1c00   : > { %7399 = vmatmul.mubr.msk.bf16.gmra.mrb[8].mxu0 %vm2679_vm8, %v5231_v16  ;;  %v5452_v0 = vpop.permute.xlu1 %5451 }
0x1c01   : > { %7402 = vmatprep.mubr.msk.bf16.mxu0 %vm7996_vm2, %v7994_v1 }
0x1c04   : > { %v5456_v6 = vpop.permute.xlu1 %5455 }
0x1c08   : > { %7403 = vmatmul.mubr.msk.bf16.gmra.mrb[12].mxu0 %vm2679_vm8, %v5232_v32 }
0x1c09   : > { %7422 = vmatprep.mubr.msk.bf16.mxu0 %vm7996_vm2, %v7994_v1 }
0x1cb3   : > { %v5053_v26 = vpop.f32.mrb[248].mxu0 }
0x1cb4   : > { %v7360_v5 = vpop.f32.mrb[249].mxu0 }
0x1cb5   : > { %v5056_v29 = vpop.f32.mrb[250].mxu0 }
0x1cb6   : > { %v5075_v50 = vpack.c.bf16 %v5056_v29, %v5053_v26  ;;  %v7361_v38 = vpop.f32.mrb[251].mxu0 }
0x1cb8   : > { %7423 = vmatmul.mubr.msk.bf16.vlgmr.msra.gmra.mrb[16].mxu0 %vm2599_vm7, %v5075_v50 }
0x1cb9   : > { %7426 = vmatprep.mubr.msk.bf16.mxu0 %vm7996_vm2, %v7994_v1 }
0x1cbb   : > { %v5061_v4 = vpop.f32.mrb[252].mxu0 }
0x1cbc   : > { %v7364_v8 = vpop.f32.mrb[253].mxu0 }
0x1cbd   : > { %v5064_v35 = vpop.f32.mrb[254].mxu0 }
0x1cbe   : > { %v5076_v39 = vpack.c.bf16 %v5064_v35, %v5061_v4  ;;  %v7365_v52 = vpop.f32.mrb[255].mxu0 }
0x1cc0   : > { %7427 = vmatmul.mubr.msk.bf16.gmra.mrb[20].mxu0 %vm2599_vm7, %v5076_v39 }
0x1cc1   : > { %7430 = vmatprep.mubr.msk.bf16.mxu0 %vm7996_vm2, %v7994_v1 }
0x1cc3   : > { %v5069_v36 = vpop.f32.mrb[0].mxu0 }
0x1cc4   : > { %v7368_v23 = vpop.f32.mrb[1].mxu0  ;;  %v5077_v56 = vpack.c.bf16 %v5069_v36, %v5069_v36 }
0x1cc5   : > { %v5072_v57 = vpop.f32.mrb[2].mxu0 }
0x1cc6   : > { %v7369_v59 = vpop.f32.mrb[3].mxu0 }
0x1cc8   : > { %7431 = vmatmul.mubr.msk.bf16.gmra.mrb[24].mxu0 %vm2599_vm7, %v5077_v56 }
0x1cc9   : > { %7458 = vmatprep.mubr.msk.bf16.mxu0 %vm7996_vm2, %v7994_v1 }
0x1ccb   : > { %v5290_v62 = vpop.f32.mrb[4].mxu0 }
0x1ccc   : > { %v7396_v41 = vpop.f32.mrb[5].mxu0 }
0x1ccd   : > { %v5293_v42 = vpop.f32.mrb[6].mxu0 }
0x1cce   : > { %v5312_v55 = vpack.c.bf16 %v5293_v42, %v5290_v62  ;;  %v7397_v3 = vpop.f32.mrb[7].mxu0 }
0x1cd0   : > { %7409 = vmatmul.mubr.msk.bf16.vlgmr.msra.gmra.mrb[180].mxu1 %vm2599_vm7, %v5312_v55 }
0x1cd1   : > { %7435 = vmatpush3.bf16.xpose.msra.mxu1 %v5473_v51  ;;  %7412 = vmatprep.mubr.msk.bf16.mxu1 %vm7996_vm2, %v7994_v1 }
0x1cd2   : > { %7436 = vmatprep.subr.bf16.mxu1 %v7994_v1 }
0x1cd3   : > { %v5298_v21 = vpop.f32.mrb[8].mxu0 }
0x1cd4   : > { %v7400_v61 = vpop.f32.mrb[9].mxu0 }
0x1cd5   : > { %v5301_v40 = vpop.f32.mrb[10].mxu0 }
0x1cd6   : > { %v5313_v28 = vpack.c.bf16 %v5301_v40, %v5298_v21  ;;  %v7401_v34 = vpop.f32.mrb[11].mxu0 }
0x1cd8   : > { %7413 = vmatmul.mubr.msk.bf16.gmra.mrb[184].mxu1 %vm2599_vm7, %v5313_v28 }
0x1cd9   : > { %7437 = vmatpush3.bf16.xpose.msra.mxu1 %v5476_v43  ;;  %7416 = vmatprep.mubr.msk.bf16.mxu1 %vm7996_vm2, %v7994_v1 }
0x1cda   : > { %7438 = vmatprep.subr.bf16.mxu1 %v7994_v1 }
0x1cdb   : > { %v5306_v20 = vpop.f32.mrb[12].mxu0 }
0x1cdc   : > { %v7404_v49 = vpop.f32.mrb[13].mxu0  ;;  %v5314_v60 = vpack.c.bf16 %v5306_v20, %v5306_v20 }
0x1cdd   : > { %v5309_v54 = vpop.f32.mrb[14].mxu0 }
0x1cde   : > { %v7405_v47 = vpop.f32.mrb[15].mxu0 }
0x1ce0   : > { %7417 = vmatmul.mubr.msk.bf16.gmra.mrb[188].mxu1 %vm2599_vm7, %v5314_v60 }
0x1ce1   : > { %7439 = vmatpush3.bf16.xpose.msra.mxu1 %v5479_v19  ;;  %7440 = vmatprep.mubr.msk.bf16.mxu1 %vm7996_vm2, %v7994_v1 }
0x1ce2   : > { %7470 = vmatprep.subr.bf16.mxu1 %v7994_v1 }
0x1ce8   : > { %7441 = vmatmul.mubr.msk.bf16.vlgmr.msra.gmra.mrb[192].mxu1 %vm2599_vm7, %v5452_v0 }
0x1ce9   : > { %7444 = vmatprep.mubr.msk.bf16.mxu1 %vm7996_vm2, %v7994_v1 }
0x1cf0   : > { %7445 = vmatmul.mubr.msk.bf16.gmra.mrb[196].mxu1 %vm2599_vm7, %v5454_v24 }
0x1cf1   : > { %7448 = vmatprep.mubr.msk.bf16.mxu1 %vm7996_vm2, %v7994_v1 }
0x1cf8   : > { %7449 = vmatmul.mubr.msk.bf16.gmra.mrb[200].mxu1 %vm2599_vm7, %v5456_v6 }
0x1cf9   : > { %7472 = vmatprep.mubr.msk.bf16.mxu1 %vm7996_vm2, %v7994_v1 }
0x1d8b   : > { %v5429_v48 = vpop.f32.mrb[16].mxu0 }
0x1d8c   : > { %v7424_v7 = vpop.f32.mrb[17].mxu0 }
0x1d8d   : > { %v5432_v11 = vpop.f32.mrb[18].mxu0 }
0x1d8e   : > { %v7425_v25 = vpop.f32.mrb[19].mxu0 }
0x1d93   : > { %v5437_v9 = vpop.f32.mrb[20].mxu0 }
0x1d94   : > { %v7428_v63 = vpop.f32.mrb[21].mxu0 }
0x1d95   : > { %v5440_v13 = vpop.f32.mrb[22].mxu0 }
0x1d96   : > { %v7429_v16 = vpop.f32.mrb[23].mxu0 }
0x1d9b   : > { %v5445_v17 = vpop.f32.mrb[24].mxu0 }
0x1d9c   : > { %v7432_v58 = vpop.f32.mrb[25].mxu0 }
0x1d9d   : > { %v5448_v32 = vpop.f32.mrb[26].mxu0 }
0x1d9e   : > { %v7433_v18 = vpop.f32.mrb[27].mxu0 }
0x1da3   : > { %v5361_v14 = vpop.f32.mrb[180].mxu1 }
0x1da4   : > { %v9713_v45 = vadd.f32 %v5429_v48, %v5361_v14  ;;  %v7410_v15 = vpop.f32.mrb[181].mxu1 }
0x1da5   : > { %v5364_v26 = vpop.f32.mrb[182].mxu1 }
0x1da6   : > { %v9715_v5 = vadd.f32 %v5432_v11, %v5364_v26  ;;  %v7411_v29 = vpop.f32.mrb[183].mxu1 }
0x1dab   : > { %v5369_v50 = vpop.f32.mrb[184].mxu1 }
0x1dac   : > { %v9717_v38 = vadd.f32 %v5437_v9, %v5369_v50  ;;  %v7414_v4 = vpop.f32.mrb[185].mxu1 }
0x1dad   : > { %v5372_v8 = vpop.f32.mrb[186].mxu1 }
0x1dae   : > { %v9719_v35 = vadd.f32 %v5440_v13, %v5372_v8  ;;  %v7415_v39 = vpop.f32.mrb[187].mxu1 }
0x1db3   : > { %v5377_v52 = vpop.f32.mrb[188].mxu1 }
0x1db4   : > { %v9721_v36 = vadd.f32 %v5445_v17, %v5377_v52  ;;  %v7418_v23 = vpop.f32.mrb[189].mxu1 }
0x1db5   : > { %v5380_v57 = vpop.f32.mrb[190].mxu1 }
0x1db6   : > { %v7419_v56 = vpop.f32.mrb[191].mxu1 }
0x1dbb   : > { %v5515_v59 = vpop.f32.mrb[192].mxu1 }
0x1dbc   : > { %v5537_v62 = vmul.f32 0.35355338, %v5515_v59  ;;  %v7442_v41 = vpop.f32.mrb[193].mxu1 }
0x1dbd   : > { %v5518_v10 = vpop.f32.mrb[194].mxu1 }
0x1dbe   : > { %v5538_v42 = vmul.f32 0.35355338, %v5518_v10  ;;  %v7443_v55 = vpop.f32.mrb[195].mxu1  ;;  %v5542_v3 = vsel %vm2679_vm8, %v5537_v62, -inf }
0x1dbf   : > { %5543 = vmax.xlane.f32.xlu0 %v5542_v3 }
0x1dc0   : > { %v5545_v51 = vsel %vm2679_vm8, %v5538_v42, -inf }
0x1dc1   : > { %5546 = vmax.xlane.f32.xlu1 %v5545_v51 }
0x1dc3   : > { %v5523_v21 = vpop.f32.mrb[196].mxu1 }
0x1dc4   : > { %v5539_v61 = vmul.f32 0.35355338, %v5523_v21  ;;  %v7446_v12 = vpop.f32.mrb[197].mxu1 }
0x1dc5   : > { %v5526_v40 = vpop.f32.mrb[198].mxu1 }
0x1dc6   : > { %v5540_v28 = vmul.f32 0.35355338, %v5526_v40  ;;  %v7447_v34 = vpop.f32.mrb[199].mxu1  ;;  %v5548_v43 = vsel %vm2679_vm8, %v5539_v61, -inf }
0x1dc7   : > { %5549 = vmax.xlane.f32.xlu0 %v5548_v43 }
0x1dc8   : > { %v5551_v20 = vsel %vm2679_vm8, %v5540_v28, -inf }
0x1dcb   : > { %5552 = vmax.xlane.f32.xlu0 %v5551_v20  ;;  %v5531_v49 = vpop.f32.mrb[200].mxu1 }
0x1dcc   : > { %v5541_v53 = vmul.f32 0.35355338, %v5531_v49  ;;  %v7450_v54 = vpop.f32.mrb[201].mxu1 }
0x1dcd   : > { %v5534_v60 = vpop.f32.mrb[202].mxu1 }
0x1dce   : > { %v7451_v47 = vpop.f32.mrb[203].mxu1  ;;  %v5554_v19 = vsel %vm2692_vm9, %v5541_v53, -inf }
0x1dcf   : > { %5555 = vmax.xlane.f32.xlu1 %v5554_v19 }
0x1de0   : > { %5602 = vrot.lane.b32.xlu1 %v9580_v30, %s8001_s23 }
0x1de1   : > { %5600 = vrot.lane.b32.xlu0 %v9578_v27, %s8001_s23 }
0x1e4c   : > { %v5544_v0 = vpop.xlane.xlu0 %5543 }
0x1e4d   : > { %v5557_v24 = vsub.f32 %v5537_v62, %v5544_v0 }
0x1e4e   : > { %v5547_v6 = vpop.xlane.xlu1 %5546 }
0x1e4f   : > { %v5562_v48 = vmul.f32 1.442695, %v5557_v24  ;;  %v5558_v7 = vsub.f32 %v5538_v42, %v5547_v6  ;;  %v6448_v24 = vld [vmem:[%s9878_s12 + $0x38] sm:$0xf] }
0x1e50   : > { %v5689_v6 = vsel %vm3057_vm11, %v6448_v24, 0 }
0x1e51   : > { %7946 = vpow2.f32 %v5562_v48  ;;  %v5564_v11 = vmul.f32 1.442695, %v5558_v7  ;;  %7471 = vmatpush3.bf16.msra.mxu1 %v5689_v6 }
0x1e52   : > { %7502 = vmatprep.subr.bf16.mxu1 %v7994_v1 }
0x1e53   : > { %7948 = vpow2.f32 %v5564_v11 }
0x1e54   : > { %v5550_v25 = vpop.xlane.xlu0 %5549 }
0x1e55   : > { %v5559_v14 = vsub.f32 %v5539_v61, %v5550_v25 }
0x1e57   : > { %v5566_v26 = vmul.f32 1.442695, %v5559_v14 }
0x1e58   : > { %v5553_v9 = vpop.xlane.xlu0 %5552 }
0x1e59   : > { %v5560_v15 = vsub.f32 %v5540_v28, %v5553_v9  ;;  %7950 = vpow2.f32 %v5566_v26 }
0x1e5b   : > { %v7947_v63 = vpop.eup %7946  ;;  %v5568_v29 = vmul.f32 1.442695, %v5560_v15 }
0x1e5c   : > { %v5601_v13 = vpop.permute.xlu0 %5600  ;;  %v5556_v16 = vpop.xlane.xlu1 %5555  ;;  %v5572_v17 = vsel %vm2679_vm8, %v7947_v63, 0.0 }
0x1e5d   : > { %v7949_v58 = vpop.eup %7948  ;;  %5573 = vadd.xlane.f32.xlu0 %v5572_v17  ;;  %7453 = vmatpush3.bf16.msra.mxu0 %v5601_v13  ;;  %v5561_v50 = vsub.f32 %v5541_v53, %v5556_v16  ;;  %7952 = vpow2.f32 %v5568_v29 }
0x1e5e   : > { %v5575_v32 = vsel %vm2679_vm8, %v7949_v58, 0.0  ;;  %7454 = vmatprep.subr.bf16.mxu0 %v7994_v1 }
0x1e5f   : > { %5576 = vadd.xlane.f32.xlu1 %v5575_v32  ;;  %v5570_v4 = vmul.f32 1.442695, %v5561_v50 }
0x1e60   : > { %v5603_v18 = vpop.permute.xlu1 %5602 }
0x1e61   : > { %7455 = vmatpush3.bf16.msra.mxu0 %v5603_v18  ;;  %7954 = vpow2.f32 %v5570_v4 }
0x1e62   : > { %7456 = vmatprep.subr.bf16.mxu0 %v7994_v1 }
0x1e63   : > { %v7951_v8 = vpop.eup %7950 }
0x1e64   : > { %v5578_v52 = vsel %vm2679_vm8, %v7951_v8, 0.0 }
0x1e67   : > { %v7953_v39 = vpop.eup %7952 }
0x1e68   : > { %v5581_v23 = vsel %vm2679_vm8, %v7953_v39, 0.0 }
0x1e70   : > { %5758 = vrot.lane.b32.xlu1 %v9424_v31, %s8002_s28  ;;  %v7955_v31 = vpop.eup %7954 }
0x1e71   : > { %v5584_v57 = vsel %vm2692_vm9, %v7955_v31, 0.0 }
0x1e73   : > { %5604 = vrot.lane.b32.xlu0 %v9586_v33, %s8001_s23 }
0x1e92   : > { %5579 = vadd.xlane.f32.xlu0 %v5578_v52 }
0x1e94   : > { %5582 = vadd.xlane.f32.xlu1 %v5581_v23 }
0x1e98   : > { %5585 = vadd.xlane.f32.xlu1 %v5584_v57 }
0x1ea8   : > { %5760 = vrot.lane.b32.xlu0 %v9431_v37, %s8002_s28 }
0x1ea9   : > { %5762 = vrot.lane.b32.xlu1 %v9437_v44, %s8002_s28 }
0x1eac   : > { %5752 = vrot.lane.b32.xlu0 %v9475_v22, %s8002_s28 }
0x1ead   : > { %5754 = vrot.lane.b32.xlu1 %v9490_v2, %s8002_s28 }
0x1eb0   : > { %5756 = vrot.lane.b32.xlu0 %v9500_v46, %s8002_s28 }
0x1eea   : > { %v5574_v56 = vpop.xlane.xlu0 %5573 }
0x1eeb   : > { %7956 = vrcp.f32 %v5574_v56 }
0x1eec   : > { %v5577_v59 = vpop.xlane.xlu1 %5576 }
0x1eed   : > { %7958 = vrcp.f32 %v5577_v59 }
0x1eee   : > { %v5605_v62 = vpop.permute.xlu0 %5604 }
0x1eef   : > { %v5618_v41 = vsel %vm2748_vm10, %v5605_v62, 0 }
0x1ef0   : > { %7457 = vmatpush3.bf16.msra.mxu0 %v5618_v41  ;;  %v5759_v42 = vpop.permute.xlu1 %5758 }
0x1ef1   : > { %7484 = vmatprep.subr.bf16.mxu0 %v7994_v1  ;;  %v5774_v2 = vsel %vm2599_vm7, %v5759_v42, 0 }
0x1ef5   : > { %v7957_v37 = vpop.eup %7956 }
0x1ef6   : > { %v5592_v10 = vmul.f32 %v7957_v37, %v7947_v63 }
0x1ef7   : > { %v7959_v44 = vpop.eup %7958 }
0x1ef8   : > { %v5593_v22 = vmul.f32 %v7959_v44, %v7949_v58 }
0x1efa   : > { %v5597_v55 = vpack.c.bf16 %v5593_v22, %v5592_v10 }
0x1efc   : > { %7459 = vmatmul.mubr.msk.bf16.vlgmr.msra.gmra.mrb[28].mxu0 %vm2679_vm8, %v5597_v55 }
0x1efd   : > { %7485 = vmatpush3.bf16.xpose.msra.mxu0 %v5774_v2  ;;  %7462 = vmatprep.mubr.msk.bf16.mxu0 %vm7996_vm2, %v7994_v1 }
0x1efe   : > { %7486 = vmatprep.subr.bf16.mxu0 %v7994_v1 }
0x1f1f   : > { %v5580_v46 = vpop.xlane.xlu0 %5579 }
0x1f20   : > { %7960 = vrcp.f32 %v5580_v46 }
0x1f21   : > { %v5583_v3 = vpop.xlane.xlu1 %5582 }
0x1f22   : > { %7962 = vrcp.f32 %v5583_v3 }
0x1f23   : > { %v5761_v51 = vpop.permute.xlu0 %5760 }
0x1f24   : > { %v5777_v21 = vsel %vm2599_vm7, %v5761_v51, 0 }
0x1f25   : > { %7487 = vmatpush3.bf16.xpose.msra.mxu0 %v5777_v21  ;;  %v5586_v61 = vpop.xlane.xlu1 %5585 }
0x1f26   : > { %7964 = vrcp.f32 %v5586_v61  ;;  %7488 = vmatprep.subr.bf16.mxu0 %v7994_v1 }
0x1f27   : > { %v5753_v47 = vpop.permute.xlu0 %5752 }
0x1f29   : > { %v5763_v12 = vpop.permute.xlu1 %5762 }
0x1f2a   : > { %v7961_v40 = vpop.eup %7960  ;;  %v5780_v34 = vsel %vm2599_vm7, %v5763_v12, 0 }
0x1f2b   : > { %v5594_v43 = vmul.f32 %v7961_v40, %v7951_v8  ;;  %v5757_v0 = vpop.permute.xlu0 %5756 }
0x1f2c   : > { %v7963_v28 = vpop.eup %7962 }
0x1f2d   : > { %v5595_v20 = vmul.f32 %v7963_v28, %v7953_v39  ;;  %7489 = vmatpush3.bf16.xpose.msra.mxu0 %v5780_v34  ;;  %v5755_v19 = vpop.permute.xlu1 %5754 }
0x1f2e   : > { %7520 = vmatprep.subr.bf16.mxu0 %v7994_v1 }
0x1f2f   : > { %v5598_v49 = vpack.c.bf16 %v5595_v20, %v5594_v43 }
0x1f30   : > { %v7965_v53 = vpop.eup %7964 }
0x1f31   : > { %7463 = vmatmul.mubr.msk.bf16.gmra.mrb[32].mxu0 %vm2679_vm8, %v5598_v49  ;;  %v5596_v54 = vmul.f32 %v7965_v53, %v7955_v31 }
0x1f32   : > { %7466 = vmatprep.mubr.msk.bf16.mxu0 %vm7996_vm2, %v7994_v1 }
0x1f33   : > { %v5599_v60 = vpack.c.bf16 %v5596_v54, %v5596_v54 }
0x1f39   : > { %7467 = vmatmul.mubr.msk.bf16.gmra.mrb[36].mxu0 %vm2679_vm8, %v5599_v60 }
0x1f3a   : > { %7490 = vmatprep.mubr.msk.bf16.mxu0 %vm7996_vm2, %v7994_v1 }
0x1f41   : > { %7491 = vmatmul.mubr.msk.bf16.vlgmr.msra.gmra.mrb[40].mxu0 %vm2599_vm7, %v5753_v47 }
0x1f42   : > { %7494 = vmatprep.mubr.msk.bf16.mxu0 %vm7996_vm2, %v7994_v1 }
0x1f49   : > { %7495 = vmatmul.mubr.msk.bf16.gmra.mrb[44].mxu0 %vm2599_vm7, %v5755_v19 }
0x1f4a   : > { %7498 = vmatprep.mubr.msk.bf16.mxu0 %vm7996_vm2, %v7994_v1 }
0x1f51   : > { %7499 = vmatmul.mubr.msk.bf16.gmra.mrb[48].mxu0 %vm2599_vm7, %v5757_v0 }
0x1f52   : > { %7522 = vmatprep.mubr.msk.bf16.mxu0 %vm7996_vm2, %v7994_v1 }
0x1fcf   : > { %v5654_v48 = vpop.f32.mrb[28].mxu0 }
0x1fd0   : > { %v7460_v7 = vpop.f32.mrb[29].mxu0 }
0x1fd1   : > { %v5657_v11 = vpop.f32.mrb[30].mxu0 }
0x1fd2   : > { %v5676_v25 = vpack.c.bf16 %v5657_v11, %v5654_v48  ;;  %v7461_v9 = vpop.f32.mrb[31].mxu0 }
0x1fd4   : > { %7473 = vmatmul.mubr.msk.bf16.vlgmr.msra.gmra.mrb[204].mxu1 %vm2599_vm7, %v5676_v25 }
0x1fd5   : > { %7476 = vmatprep.mubr.msk.bf16.mxu1 %vm7996_vm2, %v7994_v1 }
0x2004   : > { %v5662_v63 = vpop.f32.mrb[32].mxu0 }
0x2005   : > { %v7464_v13 = vpop.f32.mrb[33].mxu0 }
0x2006   : > { %v5665_v16 = vpop.f32.mrb[34].mxu0 }
0x2007   : > { %v5677_v17 = vpack.c.bf16 %v5665_v16, %v5662_v63  ;;  %v7465_v58 = vpop.f32.mrb[35].mxu0 }
0x2009   : > { %7477 = vmatmul.mubr.msk.bf16.gmra.mrb[208].mxu1 %vm2599_vm7, %v5677_v17 }
0x200a   : > { %7480 = vmatprep.mubr.msk.bf16.mxu1 %vm7996_vm2, %v7994_v1 }
0x200c   : > { %v5670_v32 = vpop.f32.mrb[36].mxu0 }
0x200d   : > { %v7468_v18 = vpop.f32.mrb[37].mxu0  ;;  %v5678_v15 = vpack.c.bf16 %v5670_v32, %v5670_v32 }
0x200e   : > { %v5673_v14 = vpop.f32.mrb[38].mxu0 }
0x200f   : > { %v7469_v26 = vpop.f32.mrb[39].mxu0 }
0x2011   : > { %7481 = vmatmul.mubr.msk.bf16.gmra.mrb[212].mxu1 %vm2599_vm7, %v5678_v15 }
0x2012   : > { %7508 = vmatprep.mubr.msk.bf16.mxu1 %vm7996_vm2, %v7994_v1 }
0x2014   : > { %v5816_v29 = vpop.f32.mrb[40].mxu0 }
0x2015   : > { %v5838_v50 = vmul.f32 0.35355338, %v5816_v29  ;;  %v7492_v4 = vpop.f32.mrb[41].mxu0 }
0x2016   : > { %v5819_v8 = vpop.f32.mrb[42].mxu0 }
0x2017   : > { %v5839_v39 = vmul.f32 0.35355338, %v5819_v8  ;;  %v7493_v52 = vpop.f32.mrb[43].mxu0  ;;  %v5843_v23 = vsel %vm2679_vm8, %v5838_v50, -inf }
0x2018   : > { %5844 = vmax.xlane.f32.xlu1 %v5843_v23 }
0x2019   : > { %v5846_v31 = vsel %vm2679_vm8, %v5839_v39, -inf }
0x201a   : > { %5847 = vmax.xlane.f32.xlu0 %v5846_v31 }
0x201c   : > { %v5824_v57 = vpop.f32.mrb[44].mxu0 }
0x201d   : > { %v5840_v56 = vmul.f32 0.35355338, %v5824_v57  ;;  %v7496_v59 = vpop.f32.mrb[45].mxu0 }
0x201e   : > { %v5827_v62 = vpop.f32.mrb[46].mxu0 }
0x201f   : > { %v5841_v41 = vmul.f32 0.35355338, %v5827_v62  ;;  %v7497_v37 = vpop.f32.mrb[47].mxu0  ;;  %v5849_v44 = vsel %vm2679_vm8, %v5840_v56, -inf }
0x2020   : > { %5850 = vmax.xlane.f32.xlu0 %v5849_v44 }
0x2021   : > { %v5852_v10 = vsel %vm2679_vm8, %v5841_v41, -inf }
0x2022   : > { %5853 = vmax.xlane.f32.xlu1 %v5852_v10 }
0x2024   : > { %v5832_v22 = vpop.f32.mrb[48].mxu0 }
0x2025   : > { %v5842_v42 = vmul.f32 0.35355338, %v5832_v22  ;;  %v7500_v55 = vpop.f32.mrb[49].mxu0 }
0x2026   : > { %v5835_v2 = vpop.f32.mrb[50].mxu0 }
0x2027   : > { %v7501_v46 = vpop.f32.mrb[51].mxu0  ;;  %v5855_v3 = vsel %vm2692_vm9, %v5842_v42, -inf }
0x2028   : > { %5856 = vmax.xlane.f32.xlu0 %v5855_v3 }
0x20a5   : > { %v5845_v51 = vpop.xlane.xlu1 %5844 }
0x20a6   : > { %v5858_v21 = vsub.f32 %v5838_v50, %v5845_v51 }
0x20a7   : > { %v5725_v61 = vpop.f32.mrb[204].mxu1  ;;  %v5848_v12 = vpop.xlane.xlu0 %5847 }
0x20a8   : > { %v5863_v40 = vmul.f32 1.442695, %v5858_v21  ;;  %v9799_v28 = vadd.f32 %v5725_v61, %v9713_v45  ;;  %v5859_v34 = vsub.f32 %v5839_v39, %v5848_v12  ;;  %v7474_v43 = vpop.f32.mrb[205].mxu1  ;;  %v6486_v12 = vld [vmem:[%s9879_s13 + $0x4] ss:$0 sm:$0xff] }
0x20a9   : > { %v5728_v20 = vpop.f32.mrb[206].mxu1 }
0x20aa   : > { %7966 = vpow2.f32 %v5863_v40  ;;  %v5865_v49 = vmul.f32 1.442695, %v5859_v34  ;;  %v9802_v53 = vadd.f32 %v5728_v20, %v9715_v5  ;;  %v7475_v54 = vpop.f32.mrb[207].mxu1 }
0x20ac   : > { %7968 = vpow2.f32 %v5865_v49 }
0x20ad   : > { %v5851_v60 = vpop.xlane.xlu0 %5850 }
0x20ae   : > { %v5860_v47 = vsub.f32 %v5840_v56, %v5851_v60 }
0x20af   : > { %v5854_v19 = vpop.xlane.xlu1 %5853 }
0x20b0   : > { %v5867_v0 = vmul.f32 1.442695, %v5860_v47  ;;  %v5861_v24 = vsub.f32 %v5841_v41, %v5854_v19 }
0x20b2   : > { %7970 = vpow2.f32 %v5867_v0  ;;  %v5869_v6 = vmul.f32 1.442695, %v5861_v24 }
0x20b4   : > { %v7967_v48 = vpop.eup %7966  ;;  %7972 = vpow2.f32 %v5869_v6 }
0x20b5   : > { %v5873_v45 = vsel %vm2679_vm8, %v7967_v48, 0.0  ;;  %v5857_v13 = vpop.xlane.xlu0 %5856 }
0x20b6   : > { %v7969_v7 = vpop.eup %7968  ;;  %5874 = vadd.xlane.f32.xlu1 %v5873_v45  ;;  %v5862_v17 = vsub.f32 %v5842_v42, %v5857_v13 }
0x20b7   : > { %v5876_v11 = vsel %vm2679_vm8, %v7969_v7, 0.0 }
0x20b8   : > { %5877 = vadd.xlane.f32.xlu0 %v5876_v11  ;;  %v5871_v26 = vmul.f32 1.442695, %v5862_v17 }
0x20ba   : > { %7974 = vpow2.f32 %v5871_v26 }
0x20bc   : > { %v7971_v5 = vpop.eup %7970 }
0x20bd   : > { %v5879_v25 = vsel %vm2679_vm8, %v7971_v5, 0.0 }
0x20be   : > { %v7973_v9 = vpop.eup %7972  ;;  %5880 = vadd.xlane.f32.xlu1 %v5879_v25 }
0x20bf   : > { %v5882_v63 = vsel %vm2679_vm8, %v7973_v9, 0.0 }
0x20c0   : > { %5883 = vadd.xlane.f32.xlu0 %v5882_v63 }
0x20c4   : > { %v7975_v8 = vpop.eup %7974 }
0x20c5   : > { %v5885_v39 = vsel %vm2692_vm9, %v7975_v8, 0.0 }
0x20cf   : > { %5903 = vrot.lane.b32.xlu1 %v9580_v30, %s8002_s28 }
0x20d6   : > { %5901 = vrot.lane.b32.xlu0 %v9578_v27, %s8002_s28 }
0x20da   : > { %6059 = vrot.lane.b32.xlu0 %v6486_v12, %s7997_s16  ;;  %s7569_s16 = smul.u32 40, %s9882_s30 }
0x20dc   : > { %v5733_v16 = vpop.f32.mrb[208].mxu1  ;;  %s481_s20 = scalar_lea.vmem %s9880_s14, %s7569_s16 }
0x20dd   : > { %v9813_v58 = vadd.f32 %v5733_v16, %v9717_v38  ;;  %v7478_v32 = vpop.f32.mrb[209].mxu1  ;;  %v6449_v38 = vld [vmem:[%s9878_s12 + $0x3c] sm:$0xf] }
0x20de   : > { %v5736_v18 = vpop.f32.mrb[210].mxu1 }
0x20df   : > { %v9816_v14 = vadd.f32 %v5736_v18, %v9719_v35  ;;  %v7479_v15 = vpop.f32.mrb[211].mxu1  ;;  %v5990_v35 = vsel %vm3057_vm11, %v6449_v38, 0 }
0x20e0   : > { %7521 = vmatpush3.bf16.msra.mxu0 %v5990_v35 }
0x20e4   : > { %v5741_v29 = vpop.f32.mrb[212].mxu1 }
0x20e5   : > { %v9819_v30 = vadd.f32 %v5741_v29, %v9721_v36  ;;  %v7482_v50 = vpop.f32.mrb[213].mxu1 }
0x20e6   : > { %v5744_v27 = vpop.f32.mrb[214].mxu1 }
0x20e7   : > { %v7483_v4 = vpop.f32.mrb[215].mxu1 }
0x20f3   : > { %5886 = vadd.xlane.f32.xlu1 %v5885_v39 }
0x2104   : > { %5905 = vrot.lane.b32.xlu1 %v9586_v33, %s8002_s28 }
0x2143   : > { %v5875_v36 = vpop.xlane.xlu1 %5874 }
0x2145   : > { %v5878_v52 = vpop.xlane.xlu0 %5877 }
0x2146   : > { %7976 = vrcp.f32 %v5878_v52 }
0x2147   : > { %7978 = vrcp.f32 %v5875_v36 }
0x214b   : > { %v5881_v31 = vpop.xlane.xlu1 %5880 }
0x214d   : > { %v5884_v23 = vpop.xlane.xlu0 %5883 }
0x214e   : > { %7980 = vrcp.f32 %v5884_v23 }
0x214f   : > { %v5904_v56 = vpop.permute.xlu1 %5903  ;;  %7982 = vrcp.f32 %v5881_v31 }
0x2150   : > { %v7977_v33 = vpop.eup %7976 }
0x2151   : > { %v5902_v57 = vpop.permute.xlu0 %5901  ;;  %v7979_v62 = vpop.eup %7978  ;;  %v5894_v41 = vmul.f32 %v7977_v33, %v7969_v7 }
0x2152   : > { %7503 = vmatpush3.bf16.msra.mxu1 %v5902_v57  ;;  %v5893_v44 = vmul.f32 %v7979_v62, %v7967_v48 }
0x2153   : > { %7504 = vmatprep.subr.bf16.mxu1 %v7994_v1 }
0x2154   : > { %v5898_v22 = vpack.c.bf16 %v5894_v41, %v5893_v44 }
0x2156   : > { %7505 = vmatpush3.bf16.msra.mxu1 %v5904_v56 }
0x2157   : > { %7506 = vmatprep.subr.bf16.mxu1 %v7994_v1 }
0x2158   : > { %v7981_v42 = vpop.eup %7980 }
0x2159   : > { %v7983_v55 = vpop.eup %7982  ;;  %v5896_v2 = vmul.f32 %v7981_v42, %v7973_v9 }
0x215a   : > { %v5895_v46 = vmul.f32 %v7983_v55, %v7971_v5  ;;  %v6060_v5 = vpop.permute.xlu0 %6059 }
0x215c   : > { %v5899_v3 = vpack.c.bf16 %v5896_v2, %v5895_v46 }
0x2180   : > { %v5887_v59 = vpop.xlane.xlu1 %5886 }
0x2181   : > { %7984 = vrcp.f32 %v5887_v59 }
0x2184   : > { %v5906_v37 = vpop.permute.xlu1 %5905 }
0x2185   : > { %v5919_v10 = vsel %vm2748_vm10, %v5906_v37, 0 }
0x2186   : > { %7507 = vmatpush3.bf16.msra.mxu1 %v5919_v10 }
0x2189   : > { %7509 = vmatmul.mubr.msk.bf16.vlgmr.msra.gmra.mrb[216].mxu1 %vm2679_vm8, %v5898_v22 }
0x218a   : > { %7512 = vmatprep.mubr.msk.bf16.mxu1 %vm7996_vm2, %v7994_v1 }
0x218b   : > { %v7985_v51 = vpop.eup %7984 }
0x218c   : > { %v5897_v21 = vmul.f32 %v7985_v51, %v7975_v8 }
0x218e   : > { %v5900_v61 = vpack.c.bf16 %v5897_v21, %v5897_v21 }
0x2191   : > { %7513 = vmatmul.mubr.msk.bf16.gmra.mrb[220].mxu1 %vm2679_vm8, %v5899_v3 }
0x2192   : > { %7516 = vmatprep.mubr.msk.bf16.mxu1 %vm7996_vm2, %v7994_v1 }
0x2199   : > { %7517 = vmatmul.mubr.msk.bf16.gmra.mrb[224].mxu1 %vm2679_vm8, %v5900_v61 }
0x225c   : > { %v5955_v40 = vpop.f32.mrb[216].mxu1 }
0x225d   : > { %v7510_v34 = vpop.f32.mrb[217].mxu1 }
0x225e   : > { %v5958_v43 = vpop.f32.mrb[218].mxu1 }
0x225f   : > { %v5977_v20 = vpack.c.bf16 %v5958_v43, %v5955_v40  ;;  %v7511_v49 = vpop.f32.mrb[219].mxu1 }
0x2261   : > { %7523 = vmatmul.mubr.msk.bf16.vlgmr.msra.gmra.mrb[52].mxu0 %vm2599_vm7, %v5977_v20 }
0x2262   : > { %7526 = vmatprep.mubr.msk.bf16.mxu0 %vm7996_vm2, %v7994_v1 }
0x2264   : > { %v5963_v54 = vpop.f32.mrb[220].mxu1 }
0x2265   : > { %v7514_v60 = vpop.f32.mrb[221].mxu1 }
0x2266   : > { %v5966_v47 = vpop.f32.mrb[222].mxu1 }
0x2267   : > { %v5978_v19 = vpack.c.bf16 %v5966_v47, %v5963_v54  ;;  %v7515_v0 = vpop.f32.mrb[223].mxu1 }
0x2269   : > { %7527 = vmatmul.mubr.msk.bf16.gmra.mrb[56].mxu0 %vm2599_vm7, %v5978_v19 }
0x226a   : > { %7530 = vmatprep.mubr.msk.bf16.mxu0 %vm7996_vm2, %v7994_v1 }
0x226c   : > { %v5971_v24 = vpop.f32.mrb[224].mxu1 }
0x226d   : > { %v7518_v6 = vpop.f32.mrb[225].mxu1  ;;  %v5979_v45 = vpack.c.bf16 %v5971_v24, %v5971_v24 }
0x226e   : > { %v5974_v48 = vpop.f32.mrb[226].mxu1 }
0x226f   : > { %v7519_v7 = vpop.f32.mrb[227].mxu1 }
0x2271   : > { %7531 = vmatmul.mubr.msk.bf16.gmra.mrb[60].mxu0 %vm2599_vm7, %v5979_v45 }
0x2334   : > { %v6026_v11 = vpop.f32.mrb[52].mxu0 }
0x2335   : > { %v6048_v25 = vadd.f32 %v6026_v11, %v9799_v28  ;;  %v7524_v9 = vpop.f32.mrb[53].mxu0 }
0x2336   : > { %v6029_v63 = vpop.f32.mrb[54].mxu0 }
0x2337   : > { %v6062_v13 = vadd.f32 %v6060_v5, %v6048_v25  ;;  %v6049_v1 = vadd.f32 %v6029_v63, %v9802_v53  ;;  %v7525_v16 = vpop.f32.mrb[55].mxu0 }
0x2339   : > { %6067 = vst.msk [vmem:[%s481_s20] sm:$0xff] %vm719_vm5, %v6062_v13  ;;  %v6063_v17 = vadd.f32 %v6060_v5, %v6049_v1 }
0x233b   : > { %6068 = vst.msk [vmem:[%s481_s20 + $0x8] sm:$0xff] %vm719_vm5, %v6063_v17 }
0x233c   : > { %v6034_v32 = vpop.f32.mrb[56].mxu0 }
0x233d   : > { %v6050_v18 = vadd.f32 %v6034_v32, %v9813_v58  ;;  %v7528_v15 = vpop.f32.mrb[57].mxu0 }
0x233e   : > { %v6037_v28 = vpop.f32.mrb[58].mxu0 }
0x233f   : > { %v6064_v26 = vadd.f32 %v6060_v5, %v6050_v18  ;;  %v6051_v29 = vadd.f32 %v6037_v28, %v9816_v14  ;;  %v7529_v50 = vpop.f32.mrb[59].mxu0 }
0x2341   : > { %6069 = vst.msk [vmem:[%s481_s20 + $0x10] sm:$0xff] %vm719_vm5, %v6064_v26  ;;  %v6065_v27 = vadd.f32 %v6060_v5, %v6051_v29 }
0x2343   : > { %6070 = vst.msk [vmem:[%s481_s20 + $0x18] sm:$0xff] %vm719_vm5, %v6065_v27 }
0x2344   : > { %v6042_v53 = vpop.f32.mrb[60].mxu0 }
0x2345   : > { %v6052_v4 = vadd.f32 %v6042_v53, %v9819_v30  ;;  %v7532_v8 = vpop.f32.mrb[61].mxu0 }
0x2346   : > { %v6045_v39 = vpop.f32.mrb[62].mxu0 }
0x2347   : > { %v6066_v38 = vadd.f32 %v6060_v5, %v6052_v4  ;;  %v7533_v35 = vpop.f32.mrb[63].mxu0 }
0x2349   : > { %6071 = vst.msk [vmem:[%s481_s20 + $0x20] sm:$0x3] %vm2274_vm6, %v6066_v38 }
0x234a PF: > { %s24_s29 = sadd.s32 1, %s7992_s29  }
0x234b   : > { %p21_p4 = scmp.ge.s32.totalorder %s24_s29, 4  }
0x234d   :  { %23 = sbr.rel (!%p21_p4) target bundleno = 1 (0x1), region = 119 }

</bundles_post_ra>
